<compile_context>
chip_gen: v6e
topology: v6e:2x2x1
jax: 0.10.0
libtpu: 0.0.40
codegen_flags: <defaults>
</compile_context>

<pallas_src>
import functools

import jax
import jax.numpy as jnp
from jax import lax
from jax.experimental import pallas as pl
from jax.experimental.pallas import tpu as pltpu

N_CLASSES = 10
N_PAD = 128            # lane-padded class dim (lane-dense stores / softmax)
HIDDEN = 64
HIDDEN_PAD = 128       # lane-padded hidden dim (perf review: pad 64 -> 128)
OUT_CH = 16            # conv output channels
OUT_HW = 14            # conv output spatial (28 with stride 2)
POS = OUT_HW * OUT_HW  # 196 output positions
IN_PIX = 28 * 28       # 784


# ----------------------------------------------------------------------------
# Fused Pallas kernel: 9-tap conv -> MLP -> gumbel-softmax (hard=False)
# ----------------------------------------------------------------------------
def _fused_mnist_kernel(wc_ref, bc_ref, p_ref, w1_ref, b1_ref, w2_ref,
                        b2_ref, u_ref, o_ref, *, inv_temperature, center,
                        n_classes, eps):
    b, n_pad = o_ref.shape

    # ---- backbone conv + first MLP layer, fused per output channel ---------
    # p_ref[k] is the (b, 196) stride-2 tap k of the zero-padded image.
    # feat_c = relu(bias_c + sum_k wc[c,k] * tap_k)   -> 144 VPU FMAs total,
    # then accumulate its contribution to the hidden layer with a small
    # (b,196)@(196,128) MXU matmul -> no (b,3136) reshape, no dense conv matrix.
    h = jnp.zeros((b, HIDDEN_PAD), jnp.float32)
    for c in range(OUT_CH):
        fc = wc_ref[c, 0] * p_ref[0]
        for k in range(1, 9):
            fc = fc + wc_ref[c, k] * p_ref[k]
        fc = jnp.maximum(fc + bc_ref[c], 0.0)                 # f32 elementwise
        h = h + jnp.dot(fc.astype(jnp.bfloat16), w1_ref[c],
                        preferred_element_type=jnp.float32)

    # ---- MLP head: hidden ReLU -> logits (128 lanes, 10 real classes) -------
    h = jnp.maximum(h + b1_ref[...], 0.0)
    logits = jnp.dot(h.astype(jnp.bfloat16), w2_ref[...],
                     preferred_element_type=jnp.float32)
    logits = logits + b2_ref[...] - center

    # ---- gumbel-softmax sample (hard=False), all f32 ------------------------
    u = u_ref[...]
    g = -jnp.log(-jnp.log(u + eps) + eps)                     # sample_gumbel
    y = (logits + g) * inv_temperature

    # lane-padded, numerically stable softmax over the 10 real classes
    lane = lax.broadcasted_iota(jnp.int32, (b, n_pad), 1)
    y = jnp.where(lane < n_classes, y, -1e30)
    y = y - jnp.max(y, axis=1, keepdims=True)
    e = jnp.exp(y)
    o_ref[...] = (e / jnp.sum(e, axis=1, keepdims=True)).astype(o_ref.dtype)


# ----------------------------------------------------------------------------
# Wrapper: tap extraction (tiny layout plumbing), noise, one pallas_call
# ----------------------------------------------------------------------------
def _extract_patches(x):
    """9 stride-2 shifted taps of the zero-padded 28x28 image.

    tap[k][bi, oh*14+ow] = x_pad[bi, 2*oh + kh, 2*ow + kw]  (pad=1, k=kh*3+kw)
    """
    b = x.shape[0]
    img = x.reshape(b, 28, 28)
    xp = jnp.pad(img, ((0, 0), (1, 1), (1, 1)))               # (b, 30, 30)
    taps = []
    for kh in range(3):
        for kw in range(3):
            taps.append(xp[:, kh:kh + 28:2, kw:kw + 28:2].reshape(b, POS))
    return jnp.stack(taps, axis=0)                            # (9, b, 196)


def mnist_classifier_forward(x, params, key, *, temperature=1.0, center=0.0):
    b = x.shape[0]
    patches = _extract_patches(x)
    # torch.rand equivalent; drawn outside the kernel (pltpu.prng_* has no
    # interpret/CPU lowering).  Tiny: b x 128 f32.
    u = jax.random.uniform(key, (b, N_PAD), dtype=jnp.float32)

    kernel = functools.partial(
        _fused_mnist_kernel,
        inv_temperature=float(1.0 / temperature),
        center=float(center),
        n_classes=N_CLASSES,
        eps=1e-12,
    )
    out = pl.pallas_call(
        kernel,
        out_shape=jax.ShapeDtypeStruct((b, N_PAD), jnp.float32),
        in_specs=[
            pl.BlockSpec(memory_space=pltpu.MemorySpace.SMEM),   # wc (16, 9)
            pl.BlockSpec(memory_space=pltpu.MemorySpace.SMEM),   # bc (16,)
            pl.BlockSpec(patches.shape, lambda: (0, 0, 0)),      # taps
            pl.BlockSpec(params["w1"].shape, lambda: (0, 0, 0)), # (16,196,128)
            pl.BlockSpec(params["b1"].shape, lambda: (0, 0)),    # (1,128)
            pl.BlockSpec(params["w2"].shape, lambda: (0, 0)),    # (128,128)
            pl.BlockSpec(params["b2"].shape, lambda: (0, 0)),    # (1,128)
            pl.BlockSpec((b, N_PAD), lambda: (0, 0)),            # uniform noise
        ],
        out_specs=pl.BlockSpec((b, N_PAD), lambda: (0, 0)),
    )(params["wc"], params["bc"], patches, params["w1"], params["b1"],
      params["w2"], params["b2"], u)
    return out[:, :N_CLASSES]


# ----------------------------------------------------------------------------
# Init-time weight construction / padding (runs once, outside the forward)
# ----------------------------------------------------------------------------
def init_params(key):
    ks = jax.random.split(key, 6)
    scale = 0.05
    conv_w = scale * jax.random.normal(ks[0], (OUT_CH, 3, 3, 3), jnp.float32)
    conv_b = scale * jax.random.normal(ks[1], (OUT_CH,), jnp.float32)
    # w1 defined directly as (out_ch, pos, hidden); for real torch weights use
    # w1[c, pos, hid] = w1_torch[hid, c*196 + pos]  (NCHW flatten order).
    w1 = scale * jax.random.normal(ks[2], (OUT_CH, POS, HIDDEN), jnp.float32)
    b1 = scale * jax.random.normal(ks[3], (HIDDEN,), jnp.float32)
    w2 = scale * jax.random.normal(ks[4], (HIDDEN, N_CLASSES), jnp.float32)
    b2 = scale * jax.random.normal(ks[5], (N_CLASSES,), jnp.float32)

    # channel-broadcast fold: forward() expands the single input channel to 3
    # identical channels, so sum the conv weight over input channels.
    wc = jnp.sum(conv_w, axis=1).reshape(OUT_CH, 9)            # (16, 9)

    # zero-pad hidden 64 -> 128 and classes 10 -> 128 (lane-dense everywhere)
    w1p = jnp.zeros((OUT_CH, POS, HIDDEN_PAD), jnp.float32).at[..., :HIDDEN].set(w1)
    b1p = jnp.zeros((1, HIDDEN_PAD), jnp.float32).at[0, :HIDDEN].set(b1)
    w2p = jnp.zeros((HIDDEN_PAD, N_PAD), jnp.float32).at[:HIDDEN, :N_CLASSES].set(w2)
    b2p = jnp.zeros((1, N_PAD), jnp.float32).at[0, :N_CLASSES].set(b2)

    return {
        "wc": wc,                                  # (16, 9)  f32, SMEM scalars
        "bc": conv_b,                              # (16,)    f32, SMEM scalars
        "w1": w1p.astype(jnp.bfloat16),            # (16, 196, 128)
        "b1": b1p,                                 # (1, 128) f32
        "w2": w2p.astype(jnp.bfloat16),            # (128, 128)
        "b2": b2p,                                 # (1, 128) f32
    }


if __name__ == "__main__":
    root = jax.random.PRNGKey(0)
    k_params, k_x, k_noise = jax.random.split(root, 3)

    params = init_params(k_params)
    x = jax.random.uniform(k_x, (2, IN_PIX), dtype=jnp.float32)  # batch=2 MNIST

    fwd = jax.jit(
        functools.partial(mnist_classifier_forward, temperature=1.0, center=0.0)
    )
    y = fwd(x, params, k_noise)
    jax.block_until_ready(y)

    assert y.shape == (2, N_CLASSES)
    assert bool(jnp.all(jnp.isfinite(y)))
    assert bool(jnp.all(y >= 0.0))
    # rows of a softmax sum to 1
    assert bool(jnp.allclose(jnp.sum(y, axis=1), 1.0, atol=1e-5))
    print("KERNEL_OK")
</pallas_src>

<mosaic_0001>
module attributes {stable_mosaic.version = 11 : i64} {
  func.func @_fused_mnist_kernel(%arg0: memref<16x9xf32, #tpu.memory_space<smem>>, %arg1: memref<16xf32, #tpu.memory_space<smem>>, %arg2: memref<9x2x196xf32, #tpu.memory_space<vmem>>, %arg3: memref<16x196x128xbf16, #tpu.memory_space<vmem>>, %arg4: memref<1x128xf32, #tpu.memory_space<vmem>>, %arg5: memref<128x128xbf16, #tpu.memory_space<vmem>>, %arg6: memref<1x128xf32, #tpu.memory_space<vmem>>, %arg7: memref<2x128xf32, #tpu.memory_space<vmem>>, %arg8: memref<2x128xf32, #tpu.memory_space<vmem>>) attributes {dimension_semantics = [], scalar_prefetch = 0 : i64, scratch_operands = 0 : i64, tpu.core_type = #tpu.core_type<tc>} {
    %cst = arith.constant 0.000000e+00 : f32
    %0 = vector.broadcast %cst : f32 to vector<2x128xf32>
    %c0 = arith.constant 0 : index
    %c0_0 = arith.constant 0 : index
    %1 = memref.load %arg0[%c0, %c0_0] : memref<16x9xf32, #tpu.memory_space<smem>>
    %c0_1 = arith.constant 0 : index
    %c0_2 = arith.constant 0 : index
    %c0_3 = arith.constant 0 : index
    %2 = vector.load %arg2[%c0_1, %c0_2, %c0_3] : memref<9x2x196xf32, #tpu.memory_space<vmem>>, vector<1x2x196xf32>
    %3 = vector.shape_cast %2 : vector<1x2x196xf32> to vector<2x196xf32>
    %4 = vector.broadcast %1 : f32 to vector<2x196xf32>
    %5 = arith.mulf %4, %3 : vector<2x196xf32>
    %c0_4 = arith.constant 0 : index
    %c1 = arith.constant 1 : index
    %6 = memref.load %arg0[%c0_4, %c1] : memref<16x9xf32, #tpu.memory_space<smem>>
    %c1_5 = arith.constant 1 : index
    %c0_6 = arith.constant 0 : index
    %c0_7 = arith.constant 0 : index
    %7 = vector.load %arg2[%c1_5, %c0_6, %c0_7] : memref<9x2x196xf32, #tpu.memory_space<vmem>>, vector<1x2x196xf32>
    %8 = vector.shape_cast %7 : vector<1x2x196xf32> to vector<2x196xf32>
    %9 = vector.broadcast %6 : f32 to vector<2x196xf32>
    %10 = arith.mulf %9, %8 : vector<2x196xf32>
    %11 = arith.addf %5, %10 : vector<2x196xf32>
    %c0_8 = arith.constant 0 : index
    %c2 = arith.constant 2 : index
    %12 = memref.load %arg0[%c0_8, %c2] : memref<16x9xf32, #tpu.memory_space<smem>>
    %c2_9 = arith.constant 2 : index
    %c0_10 = arith.constant 0 : index
    %c0_11 = arith.constant 0 : index
    %13 = vector.load %arg2[%c2_9, %c0_10, %c0_11] : memref<9x2x196xf32, #tpu.memory_space<vmem>>, vector<1x2x196xf32>
    %14 = vector.shape_cast %13 : vector<1x2x196xf32> to vector<2x196xf32>
    %15 = vector.broadcast %12 : f32 to vector<2x196xf32>
    %16 = arith.mulf %15, %14 : vector<2x196xf32>
    %17 = arith.addf %11, %16 : vector<2x196xf32>
    %c0_12 = arith.constant 0 : index
    %c3 = arith.constant 3 : index
    %18 = memref.load %arg0[%c0_12, %c3] : memref<16x9xf32, #tpu.memory_space<smem>>
    %c3_13 = arith.constant 3 : index
    %c0_14 = arith.constant 0 : index
    %c0_15 = arith.constant 0 : index
    %19 = vector.load %arg2[%c3_13, %c0_14, %c0_15] : memref<9x2x196xf32, #tpu.memory_space<vmem>>, vector<1x2x196xf32>
    %20 = vector.shape_cast %19 : vector<1x2x196xf32> to vector<2x196xf32>
    %21 = vector.broadcast %18 : f32 to vector<2x196xf32>
    %22 = arith.mulf %21, %20 : vector<2x196xf32>
    %23 = arith.addf %17, %22 : vector<2x196xf32>
    %c0_16 = arith.constant 0 : index
    %c4 = arith.constant 4 : index
    %24 = memref.load %arg0[%c0_16, %c4] : memref<16x9xf32, #tpu.memory_space<smem>>
    %c4_17 = arith.constant 4 : index
    %c0_18 = arith.constant 0 : index
    %c0_19 = arith.constant 0 : index
    %25 = vector.load %arg2[%c4_17, %c0_18, %c0_19] : memref<9x2x196xf32, #tpu.memory_space<vmem>>, vector<1x2x196xf32>
    %26 = vector.shape_cast %25 : vector<1x2x196xf32> to vector<2x196xf32>
    %27 = vector.broadcast %24 : f32 to vector<2x196xf32>
    %28 = arith.mulf %27, %26 : vector<2x196xf32>
    %29 = arith.addf %23, %28 : vector<2x196xf32>
    %c0_20 = arith.constant 0 : index
    %c5 = arith.constant 5 : index
    %30 = memref.load %arg0[%c0_20, %c5] : memref<16x9xf32, #tpu.memory_space<smem>>
    %c5_21 = arith.constant 5 : index
    %c0_22 = arith.constant 0 : index
    %c0_23 = arith.constant 0 : index
    %31 = vector.load %arg2[%c5_21, %c0_22, %c0_23] : memref<9x2x196xf32, #tpu.memory_space<vmem>>, vector<1x2x196xf32>
    %32 = vector.shape_cast %31 : vector<1x2x196xf32> to vector<2x196xf32>
    %33 = vector.broadcast %30 : f32 to vector<2x196xf32>
    %34 = arith.mulf %33, %32 : vector<2x196xf32>
    %35 = arith.addf %29, %34 : vector<2x196xf32>
    %c0_24 = arith.constant 0 : index
    %c6 = arith.constant 6 : index
    %36 = memref.load %arg0[%c0_24, %c6] : memref<16x9xf32, #tpu.memory_space<smem>>
    %c6_25 = arith.constant 6 : index
    %c0_26 = arith.constant 0 : index
    %c0_27 = arith.constant 0 : index
    %37 = vector.load %arg2[%c6_25, %c0_26, %c0_27] : memref<9x2x196xf32, #tpu.memory_space<vmem>>, vector<1x2x196xf32>
    %38 = vector.shape_cast %37 : vector<1x2x196xf32> to vector<2x196xf32>
    %39 = vector.broadcast %36 : f32 to vector<2x196xf32>
    %40 = arith.mulf %39, %38 : vector<2x196xf32>
    %41 = arith.addf %35, %40 : vector<2x196xf32>
    %c0_28 = arith.constant 0 : index
    %c7 = arith.constant 7 : index
    %42 = memref.load %arg0[%c0_28, %c7] : memref<16x9xf32, #tpu.memory_space<smem>>
    %c7_29 = arith.constant 7 : index
    %c0_30 = arith.constant 0 : index
    %c0_31 = arith.constant 0 : index
    %43 = vector.load %arg2[%c7_29, %c0_30, %c0_31] : memref<9x2x196xf32, #tpu.memory_space<vmem>>, vector<1x2x196xf32>
    %44 = vector.shape_cast %43 : vector<1x2x196xf32> to vector<2x196xf32>
    %45 = vector.broadcast %42 : f32 to vector<2x196xf32>
    %46 = arith.mulf %45, %44 : vector<2x196xf32>
    %47 = arith.addf %41, %46 : vector<2x196xf32>
    %c0_32 = arith.constant 0 : index
    %c8 = arith.constant 8 : index
    %48 = memref.load %arg0[%c0_32, %c8] : memref<16x9xf32, #tpu.memory_space<smem>>
    %c8_33 = arith.constant 8 : index
    %c0_34 = arith.constant 0 : index
    %c0_35 = arith.constant 0 : index
    %49 = vector.load %arg2[%c8_33, %c0_34, %c0_35] : memref<9x2x196xf32, #tpu.memory_space<vmem>>, vector<1x2x196xf32>
    %50 = vector.shape_cast %49 : vector<1x2x196xf32> to vector<2x196xf32>
    %51 = vector.broadcast %48 : f32 to vector<2x196xf32>
    %52 = arith.mulf %51, %50 : vector<2x196xf32>
    %53 = arith.addf %47, %52 : vector<2x196xf32>
    %c0_36 = arith.constant 0 : index
    %54 = memref.load %arg1[%c0_36] : memref<16xf32, #tpu.memory_space<smem>>
    %55 = vector.broadcast %54 : f32 to vector<2x196xf32>
    %56 = arith.addf %53, %55 : vector<2x196xf32>
    %cst_37 = arith.constant 0.000000e+00 : f32
    %57 = vector.broadcast %cst_37 : f32 to vector<2x196xf32>
    %58 = arith.maximumf %56, %57 : vector<2x196xf32>
    %59 = arith.truncf %58 : vector<2x196xf32> to vector<2x196xbf16>
    %c0_38 = arith.constant 0 : index
    %c0_39 = arith.constant 0 : index
    %c0_40 = arith.constant 0 : index
    %60 = vector.load %arg3[%c0_38, %c0_39, %c0_40] : memref<16x196x128xbf16, #tpu.memory_space<vmem>>, vector<1x196x128xbf16>
    %61 = vector.shape_cast %60 : vector<1x196x128xbf16> to vector<196x128xbf16>
    %cst_41 = arith.constant dense<0.000000e+00> : vector<2x128xf32>
    %62 = tpu.matmul %59, %61, %cst_41 {dimension_numbers = #tpu.dot_dimension_numbers<[1], [0], [0], [1], [0, 0, 1, 1], [], []>} : vector<2x196xbf16>, vector<196x128xbf16>, vector<2x128xf32> -> vector<2x128xf32>
    %63 = arith.addf %0, %62 : vector<2x128xf32>
    %c1_42 = arith.constant 1 : index
    %c0_43 = arith.constant 0 : index
    %64 = memref.load %arg0[%c1_42, %c0_43] : memref<16x9xf32, #tpu.memory_space<smem>>
    %c0_44 = arith.constant 0 : index
    %c0_45 = arith.constant 0 : index
    %c0_46 = arith.constant 0 : index
    %65 = vector.load %arg2[%c0_44, %c0_45, %c0_46] : memref<9x2x196xf32, #tpu.memory_space<vmem>>, vector<1x2x196xf32>
    %66 = vector.shape_cast %65 : vector<1x2x196xf32> to vector<2x196xf32>
    %67 = vector.broadcast %64 : f32 to vector<2x196xf32>
    %68 = arith.mulf %67, %66 : vector<2x196xf32>
    %c1_47 = arith.constant 1 : index
    %c1_48 = arith.constant 1 : index
    %69 = memref.load %arg0[%c1_47, %c1_48] : memref<16x9xf32, #tpu.memory_space<smem>>
    %c1_49 = arith.constant 1 : index
    %c0_50 = arith.constant 0 : index
    %c0_51 = arith.constant 0 : index
    %70 = vector.load %arg2[%c1_49, %c0_50, %c0_51] : memref<9x2x196xf32, #tpu.memory_space<vmem>>, vector<1x2x196xf32>
    %71 = vector.shape_cast %70 : vector<1x2x196xf32> to vector<2x196xf32>
    %72 = vector.broadcast %69 : f32 to vector<2x196xf32>
    %73 = arith.mulf %72, %71 : vector<2x196xf32>
    %74 = arith.addf %68, %73 : vector<2x196xf32>
    %c1_52 = arith.constant 1 : index
    %c2_53 = arith.constant 2 : index
    %75 = memref.load %arg0[%c1_52, %c2_53] : memref<16x9xf32, #tpu.memory_space<smem>>
    %c2_54 = arith.constant 2 : index
    %c0_55 = arith.constant 0 : index
    %c0_56 = arith.constant 0 : index
    %76 = vector.load %arg2[%c2_54, %c0_55, %c0_56] : memref<9x2x196xf32, #tpu.memory_space<vmem>>, vector<1x2x196xf32>
    %77 = vector.shape_cast %76 : vector<1x2x196xf32> to vector<2x196xf32>
    %78 = vector.broadcast %75 : f32 to vector<2x196xf32>
    %79 = arith.mulf %78, %77 : vector<2x196xf32>
    %80 = arith.addf %74, %79 : vector<2x196xf32>
    %c1_57 = arith.constant 1 : index
    %c3_58 = arith.constant 3 : index
    %81 = memref.load %arg0[%c1_57, %c3_58] : memref<16x9xf32, #tpu.memory_space<smem>>
    %c3_59 = arith.constant 3 : index
    %c0_60 = arith.constant 0 : index
    %c0_61 = arith.constant 0 : index
    %82 = vector.load %arg2[%c3_59, %c0_60, %c0_61] : memref<9x2x196xf32, #tpu.memory_space<vmem>>, vector<1x2x196xf32>
    %83 = vector.shape_cast %82 : vector<1x2x196xf32> to vector<2x196xf32>
    %84 = vector.broadcast %81 : f32 to vector<2x196xf32>
    %85 = arith.mulf %84, %83 : vector<2x196xf32>
    %86 = arith.addf %80, %85 : vector<2x196xf32>
    %c1_62 = arith.constant 1 : index
    %c4_63 = arith.constant 4 : index
    %87 = memref.load %arg0[%c1_62, %c4_63] : memref<16x9xf32, #tpu.memory_space<smem>>
    %c4_64 = arith.constant 4 : index
    %c0_65 = arith.constant 0 : index
    %c0_66 = arith.constant 0 : index
    %88 = vector.load %arg2[%c4_64, %c0_65, %c0_66] : memref<9x2x196xf32, #tpu.memory_space<vmem>>, vector<1x2x196xf32>
    %89 = vector.shape_cast %88 : vector<1x2x196xf32> to vector<2x196xf32>
    %90 = vector.broadcast %87 : f32 to vector<2x196xf32>
    %91 = arith.mulf %90, %89 : vector<2x196xf32>
    %92 = arith.addf %86, %91 : vector<2x196xf32>
    %c1_67 = arith.constant 1 : index
    %c5_68 = arith.constant 5 : index
    %93 = memref.load %arg0[%c1_67, %c5_68] : memref<16x9xf32, #tpu.memory_space<smem>>
    %c5_69 = arith.constant 5 : index
    %c0_70 = arith.constant 0 : index
    %c0_71 = arith.constant 0 : index
    %94 = vector.load %arg2[%c5_69, %c0_70, %c0_71] : memref<9x2x196xf32, #tpu.memory_space<vmem>>, vector<1x2x196xf32>
    %95 = vector.shape_cast %94 : vector<1x2x196xf32> to vector<2x196xf32>
    %96 = vector.broadcast %93 : f32 to vector<2x196xf32>
    %97 = arith.mulf %96, %95 : vector<2x196xf32>
    %98 = arith.addf %92, %97 : vector<2x196xf32>
    %c1_72 = arith.constant 1 : index
    %c6_73 = arith.constant 6 : index
    %99 = memref.load %arg0[%c1_72, %c6_73] : memref<16x9xf32, #tpu.memory_space<smem>>
    %c6_74 = arith.constant 6 : index
    %c0_75 = arith.constant 0 : index
    %c0_76 = arith.constant 0 : index
    %100 = vector.load %arg2[%c6_74, %c0_75, %c0_76] : memref<9x2x196xf32, #tpu.memory_space<vmem>>, vector<1x2x196xf32>
    %101 = vector.shape_cast %100 : vector<1x2x196xf32> to vector<2x196xf32>
    %102 = vector.broadcast %99 : f32 to vector<2x196xf32>
    %103 = arith.mulf %102, %101 : vector<2x196xf32>
    %104 = arith.addf %98, %103 : vector<2x196xf32>
    %c1_77 = arith.constant 1 : index
    %c7_78 = arith.constant 7 : index
    %105 = memref.load %arg0[%c1_77, %c7_78] : memref<16x9xf32, #tpu.memory_space<smem>>
    %c7_79 = arith.constant 7 : index
    %c0_80 = arith.constant 0 : index
    %c0_81 = arith.constant 0 : index
    %106 = vector.load %arg2[%c7_79, %c0_80, %c0_81] : memref<9x2x196xf32, #tpu.memory_space<vmem>>, vector<1x2x196xf32>
    %107 = vector.shape_cast %106 : vector<1x2x196xf32> to vector<2x196xf32>
    %108 = vector.broadcast %105 : f32 to vector<2x196xf32>
    %109 = arith.mulf %108, %107 : vector<2x196xf32>
    %110 = arith.addf %104, %109 : vector<2x196xf32>
    %c1_82 = arith.constant 1 : index
    %c8_83 = arith.constant 8 : index
    %111 = memref.load %arg0[%c1_82, %c8_83] : memref<16x9xf32, #tpu.memory_space<smem>>
    %c8_84 = arith.constant 8 : index
    %c0_85 = arith.constant 0 : index
    %c0_86 = arith.constant 0 : index
    %112 = vector.load %arg2[%c8_84, %c0_85, %c0_86] : memref<9x2x196xf32, #tpu.memory_space<vmem>>, vector<1x2x196xf32>
    %113 = vector.shape_cast %112 : vector<1x2x196xf32> to vector<2x196xf32>
    %114 = vector.broadcast %111 : f32 to vector<2x196xf32>
    %115 = arith.mulf %114, %113 : vector<2x196xf32>
    %116 = arith.addf %110, %115 : vector<2x196xf32>
    %c1_87 = arith.constant 1 : index
    %117 = memref.load %arg1[%c1_87] : memref<16xf32, #tpu.memory_space<smem>>
    %118 = vector.broadcast %117 : f32 to vector<2x196xf32>
    %119 = arith.addf %116, %118 : vector<2x196xf32>
    %cst_88 = arith.constant 0.000000e+00 : f32
    %120 = vector.broadcast %cst_88 : f32 to vector<2x196xf32>
    %121 = arith.maximumf %119, %120 : vector<2x196xf32>
    %122 = arith.truncf %121 : vector<2x196xf32> to vector<2x196xbf16>
    %c1_89 = arith.constant 1 : index
    %c0_90 = arith.constant 0 : index
    %c0_91 = arith.constant 0 : index
    %123 = vector.load %arg3[%c1_89, %c0_90, %c0_91] : memref<16x196x128xbf16, #tpu.memory_space<vmem>>, vector<1x196x128xbf16>
    %124 = vector.shape_cast %123 : vector<1x196x128xbf16> to vector<196x128xbf16>
    %cst_92 = arith.constant dense<0.000000e+00> : vector<2x128xf32>
    %125 = tpu.matmul %122, %124, %cst_92 {dimension_numbers = #tpu.dot_dimension_numbers<[1], [0], [0], [1], [0, 0, 1, 1], [], []>} : vector<2x196xbf16>, vector<196x128xbf16>, vector<2x128xf32> -> vector<2x128xf32>
    %126 = arith.addf %63, %125 : vector<2x128xf32>
    %c2_93 = arith.constant 2 : index
    %c0_94 = arith.constant 0 : index
    %127 = memref.load %arg0[%c2_93, %c0_94] : memref<16x9xf32, #tpu.memory_space<smem>>
    %c0_95 = arith.constant 0 : index
    %c0_96 = arith.constant 0 : index
    %c0_97 = arith.constant 0 : index
    %128 = vector.load %arg2[%c0_95, %c0_96, %c0_97] : memref<9x2x196xf32, #tpu.memory_space<vmem>>, vector<1x2x196xf32>
    %129 = vector.shape_cast %128 : vector<1x2x196xf32> to vector<2x196xf32>
    %130 = vector.broadcast %127 : f32 to vector<2x196xf32>
    %131 = arith.mulf %130, %129 : vector<2x196xf32>
    %c2_98 = arith.constant 2 : index
    %c1_99 = arith.constant 1 : index
    %132 = memref.load %arg0[%c2_98, %c1_99] : memref<16x9xf32, #tpu.memory_space<smem>>
    %c1_100 = arith.constant 1 : index
    %c0_101 = arith.constant 0 : index
    %c0_102 = arith.constant 0 : index
    %133 = vector.load %arg2[%c1_100, %c0_101, %c0_102] : memref<9x2x196xf32, #tpu.memory_space<vmem>>, vector<1x2x196xf32>
    %134 = vector.shape_cast %133 : vector<1x2x196xf32> to vector<2x196xf32>
    %135 = vector.broadcast %132 : f32 to vector<2x196xf32>
    %136 = arith.mulf %135, %134 : vector<2x196xf32>
    %137 = arith.addf %131, %136 : vector<2x196xf32>
    %c2_103 = arith.constant 2 : index
    %c2_104 = arith.constant 2 : index
    %138 = memref.load %arg0[%c2_103, %c2_104] : memref<16x9xf32, #tpu.memory_space<smem>>
    %c2_105 = arith.constant 2 : index
    %c0_106 = arith.constant 0 : index
    %c0_107 = arith.constant 0 : index
    %139 = vector.load %arg2[%c2_105, %c0_106, %c0_107] : memref<9x2x196xf32, #tpu.memory_space<vmem>>, vector<1x2x196xf32>
    %140 = vector.shape_cast %139 : vector<1x2x196xf32> to vector<2x196xf32>
    %141 = vector.broadcast %138 : f32 to vector<2x196xf32>
    %142 = arith.mulf %141, %140 : vector<2x196xf32>
    %143 = arith.addf %137, %142 : vector<2x196xf32>
    %c2_108 = arith.constant 2 : index
    %c3_109 = arith.constant 3 : index
    %144 = memref.load %arg0[%c2_108, %c3_109] : memref<16x9xf32, #tpu.memory_space<smem>>
    %c3_110 = arith.constant 3 : index
    %c0_111 = arith.constant 0 : index
    %c0_112 = arith.constant 0 : index
    %145 = vector.load %arg2[%c3_110, %c0_111, %c0_112] : memref<9x2x196xf32, #tpu.memory_space<vmem>>, vector<1x2x196xf32>
    %146 = vector.shape_cast %145 : vector<1x2x196xf32> to vector<2x196xf32>
    %147 = vector.broadcast %144 : f32 to vector<2x196xf32>
    %148 = arith.mulf %147, %146 : vector<2x196xf32>
    %149 = arith.addf %143, %148 : vector<2x196xf32>
    %c2_113 = arith.constant 2 : index
    %c4_114 = arith.constant 4 : index
    %150 = memref.load %arg0[%c2_113, %c4_114] : memref<16x9xf32, #tpu.memory_space<smem>>
    %c4_115 = arith.constant 4 : index
    %c0_116 = arith.constant 0 : index
    %c0_117 = arith.constant 0 : index
    %151 = vector.load %arg2[%c4_115, %c0_116, %c0_117] : memref<9x2x196xf32, #tpu.memory_space<vmem>>, vector<1x2x196xf32>
    %152 = vector.shape_cast %151 : vector<1x2x196xf32> to vector<2x196xf32>
    %153 = vector.broadcast %150 : f32 to vector<2x196xf32>
    %154 = arith.mulf %153, %152 : vector<2x196xf32>
    %155 = arith.addf %149, %154 : vector<2x196xf32>
    %c2_118 = arith.constant 2 : index
    %c5_119 = arith.constant 5 : index
    %156 = memref.load %arg0[%c2_118, %c5_119] : memref<16x9xf32, #tpu.memory_space<smem>>
    %c5_120 = arith.constant 5 : index
    %c0_121 = arith.constant 0 : index
    %c0_122 = arith.constant 0 : index
    %157 = vector.load %arg2[%c5_120, %c0_121, %c0_122] : memref<9x2x196xf32, #tpu.memory_space<vmem>>, vector<1x2x196xf32>
    %158 = vector.shape_cast %157 : vector<1x2x196xf32> to vector<2x196xf32>
    %159 = vector.broadcast %156 : f32 to vector<2x196xf32>
    %160 = arith.mulf %159, %158 : vector<2x196xf32>
    %161 = arith.addf %155, %160 : vector<2x196xf32>
    %c2_123 = arith.constant 2 : index
    %c6_124 = arith.constant 6 : index
    %162 = memref.load %arg0[%c2_123, %c6_124] : memref<16x9xf32, #tpu.memory_space<smem>>
    %c6_125 = arith.constant 6 : index
    %c0_126 = arith.constant 0 : index
    %c0_127 = arith.constant 0 : index
    %163 = vector.load %arg2[%c6_125, %c0_126, %c0_127] : memref<9x2x196xf32, #tpu.memory_space<vmem>>, vector<1x2x196xf32>
    %164 = vector.shape_cast %163 : vector<1x2x196xf32> to vector<2x196xf32>
    %165 = vector.broadcast %162 : f32 to vector<2x196xf32>
    %166 = arith.mulf %165, %164 : vector<2x196xf32>
    %167 = arith.addf %161, %166 : vector<2x196xf32>
    %c2_128 = arith.constant 2 : index
    %c7_129 = arith.constant 7 : index
    %168 = memref.load %arg0[%c2_128, %c7_129] : memref<16x9xf32, #tpu.memory_space<smem>>
    %c7_130 = arith.constant 7 : index
    %c0_131 = arith.constant 0 : index
    %c0_132 = arith.constant 0 : index
    %169 = vector.load %arg2[%c7_130, %c0_131, %c0_132] : memref<9x2x196xf32, #tpu.memory_space<vmem>>, vector<1x2x196xf32>
    %170 = vector.shape_cast %169 : vector<1x2x196xf32> to vector<2x196xf32>
    %171 = vector.broadcast %168 : f32 to vector<2x196xf32>
    %172 = arith.mulf %171, %170 : vector<2x196xf32>
    %173 = arith.addf %167, %172 : vector<2x196xf32>
    %c2_133 = arith.constant 2 : index
    %c8_134 = arith.constant 8 : index
    %174 = memref.load %arg0[%c2_133, %c8_134] : memref<16x9xf32, #tpu.memory_space<smem>>
    %c8_135 = arith.constant 8 : index
    %c0_136 = arith.constant 0 : index
    %c0_137 = arith.constant 0 : index
    %175 = vector.load %arg2[%c8_135, %c0_136, %c0_137] : memref<9x2x196xf32, #tpu.memory_space<vmem>>, vector<1x2x196xf32>
    %176 = vector.shape_cast %175 : vector<1x2x196xf32> to vector<2x196xf32>
    %177 = vector.broadcast %174 : f32 to vector<2x196xf32>
    %178 = arith.mulf %177, %176 : vector<2x196xf32>
    %179 = arith.addf %173, %178 : vector<2x196xf32>
    %c2_138 = arith.constant 2 : index
    %180 = memref.load %arg1[%c2_138] : memref<16xf32, #tpu.memory_space<smem>>
    %181 = vector.broadcast %180 : f32 to vector<2x196xf32>
    %182 = arith.addf %179, %181 : vector<2x196xf32>
    %cst_139 = arith.constant 0.000000e+00 : f32
    %183 = vector.broadcast %cst_139 : f32 to vector<2x196xf32>
    %184 = arith.maximumf %182, %183 : vector<2x196xf32>
    %185 = arith.truncf %184 : vector<2x196xf32> to vector<2x196xbf16>
    %c2_140 = arith.constant 2 : index
    %c0_141 = arith.constant 0 : index
    %c0_142 = arith.constant 0 : index
    %186 = vector.load %arg3[%c2_140, %c0_141, %c0_142] : memref<16x196x128xbf16, #tpu.memory_space<vmem>>, vector<1x196x128xbf16>
    %187 = vector.shape_cast %186 : vector<1x196x128xbf16> to vector<196x128xbf16>
    %cst_143 = arith.constant dense<0.000000e+00> : vector<2x128xf32>
    %188 = tpu.matmul %185, %187, %cst_143 {dimension_numbers = #tpu.dot_dimension_numbers<[1], [0], [0], [1], [0, 0, 1, 1], [], []>} : vector<2x196xbf16>, vector<196x128xbf16>, vector<2x128xf32> -> vector<2x128xf32>
    %189 = arith.addf %126, %188 : vector<2x128xf32>
    %c3_144 = arith.constant 3 : index
    %c0_145 = arith.constant 0 : index
    %190 = memref.load %arg0[%c3_144, %c0_145] : memref<16x9xf32, #tpu.memory_space<smem>>
    %c0_146 = arith.constant 0 : index
    %c0_147 = arith.constant 0 : index
    %c0_148 = arith.constant 0 : index
    %191 = vector.load %arg2[%c0_146, %c0_147, %c0_148] : memref<9x2x196xf32, #tpu.memory_space<vmem>>, vector<1x2x196xf32>
    %192 = vector.shape_cast %191 : vector<1x2x196xf32> to vector<2x196xf32>
    %193 = vector.broadcast %190 : f32 to vector<2x196xf32>
    %194 = arith.mulf %193, %192 : vector<2x196xf32>
    %c3_149 = arith.constant 3 : index
    %c1_150 = arith.constant 1 : index
    %195 = memref.load %arg0[%c3_149, %c1_150] : memref<16x9xf32, #tpu.memory_space<smem>>
    %c1_151 = arith.constant 1 : index
    %c0_152 = arith.constant 0 : index
    %c0_153 = arith.constant 0 : index
    %196 = vector.load %arg2[%c1_151, %c0_152, %c0_153] : memref<9x2x196xf32, #tpu.memory_space<vmem>>, vector<1x2x196xf32>
    %197 = vector.shape_cast %196 : vector<1x2x196xf32> to vector<2x196xf32>
    %198 = vector.broadcast %195 : f32 to vector<2x196xf32>
    %199 = arith.mulf %198, %197 : vector<2x196xf32>
    %200 = arith.addf %194, %199 : vector<2x196xf32>
    %c3_154 = arith.constant 3 : index
    %c2_155 = arith.constant 2 : index
    %201 = memref.load %arg0[%c3_154, %c2_155] : memref<16x9xf32, #tpu.memory_space<smem>>
    %c2_156 = arith.constant 2 : index
    %c0_157 = arith.constant 0 : index
    %c0_158 = arith.constant 0 : index
    %202 = vector.load %arg2[%c2_156, %c0_157, %c0_158] : memref<9x2x196xf32, #tpu.memory_space<vmem>>, vector<1x2x196xf32>
    %203 = vector.shape_cast %202 : vector<1x2x196xf32> to vector<2x196xf32>
    %204 = vector.broadcast %201 : f32 to vector<2x196xf32>
    %205 = arith.mulf %204, %203 : vector<2x196xf32>
    %206 = arith.addf %200, %205 : vector<2x196xf32>
    %c3_159 = arith.constant 3 : index
    %c3_160 = arith.constant 3 : index
    %207 = memref.load %arg0[%c3_159, %c3_160] : memref<16x9xf32, #tpu.memory_space<smem>>
    %c3_161 = arith.constant 3 : index
    %c0_162 = arith.constant 0 : index
    %c0_163 = arith.constant 0 : index
    %208 = vector.load %arg2[%c3_161, %c0_162, %c0_163] : memref<9x2x196xf32, #tpu.memory_space<vmem>>, vector<1x2x196xf32>
    %209 = vector.shape_cast %208 : vector<1x2x196xf32> to vector<2x196xf32>
    %210 = vector.broadcast %207 : f32 to vector<2x196xf32>
    %211 = arith.mulf %210, %209 : vector<2x196xf32>
    %212 = arith.addf %206, %211 : vector<2x196xf32>
    %c3_164 = arith.constant 3 : index
    %c4_165 = arith.constant 4 : index
    %213 = memref.load %arg0[%c3_164, %c4_165] : memref<16x9xf32, #tpu.memory_space<smem>>
    %c4_166 = arith.constant 4 : index
    %c0_167 = arith.constant 0 : index
    %c0_168 = arith.constant 0 : index
    %214 = vector.load %arg2[%c4_166, %c0_167, %c0_168] : memref<9x2x196xf32, #tpu.memory_space<vmem>>, vector<1x2x196xf32>
    %215 = vector.shape_cast %214 : vector<1x2x196xf32> to vector<2x196xf32>
    %216 = vector.broadcast %213 : f32 to vector<2x196xf32>
    %217 = arith.mulf %216, %215 : vector<2x196xf32>
    %218 = arith.addf %212, %217 : vector<2x196xf32>
    %c3_169 = arith.constant 3 : index
    %c5_170 = arith.constant 5 : index
    %219 = memref.load %arg0[%c3_169, %c5_170] : memref<16x9xf32, #tpu.memory_space<smem>>
    %c5_171 = arith.constant 5 : index
    %c0_172 = arith.constant 0 : index
    %c0_173 = arith.constant 0 : index
    %220 = vector.load %arg2[%c5_171, %c0_172, %c0_173] : memref<9x2x196xf32, #tpu.memory_space<vmem>>, vector<1x2x196xf32>
    %221 = vector.shape_cast %220 : vector<1x2x196xf32> to vector<2x196xf32>
    %222 = vector.broadcast %219 : f32 to vector<2x196xf32>
    %223 = arith.mulf %222, %221 : vector<2x196xf32>
    %224 = arith.addf %218, %223 : vector<2x196xf32>
    %c3_174 = arith.constant 3 : index
    %c6_175 = arith.constant 6 : index
    %225 = memref.load %arg0[%c3_174, %c6_175] : memref<16x9xf32, #tpu.memory_space<smem>>
    %c6_176 = arith.constant 6 : index
    %c0_177 = arith.constant 0 : index
    %c0_178 = arith.constant 0 : index
    %226 = vector.load %arg2[%c6_176, %c0_177, %c0_178] : memref<9x2x196xf32, #tpu.memory_space<vmem>>, vector<1x2x196xf32>
    %227 = vector.shape_cast %226 : vector<1x2x196xf32> to vector<2x196xf32>
    %228 = vector.broadcast %225 : f32 to vector<2x196xf32>
    %229 = arith.mulf %228, %227 : vector<2x196xf32>
    %230 = arith.addf %224, %229 : vector<2x196xf32>
    %c3_179 = arith.constant 3 : index
    %c7_180 = arith.constant 7 : index
    %231 = memref.load %arg0[%c3_179, %c7_180] : memref<16x9xf32, #tpu.memory_space<smem>>
    %c7_181 = arith.constant 7 : index
    %c0_182 = arith.constant 0 : index
    %c0_183 = arith.constant 0 : index
    %232 = vector.load %arg2[%c7_181, %c0_182, %c0_183] : memref<9x2x196xf32, #tpu.memory_space<vmem>>, vector<1x2x196xf32>
    %233 = vector.shape_cast %232 : vector<1x2x196xf32> to vector<2x196xf32>
    %234 = vector.broadcast %231 : f32 to vector<2x196xf32>
    %235 = arith.mulf %234, %233 : vector<2x196xf32>
    %236 = arith.addf %230, %235 : vector<2x196xf32>
    %c3_184 = arith.constant 3 : index
    %c8_185 = arith.constant 8 : index
    %237 = memref.load %arg0[%c3_184, %c8_185] : memref<16x9xf32, #tpu.memory_space<smem>>
    %c8_186 = arith.constant 8 : index
    %c0_187 = arith.constant 0 : index
    %c0_188 = arith.constant 0 : index
    %238 = vector.load %arg2[%c8_186, %c0_187, %c0_188] : memref<9x2x196xf32, #tpu.memory_space<vmem>>, vector<1x2x196xf32>
    %239 = vector.shape_cast %238 : vector<1x2x196xf32> to vector<2x196xf32>
    %240 = vector.broadcast %237 : f32 to vector<2x196xf32>
    %241 = arith.mulf %240, %239 : vector<2x196xf32>
    %242 = arith.addf %236, %241 : vector<2x196xf32>
    %c3_189 = arith.constant 3 : index
    %243 = memref.load %arg1[%c3_189] : memref<16xf32, #tpu.memory_space<smem>>
    %244 = vector.broadcast %243 : f32 to vector<2x196xf32>
    %245 = arith.addf %242, %244 : vector<2x196xf32>
    %cst_190 = arith.constant 0.000000e+00 : f32
    %246 = vector.broadcast %cst_190 : f32 to vector<2x196xf32>
    %247 = arith.maximumf %245, %246 : vector<2x196xf32>
    %248 = arith.truncf %247 : vector<2x196xf32> to vector<2x196xbf16>
    %c3_191 = arith.constant 3 : index
    %c0_192 = arith.constant 0 : index
    %c0_193 = arith.constant 0 : index
    %249 = vector.load %arg3[%c3_191, %c0_192, %c0_193] : memref<16x196x128xbf16, #tpu.memory_space<vmem>>, vector<1x196x128xbf16>
    %250 = vector.shape_cast %249 : vector<1x196x128xbf16> to vector<196x128xbf16>
    %cst_194 = arith.constant dense<0.000000e+00> : vector<2x128xf32>
    %251 = tpu.matmul %248, %250, %cst_194 {dimension_numbers = #tpu.dot_dimension_numbers<[1], [0], [0], [1], [0, 0, 1, 1], [], []>} : vector<2x196xbf16>, vector<196x128xbf16>, vector<2x128xf32> -> vector<2x128xf32>
    %252 = arith.addf %189, %251 : vector<2x128xf32>
    %c4_195 = arith.constant 4 : index
    %c0_196 = arith.constant 0 : index
    %253 = memref.load %arg0[%c4_195, %c0_196] : memref<16x9xf32, #tpu.memory_space<smem>>
    %c0_197 = arith.constant 0 : index
    %c0_198 = arith.constant 0 : index
    %c0_199 = arith.constant 0 : index
    %254 = vector.load %arg2[%c0_197, %c0_198, %c0_199] : memref<9x2x196xf32, #tpu.memory_space<vmem>>, vector<1x2x196xf32>
    %255 = vector.shape_cast %254 : vector<1x2x196xf32> to vector<2x196xf32>
    %256 = vector.broadcast %253 : f32 to vector<2x196xf32>
    %257 = arith.mulf %256, %255 : vector<2x196xf32>
    %c4_200 = arith.constant 4 : index
    %c1_201 = arith.constant 1 : index
    %258 = memref.load %arg0[%c4_200, %c1_201] : memref<16x9xf32, #tpu.memory_space<smem>>
    %c1_202 = arith.constant 1 : index
    %c0_203 = arith.constant 0 : index
    %c0_204 = arith.constant 0 : index
    %259 = vector.load %arg2[%c1_202, %c0_203, %c0_204] : memref<9x2x196xf32, #tpu.memory_space<vmem>>, vector<1x2x196xf32>
    %260 = vector.shape_cast %259 : vector<1x2x196xf32> to vector<2x196xf32>
    %261 = vector.broadcast %258 : f32 to vector<2x196xf32>
    %262 = arith.mulf %261, %260 : vector<2x196xf32>
    %263 = arith.addf %257, %262 : vector<2x196xf32>
    %c4_205 = arith.constant 4 : index
    %c2_206 = arith.constant 2 : index
    %264 = memref.load %arg0[%c4_205, %c2_206] : memref<16x9xf32, #tpu.memory_space<smem>>
    %c2_207 = arith.constant 2 : index
    %c0_208 = arith.constant 0 : index
    %c0_209 = arith.constant 0 : index
    %265 = vector.load %arg2[%c2_207, %c0_208, %c0_209] : memref<9x2x196xf32, #tpu.memory_space<vmem>>, vector<1x2x196xf32>
    %266 = vector.shape_cast %265 : vector<1x2x196xf32> to vector<2x196xf32>
    %267 = vector.broadcast %264 : f32 to vector<2x196xf32>
    %268 = arith.mulf %267, %266 : vector<2x196xf32>
    %269 = arith.addf %263, %268 : vector<2x196xf32>
    %c4_210 = arith.constant 4 : index
    %c3_211 = arith.constant 3 : index
    %270 = memref.load %arg0[%c4_210, %c3_211] : memref<16x9xf32, #tpu.memory_space<smem>>
    %c3_212 = arith.constant 3 : index
    %c0_213 = arith.constant 0 : index
    %c0_214 = arith.constant 0 : index
    %271 = vector.load %arg2[%c3_212, %c0_213, %c0_214] : memref<9x2x196xf32, #tpu.memory_space<vmem>>, vector<1x2x196xf32>
    %272 = vector.shape_cast %271 : vector<1x2x196xf32> to vector<2x196xf32>
    %273 = vector.broadcast %270 : f32 to vector<2x196xf32>
    %274 = arith.mulf %273, %272 : vector<2x196xf32>
    %275 = arith.addf %269, %274 : vector<2x196xf32>
    %c4_215 = arith.constant 4 : index
    %c4_216 = arith.constant 4 : index
    %276 = memref.load %arg0[%c4_215, %c4_216] : memref<16x9xf32, #tpu.memory_space<smem>>
    %c4_217 = arith.constant 4 : index
    %c0_218 = arith.constant 0 : index
    %c0_219 = arith.constant 0 : index
    %277 = vector.load %arg2[%c4_217, %c0_218, %c0_219] : memref<9x2x196xf32, #tpu.memory_space<vmem>>, vector<1x2x196xf32>
    %278 = vector.shape_cast %277 : vector<1x2x196xf32> to vector<2x196xf32>
    %279 = vector.broadcast %276 : f32 to vector<2x196xf32>
    %280 = arith.mulf %279, %278 : vector<2x196xf32>
    %281 = arith.addf %275, %280 : vector<2x196xf32>
    %c4_220 = arith.constant 4 : index
    %c5_221 = arith.constant 5 : index
    %282 = memref.load %arg0[%c4_220, %c5_221] : memref<16x9xf32, #tpu.memory_space<smem>>
    %c5_222 = arith.constant 5 : index
    %c0_223 = arith.constant 0 : index
    %c0_224 = arith.constant 0 : index
    %283 = vector.load %arg2[%c5_222, %c0_223, %c0_224] : memref<9x2x196xf32, #tpu.memory_space<vmem>>, vector<1x2x196xf32>
    %284 = vector.shape_cast %283 : vector<1x2x196xf32> to vector<2x196xf32>
    %285 = vector.broadcast %282 : f32 to vector<2x196xf32>
    %286 = arith.mulf %285, %284 : vector<2x196xf32>
    %287 = arith.addf %281, %286 : vector<2x196xf32>
    %c4_225 = arith.constant 4 : index
    %c6_226 = arith.constant 6 : index
    %288 = memref.load %arg0[%c4_225, %c6_226] : memref<16x9xf32, #tpu.memory_space<smem>>
    %c6_227 = arith.constant 6 : index
    %c0_228 = arith.constant 0 : index
    %c0_229 = arith.constant 0 : index
    %289 = vector.load %arg2[%c6_227, %c0_228, %c0_229] : memref<9x2x196xf32, #tpu.memory_space<vmem>>, vector<1x2x196xf32>
    %290 = vector.shape_cast %289 : vector<1x2x196xf32> to vector<2x196xf32>
    %291 = vector.broadcast %288 : f32 to vector<2x196xf32>
    %292 = arith.mulf %291, %290 : vector<2x196xf32>
    %293 = arith.addf %287, %292 : vector<2x196xf32>
    %c4_230 = arith.constant 4 : index
    %c7_231 = arith.constant 7 : index
    %294 = memref.load %arg0[%c4_230, %c7_231] : memref<16x9xf32, #tpu.memory_space<smem>>
    %c7_232 = arith.constant 7 : index
    %c0_233 = arith.constant 0 : index
    %c0_234 = arith.constant 0 : index
    %295 = vector.load %arg2[%c7_232, %c0_233, %c0_234] : memref<9x2x196xf32, #tpu.memory_space<vmem>>, vector<1x2x196xf32>
    %296 = vector.shape_cast %295 : vector<1x2x196xf32> to vector<2x196xf32>
    %297 = vector.broadcast %294 : f32 to vector<2x196xf32>
    %298 = arith.mulf %297, %296 : vector<2x196xf32>
    %299 = arith.addf %293, %298 : vector<2x196xf32>
    %c4_235 = arith.constant 4 : index
    %c8_236 = arith.constant 8 : index
    %300 = memref.load %arg0[%c4_235, %c8_236] : memref<16x9xf32, #tpu.memory_space<smem>>
    %c8_237 = arith.constant 8 : index
    %c0_238 = arith.constant 0 : index
    %c0_239 = arith.constant 0 : index
    %301 = vector.load %arg2[%c8_237, %c0_238, %c0_239] : memref<9x2x196xf32, #tpu.memory_space<vmem>>, vector<1x2x196xf32>
    %302 = vector.shape_cast %301 : vector<1x2x196xf32> to vector<2x196xf32>
    %303 = vector.broadcast %300 : f32 to vector<2x196xf32>
    %304 = arith.mulf %303, %302 : vector<2x196xf32>
    %305 = arith.addf %299, %304 : vector<2x196xf32>
    %c4_240 = arith.constant 4 : index
    %306 = memref.load %arg1[%c4_240] : memref<16xf32, #tpu.memory_space<smem>>
    %307 = vector.broadcast %306 : f32 to vector<2x196xf32>
    %308 = arith.addf %305, %307 : vector<2x196xf32>
    %cst_241 = arith.constant 0.000000e+00 : f32
    %309 = vector.broadcast %cst_241 : f32 to vector<2x196xf32>
    %310 = arith.maximumf %308, %309 : vector<2x196xf32>
    %311 = arith.truncf %310 : vector<2x196xf32> to vector<2x196xbf16>
    %c4_242 = arith.constant 4 : index
    %c0_243 = arith.constant 0 : index
    %c0_244 = arith.constant 0 : index
    %312 = vector.load %arg3[%c4_242, %c0_243, %c0_244] : memref<16x196x128xbf16, #tpu.memory_space<vmem>>, vector<1x196x128xbf16>
    %313 = vector.shape_cast %312 : vector<1x196x128xbf16> to vector<196x128xbf16>
    %cst_245 = arith.constant dense<0.000000e+00> : vector<2x128xf32>
    %314 = tpu.matmul %311, %313, %cst_245 {dimension_numbers = #tpu.dot_dimension_numbers<[1], [0], [0], [1], [0, 0, 1, 1], [], []>} : vector<2x196xbf16>, vector<196x128xbf16>, vector<2x128xf32> -> vector<2x128xf32>
    %315 = arith.addf %252, %314 : vector<2x128xf32>
    %c5_246 = arith.constant 5 : index
    %c0_247 = arith.constant 0 : index
    %316 = memref.load %arg0[%c5_246, %c0_247] : memref<16x9xf32, #tpu.memory_space<smem>>
    %c0_248 = arith.constant 0 : index
    %c0_249 = arith.constant 0 : index
    %c0_250 = arith.constant 0 : index
    %317 = vector.load %arg2[%c0_248, %c0_249, %c0_250] : memref<9x2x196xf32, #tpu.memory_space<vmem>>, vector<1x2x196xf32>
    %318 = vector.shape_cast %317 : vector<1x2x196xf32> to vector<2x196xf32>
    %319 = vector.broadcast %316 : f32 to vector<2x196xf32>
    %320 = arith.mulf %319, %318 : vector<2x196xf32>
    %c5_251 = arith.constant 5 : index
    %c1_252 = arith.constant 1 : index
    %321 = memref.load %arg0[%c5_251, %c1_252] : memref<16x9xf32, #tpu.memory_space<smem>>
    %c1_253 = arith.constant 1 : index
    %c0_254 = arith.constant 0 : index
    %c0_255 = arith.constant 0 : index
    %322 = vector.load %arg2[%c1_253, %c0_254, %c0_255] : memref<9x2x196xf32, #tpu.memory_space<vmem>>, vector<1x2x196xf32>
    %323 = vector.shape_cast %322 : vector<1x2x196xf32> to vector<2x196xf32>
    %324 = vector.broadcast %321 : f32 to vector<2x196xf32>
    %325 = arith.mulf %324, %323 : vector<2x196xf32>
    %326 = arith.addf %320, %325 : vector<2x196xf32>
    %c5_256 = arith.constant 5 : index
    %c2_257 = arith.constant 2 : index
    %327 = memref.load %arg0[%c5_256, %c2_257] : memref<16x9xf32, #tpu.memory_space<smem>>
    %c2_258 = arith.constant 2 : index
    %c0_259 = arith.constant 0 : index
    %c0_260 = arith.constant 0 : index
    %328 = vector.load %arg2[%c2_258, %c0_259, %c0_260] : memref<9x2x196xf32, #tpu.memory_space<vmem>>, vector<1x2x196xf32>
    %329 = vector.shape_cast %328 : vector<1x2x196xf32> to vector<2x196xf32>
    %330 = vector.broadcast %327 : f32 to vector<2x196xf32>
    %331 = arith.mulf %330, %329 : vector<2x196xf32>
    %332 = arith.addf %326, %331 : vector<2x196xf32>
    %c5_261 = arith.constant 5 : index
    %c3_262 = arith.constant 3 : index
    %333 = memref.load %arg0[%c5_261, %c3_262] : memref<16x9xf32, #tpu.memory_space<smem>>
    %c3_263 = arith.constant 3 : index
    %c0_264 = arith.constant 0 : index
    %c0_265 = arith.constant 0 : index
    %334 = vector.load %arg2[%c3_263, %c0_264, %c0_265] : memref<9x2x196xf32, #tpu.memory_space<vmem>>, vector<1x2x196xf32>
    %335 = vector.shape_cast %334 : vector<1x2x196xf32> to vector<2x196xf32>
    %336 = vector.broadcast %333 : f32 to vector<2x196xf32>
    %337 = arith.mulf %336, %335 : vector<2x196xf32>
    %338 = arith.addf %332, %337 : vector<2x196xf32>
    %c5_266 = arith.constant 5 : index
    %c4_267 = arith.constant 4 : index
    %339 = memref.load %arg0[%c5_266, %c4_267] : memref<16x9xf32, #tpu.memory_space<smem>>
    %c4_268 = arith.constant 4 : index
    %c0_269 = arith.constant 0 : index
    %c0_270 = arith.constant 0 : index
    %340 = vector.load %arg2[%c4_268, %c0_269, %c0_270] : memref<9x2x196xf32, #tpu.memory_space<vmem>>, vector<1x2x196xf32>
    %341 = vector.shape_cast %340 : vector<1x2x196xf32> to vector<2x196xf32>
    %342 = vector.broadcast %339 : f32 to vector<2x196xf32>
    %343 = arith.mulf %342, %341 : vector<2x196xf32>
    %344 = arith.addf %338, %343 : vector<2x196xf32>
    %c5_271 = arith.constant 5 : index
    %c5_272 = arith.constant 5 : index
    %345 = memref.load %arg0[%c5_271, %c5_272] : memref<16x9xf32, #tpu.memory_space<smem>>
    %c5_273 = arith.constant 5 : index
    %c0_274 = arith.constant 0 : index
    %c0_275 = arith.constant 0 : index
    %346 = vector.load %arg2[%c5_273, %c0_274, %c0_275] : memref<9x2x196xf32, #tpu.memory_space<vmem>>, vector<1x2x196xf32>
    %347 = vector.shape_cast %346 : vector<1x2x196xf32> to vector<2x196xf32>
    %348 = vector.broadcast %345 : f32 to vector<2x196xf32>
    %349 = arith.mulf %348, %347 : vector<2x196xf32>
    %350 = arith.addf %344, %349 : vector<2x196xf32>
    %c5_276 = arith.constant 5 : index
    %c6_277 = arith.constant 6 : index
    %351 = memref.load %arg0[%c5_276, %c6_277] : memref<16x9xf32, #tpu.memory_space<smem>>
    %c6_278 = arith.constant 6 : index
    %c0_279 = arith.constant 0 : index
    %c0_280 = arith.constant 0 : index
    %352 = vector.load %arg2[%c6_278, %c0_279, %c0_280] : memref<9x2x196xf32, #tpu.memory_space<vmem>>, vector<1x2x196xf32>
    %353 = vector.shape_cast %352 : vector<1x2x196xf32> to vector<2x196xf32>
    %354 = vector.broadcast %351 : f32 to vector<2x196xf32>
    %355 = arith.mulf %354, %353 : vector<2x196xf32>
    %356 = arith.addf %350, %355 : vector<2x196xf32>
    %c5_281 = arith.constant 5 : index
    %c7_282 = arith.constant 7 : index
    %357 = memref.load %arg0[%c5_281, %c7_282] : memref<16x9xf32, #tpu.memory_space<smem>>
    %c7_283 = arith.constant 7 : index
    %c0_284 = arith.constant 0 : index
    %c0_285 = arith.constant 0 : index
    %358 = vector.load %arg2[%c7_283, %c0_284, %c0_285] : memref<9x2x196xf32, #tpu.memory_space<vmem>>, vector<1x2x196xf32>
    %359 = vector.shape_cast %358 : vector<1x2x196xf32> to vector<2x196xf32>
    %360 = vector.broadcast %357 : f32 to vector<2x196xf32>
    %361 = arith.mulf %360, %359 : vector<2x196xf32>
    %362 = arith.addf %356, %361 : vector<2x196xf32>
    %c5_286 = arith.constant 5 : index
    %c8_287 = arith.constant 8 : index
    %363 = memref.load %arg0[%c5_286, %c8_287] : memref<16x9xf32, #tpu.memory_space<smem>>
    %c8_288 = arith.constant 8 : index
    %c0_289 = arith.constant 0 : index
    %c0_290 = arith.constant 0 : index
    %364 = vector.load %arg2[%c8_288, %c0_289, %c0_290] : memref<9x2x196xf32, #tpu.memory_space<vmem>>, vector<1x2x196xf32>
    %365 = vector.shape_cast %364 : vector<1x2x196xf32> to vector<2x196xf32>
    %366 = vector.broadcast %363 : f32 to vector<2x196xf32>
    %367 = arith.mulf %366, %365 : vector<2x196xf32>
    %368 = arith.addf %362, %367 : vector<2x196xf32>
    %c5_291 = arith.constant 5 : index
    %369 = memref.load %arg1[%c5_291] : memref<16xf32, #tpu.memory_space<smem>>
    %370 = vector.broadcast %369 : f32 to vector<2x196xf32>
    %371 = arith.addf %368, %370 : vector<2x196xf32>
    %cst_292 = arith.constant 0.000000e+00 : f32
    %372 = vector.broadcast %cst_292 : f32 to vector<2x196xf32>
    %373 = arith.maximumf %371, %372 : vector<2x196xf32>
    %374 = arith.truncf %373 : vector<2x196xf32> to vector<2x196xbf16>
    %c5_293 = arith.constant 5 : index
    %c0_294 = arith.constant 0 : index
    %c0_295 = arith.constant 0 : index
    %375 = vector.load %arg3[%c5_293, %c0_294, %c0_295] : memref<16x196x128xbf16, #tpu.memory_space<vmem>>, vector<1x196x128xbf16>
    %376 = vector.shape_cast %375 : vector<1x196x128xbf16> to vector<196x128xbf16>
    %cst_296 = arith.constant dense<0.000000e+00> : vector<2x128xf32>
    %377 = tpu.matmul %374, %376, %cst_296 {dimension_numbers = #tpu.dot_dimension_numbers<[1], [0], [0], [1], [0, 0, 1, 1], [], []>} : vector<2x196xbf16>, vector<196x128xbf16>, vector<2x128xf32> -> vector<2x128xf32>
    %378 = arith.addf %315, %377 : vector<2x128xf32>
    %c6_297 = arith.constant 6 : index
    %c0_298 = arith.constant 0 : index
    %379 = memref.load %arg0[%c6_297, %c0_298] : memref<16x9xf32, #tpu.memory_space<smem>>
    %c0_299 = arith.constant 0 : index
    %c0_300 = arith.constant 0 : index
    %c0_301 = arith.constant 0 : index
    %380 = vector.load %arg2[%c0_299, %c0_300, %c0_301] : memref<9x2x196xf32, #tpu.memory_space<vmem>>, vector<1x2x196xf32>
    %381 = vector.shape_cast %380 : vector<1x2x196xf32> to vector<2x196xf32>
    %382 = vector.broadcast %379 : f32 to vector<2x196xf32>
    %383 = arith.mulf %382, %381 : vector<2x196xf32>
    %c6_302 = arith.constant 6 : index
    %c1_303 = arith.constant 1 : index
    %384 = memref.load %arg0[%c6_302, %c1_303] : memref<16x9xf32, #tpu.memory_space<smem>>
    %c1_304 = arith.constant 1 : index
    %c0_305 = arith.constant 0 : index
    %c0_306 = arith.constant 0 : index
    %385 = vector.load %arg2[%c1_304, %c0_305, %c0_306] : memref<9x2x196xf32, #tpu.memory_space<vmem>>, vector<1x2x196xf32>
    %386 = vector.shape_cast %385 : vector<1x2x196xf32> to vector<2x196xf32>
    %387 = vector.broadcast %384 : f32 to vector<2x196xf32>
    %388 = arith.mulf %387, %386 : vector<2x196xf32>
    %389 = arith.addf %383, %388 : vector<2x196xf32>
    %c6_307 = arith.constant 6 : index
    %c2_308 = arith.constant 2 : index
    %390 = memref.load %arg0[%c6_307, %c2_308] : memref<16x9xf32, #tpu.memory_space<smem>>
    %c2_309 = arith.constant 2 : index
    %c0_310 = arith.constant 0 : index
    %c0_311 = arith.constant 0 : index
    %391 = vector.load %arg2[%c2_309, %c0_310, %c0_311] : memref<9x2x196xf32, #tpu.memory_space<vmem>>, vector<1x2x196xf32>
    %392 = vector.shape_cast %391 : vector<1x2x196xf32> to vector<2x196xf32>
    %393 = vector.broadcast %390 : f32 to vector<2x196xf32>
    %394 = arith.mulf %393, %392 : vector<2x196xf32>
    %395 = arith.addf %389, %394 : vector<2x196xf32>
    %c6_312 = arith.constant 6 : index
    %c3_313 = arith.constant 3 : index
    %396 = memref.load %arg0[%c6_312, %c3_313] : memref<16x9xf32, #tpu.memory_space<smem>>
    %c3_314 = arith.constant 3 : index
    %c0_315 = arith.constant 0 : index
    %c0_316 = arith.constant 0 : index
    %397 = vector.load %arg2[%c3_314, %c0_315, %c0_316] : memref<9x2x196xf32, #tpu.memory_space<vmem>>, vector<1x2x196xf32>
    %398 = vector.shape_cast %397 : vector<1x2x196xf32> to vector<2x196xf32>
    %399 = vector.broadcast %396 : f32 to vector<2x196xf32>
    %400 = arith.mulf %399, %398 : vector<2x196xf32>
    %401 = arith.addf %395, %400 : vector<2x196xf32>
    %c6_317 = arith.constant 6 : index
    %c4_318 = arith.constant 4 : index
    %402 = memref.load %arg0[%c6_317, %c4_318] : memref<16x9xf32, #tpu.memory_space<smem>>
    %c4_319 = arith.constant 4 : index
    %c0_320 = arith.constant 0 : index
    %c0_321 = arith.constant 0 : index
    %403 = vector.load %arg2[%c4_319, %c0_320, %c0_321] : memref<9x2x196xf32, #tpu.memory_space<vmem>>, vector<1x2x196xf32>
    %404 = vector.shape_cast %403 : vector<1x2x196xf32> to vector<2x196xf32>
    %405 = vector.broadcast %402 : f32 to vector<2x196xf32>
    %406 = arith.mulf %405, %404 : vector<2x196xf32>
    %407 = arith.addf %401, %406 : vector<2x196xf32>
    %c6_322 = arith.constant 6 : index
    %c5_323 = arith.constant 5 : index
    %408 = memref.load %arg0[%c6_322, %c5_323] : memref<16x9xf32, #tpu.memory_space<smem>>
    %c5_324 = arith.constant 5 : index
    %c0_325 = arith.constant 0 : index
    %c0_326 = arith.constant 0 : index
    %409 = vector.load %arg2[%c5_324, %c0_325, %c0_326] : memref<9x2x196xf32, #tpu.memory_space<vmem>>, vector<1x2x196xf32>
    %410 = vector.shape_cast %409 : vector<1x2x196xf32> to vector<2x196xf32>
    %411 = vector.broadcast %408 : f32 to vector<2x196xf32>
    %412 = arith.mulf %411, %410 : vector<2x196xf32>
    %413 = arith.addf %407, %412 : vector<2x196xf32>
    %c6_327 = arith.constant 6 : index
    %c6_328 = arith.constant 6 : index
    %414 = memref.load %arg0[%c6_327, %c6_328] : memref<16x9xf32, #tpu.memory_space<smem>>
    %c6_329 = arith.constant 6 : index
    %c0_330 = arith.constant 0 : index
    %c0_331 = arith.constant 0 : index
    %415 = vector.load %arg2[%c6_329, %c0_330, %c0_331] : memref<9x2x196xf32, #tpu.memory_space<vmem>>, vector<1x2x196xf32>
    %416 = vector.shape_cast %415 : vector<1x2x196xf32> to vector<2x196xf32>
    %417 = vector.broadcast %414 : f32 to vector<2x196xf32>
    %418 = arith.mulf %417, %416 : vector<2x196xf32>
    %419 = arith.addf %413, %418 : vector<2x196xf32>
    %c6_332 = arith.constant 6 : index
    %c7_333 = arith.constant 7 : index
    %420 = memref.load %arg0[%c6_332, %c7_333] : memref<16x9xf32, #tpu.memory_space<smem>>
    %c7_334 = arith.constant 7 : index
    %c0_335 = arith.constant 0 : index
    %c0_336 = arith.constant 0 : index
    %421 = vector.load %arg2[%c7_334, %c0_335, %c0_336] : memref<9x2x196xf32, #tpu.memory_space<vmem>>, vector<1x2x196xf32>
    %422 = vector.shape_cast %421 : vector<1x2x196xf32> to vector<2x196xf32>
    %423 = vector.broadcast %420 : f32 to vector<2x196xf32>
    %424 = arith.mulf %423, %422 : vector<2x196xf32>
    %425 = arith.addf %419, %424 : vector<2x196xf32>
    %c6_337 = arith.constant 6 : index
    %c8_338 = arith.constant 8 : index
    %426 = memref.load %arg0[%c6_337, %c8_338] : memref<16x9xf32, #tpu.memory_space<smem>>
    %c8_339 = arith.constant 8 : index
    %c0_340 = arith.constant 0 : index
    %c0_341 = arith.constant 0 : index
    %427 = vector.load %arg2[%c8_339, %c0_340, %c0_341] : memref<9x2x196xf32, #tpu.memory_space<vmem>>, vector<1x2x196xf32>
    %428 = vector.shape_cast %427 : vector<1x2x196xf32> to vector<2x196xf32>
    %429 = vector.broadcast %426 : f32 to vector<2x196xf32>
    %430 = arith.mulf %429, %428 : vector<2x196xf32>
    %431 = arith.addf %425, %430 : vector<2x196xf32>
    %c6_342 = arith.constant 6 : index
    %432 = memref.load %arg1[%c6_342] : memref<16xf32, #tpu.memory_space<smem>>
    %433 = vector.broadcast %432 : f32 to vector<2x196xf32>
    %434 = arith.addf %431, %433 : vector<2x196xf32>
    %cst_343 = arith.constant 0.000000e+00 : f32
    %435 = vector.broadcast %cst_343 : f32 to vector<2x196xf32>
    %436 = arith.maximumf %434, %435 : vector<2x196xf32>
    %437 = arith.truncf %436 : vector<2x196xf32> to vector<2x196xbf16>
    %c6_344 = arith.constant 6 : index
    %c0_345 = arith.constant 0 : index
    %c0_346 = arith.constant 0 : index
    %438 = vector.load %arg3[%c6_344, %c0_345, %c0_346] : memref<16x196x128xbf16, #tpu.memory_space<vmem>>, vector<1x196x128xbf16>
    %439 = vector.shape_cast %438 : vector<1x196x128xbf16> to vector<196x128xbf16>
    %cst_347 = arith.constant dense<0.000000e+00> : vector<2x128xf32>
    %440 = tpu.matmul %437, %439, %cst_347 {dimension_numbers = #tpu.dot_dimension_numbers<[1], [0], [0], [1], [0, 0, 1, 1], [], []>} : vector<2x196xbf16>, vector<196x128xbf16>, vector<2x128xf32> -> vector<2x128xf32>
    %441 = arith.addf %378, %440 : vector<2x128xf32>
    %c7_348 = arith.constant 7 : index
    %c0_349 = arith.constant 0 : index
    %442 = memref.load %arg0[%c7_348, %c0_349] : memref<16x9xf32, #tpu.memory_space<smem>>
    %c0_350 = arith.constant 0 : index
    %c0_351 = arith.constant 0 : index
    %c0_352 = arith.constant 0 : index
    %443 = vector.load %arg2[%c0_350, %c0_351, %c0_352] : memref<9x2x196xf32, #tpu.memory_space<vmem>>, vector<1x2x196xf32>
    %444 = vector.shape_cast %443 : vector<1x2x196xf32> to vector<2x196xf32>
    %445 = vector.broadcast %442 : f32 to vector<2x196xf32>
    %446 = arith.mulf %445, %444 : vector<2x196xf32>
    %c7_353 = arith.constant 7 : index
    %c1_354 = arith.constant 1 : index
    %447 = memref.load %arg0[%c7_353, %c1_354] : memref<16x9xf32, #tpu.memory_space<smem>>
    %c1_355 = arith.constant 1 : index
    %c0_356 = arith.constant 0 : index
    %c0_357 = arith.constant 0 : index
    %448 = vector.load %arg2[%c1_355, %c0_356, %c0_357] : memref<9x2x196xf32, #tpu.memory_space<vmem>>, vector<1x2x196xf32>
    %449 = vector.shape_cast %448 : vector<1x2x196xf32> to vector<2x196xf32>
    %450 = vector.broadcast %447 : f32 to vector<2x196xf32>
    %451 = arith.mulf %450, %449 : vector<2x196xf32>
    %452 = arith.addf %446, %451 : vector<2x196xf32>
    %c7_358 = arith.constant 7 : index
    %c2_359 = arith.constant 2 : index
    %453 = memref.load %arg0[%c7_358, %c2_359] : memref<16x9xf32, #tpu.memory_space<smem>>
    %c2_360 = arith.constant 2 : index
    %c0_361 = arith.constant 0 : index
    %c0_362 = arith.constant 0 : index
    %454 = vector.load %arg2[%c2_360, %c0_361, %c0_362] : memref<9x2x196xf32, #tpu.memory_space<vmem>>, vector<1x2x196xf32>
    %455 = vector.shape_cast %454 : vector<1x2x196xf32> to vector<2x196xf32>
    %456 = vector.broadcast %453 : f32 to vector<2x196xf32>
    %457 = arith.mulf %456, %455 : vector<2x196xf32>
    %458 = arith.addf %452, %457 : vector<2x196xf32>
    %c7_363 = arith.constant 7 : index
    %c3_364 = arith.constant 3 : index
    %459 = memref.load %arg0[%c7_363, %c3_364] : memref<16x9xf32, #tpu.memory_space<smem>>
    %c3_365 = arith.constant 3 : index
    %c0_366 = arith.constant 0 : index
    %c0_367 = arith.constant 0 : index
    %460 = vector.load %arg2[%c3_365, %c0_366, %c0_367] : memref<9x2x196xf32, #tpu.memory_space<vmem>>, vector<1x2x196xf32>
    %461 = vector.shape_cast %460 : vector<1x2x196xf32> to vector<2x196xf32>
    %462 = vector.broadcast %459 : f32 to vector<2x196xf32>
    %463 = arith.mulf %462, %461 : vector<2x196xf32>
    %464 = arith.addf %458, %463 : vector<2x196xf32>
    %c7_368 = arith.constant 7 : index
    %c4_369 = arith.constant 4 : index
    %465 = memref.load %arg0[%c7_368, %c4_369] : memref<16x9xf32, #tpu.memory_space<smem>>
    %c4_370 = arith.constant 4 : index
    %c0_371 = arith.constant 0 : index
    %c0_372 = arith.constant 0 : index
    %466 = vector.load %arg2[%c4_370, %c0_371, %c0_372] : memref<9x2x196xf32, #tpu.memory_space<vmem>>, vector<1x2x196xf32>
    %467 = vector.shape_cast %466 : vector<1x2x196xf32> to vector<2x196xf32>
    %468 = vector.broadcast %465 : f32 to vector<2x196xf32>
    %469 = arith.mulf %468, %467 : vector<2x196xf32>
    %470 = arith.addf %464, %469 : vector<2x196xf32>
    %c7_373 = arith.constant 7 : index
    %c5_374 = arith.constant 5 : index
    %471 = memref.load %arg0[%c7_373, %c5_374] : memref<16x9xf32, #tpu.memory_space<smem>>
    %c5_375 = arith.constant 5 : index
    %c0_376 = arith.constant 0 : index
    %c0_377 = arith.constant 0 : index
    %472 = vector.load %arg2[%c5_375, %c0_376, %c0_377] : memref<9x2x196xf32, #tpu.memory_space<vmem>>, vector<1x2x196xf32>
    %473 = vector.shape_cast %472 : vector<1x2x196xf32> to vector<2x196xf32>
    %474 = vector.broadcast %471 : f32 to vector<2x196xf32>
    %475 = arith.mulf %474, %473 : vector<2x196xf32>
    %476 = arith.addf %470, %475 : vector<2x196xf32>
    %c7_378 = arith.constant 7 : index
    %c6_379 = arith.constant 6 : index
    %477 = memref.load %arg0[%c7_378, %c6_379] : memref<16x9xf32, #tpu.memory_space<smem>>
    %c6_380 = arith.constant 6 : index
    %c0_381 = arith.constant 0 : index
    %c0_382 = arith.constant 0 : index
    %478 = vector.load %arg2[%c6_380, %c0_381, %c0_382] : memref<9x2x196xf32, #tpu.memory_space<vmem>>, vector<1x2x196xf32>
    %479 = vector.shape_cast %478 : vector<1x2x196xf32> to vector<2x196xf32>
    %480 = vector.broadcast %477 : f32 to vector<2x196xf32>
    %481 = arith.mulf %480, %479 : vector<2x196xf32>
    %482 = arith.addf %476, %481 : vector<2x196xf32>
    %c7_383 = arith.constant 7 : index
    %c7_384 = arith.constant 7 : index
    %483 = memref.load %arg0[%c7_383, %c7_384] : memref<16x9xf32, #tpu.memory_space<smem>>
    %c7_385 = arith.constant 7 : index
    %c0_386 = arith.constant 0 : index
    %c0_387 = arith.constant 0 : index
    %484 = vector.load %arg2[%c7_385, %c0_386, %c0_387] : memref<9x2x196xf32, #tpu.memory_space<vmem>>, vector<1x2x196xf32>
    %485 = vector.shape_cast %484 : vector<1x2x196xf32> to vector<2x196xf32>
    %486 = vector.broadcast %483 : f32 to vector<2x196xf32>
    %487 = arith.mulf %486, %485 : vector<2x196xf32>
    %488 = arith.addf %482, %487 : vector<2x196xf32>
    %c7_388 = arith.constant 7 : index
    %c8_389 = arith.constant 8 : index
    %489 = memref.load %arg0[%c7_388, %c8_389] : memref<16x9xf32, #tpu.memory_space<smem>>
    %c8_390 = arith.constant 8 : index
    %c0_391 = arith.constant 0 : index
    %c0_392 = arith.constant 0 : index
    %490 = vector.load %arg2[%c8_390, %c0_391, %c0_392] : memref<9x2x196xf32, #tpu.memory_space<vmem>>, vector<1x2x196xf32>
    %491 = vector.shape_cast %490 : vector<1x2x196xf32> to vector<2x196xf32>
    %492 = vector.broadcast %489 : f32 to vector<2x196xf32>
    %493 = arith.mulf %492, %491 : vector<2x196xf32>
    %494 = arith.addf %488, %493 : vector<2x196xf32>
    %c7_393 = arith.constant 7 : index
    %495 = memref.load %arg1[%c7_393] : memref<16xf32, #tpu.memory_space<smem>>
    %496 = vector.broadcast %495 : f32 to vector<2x196xf32>
    %497 = arith.addf %494, %496 : vector<2x196xf32>
    %cst_394 = arith.constant 0.000000e+00 : f32
    %498 = vector.broadcast %cst_394 : f32 to vector<2x196xf32>
    %499 = arith.maximumf %497, %498 : vector<2x196xf32>
    %500 = arith.truncf %499 : vector<2x196xf32> to vector<2x196xbf16>
    %c7_395 = arith.constant 7 : index
    %c0_396 = arith.constant 0 : index
    %c0_397 = arith.constant 0 : index
    %501 = vector.load %arg3[%c7_395, %c0_396, %c0_397] : memref<16x196x128xbf16, #tpu.memory_space<vmem>>, vector<1x196x128xbf16>
    %502 = vector.shape_cast %501 : vector<1x196x128xbf16> to vector<196x128xbf16>
    %cst_398 = arith.constant dense<0.000000e+00> : vector<2x128xf32>
    %503 = tpu.matmul %500, %502, %cst_398 {dimension_numbers = #tpu.dot_dimension_numbers<[1], [0], [0], [1], [0, 0, 1, 1], [], []>} : vector<2x196xbf16>, vector<196x128xbf16>, vector<2x128xf32> -> vector<2x128xf32>
    %504 = arith.addf %441, %503 : vector<2x128xf32>
    %c8_399 = arith.constant 8 : index
    %c0_400 = arith.constant 0 : index
    %505 = memref.load %arg0[%c8_399, %c0_400] : memref<16x9xf32, #tpu.memory_space<smem>>
    %c0_401 = arith.constant 0 : index
    %c0_402 = arith.constant 0 : index
    %c0_403 = arith.constant 0 : index
    %506 = vector.load %arg2[%c0_401, %c0_402, %c0_403] : memref<9x2x196xf32, #tpu.memory_space<vmem>>, vector<1x2x196xf32>
    %507 = vector.shape_cast %506 : vector<1x2x196xf32> to vector<2x196xf32>
    %508 = vector.broadcast %505 : f32 to vector<2x196xf32>
    %509 = arith.mulf %508, %507 : vector<2x196xf32>
    %c8_404 = arith.constant 8 : index
    %c1_405 = arith.constant 1 : index
    %510 = memref.load %arg0[%c8_404, %c1_405] : memref<16x9xf32, #tpu.memory_space<smem>>
    %c1_406 = arith.constant 1 : index
    %c0_407 = arith.constant 0 : index
    %c0_408 = arith.constant 0 : index
    %511 = vector.load %arg2[%c1_406, %c0_407, %c0_408] : memref<9x2x196xf32, #tpu.memory_space<vmem>>, vector<1x2x196xf32>
    %512 = vector.shape_cast %511 : vector<1x2x196xf32> to vector<2x196xf32>
    %513 = vector.broadcast %510 : f32 to vector<2x196xf32>
    %514 = arith.mulf %513, %512 : vector<2x196xf32>
    %515 = arith.addf %509, %514 : vector<2x196xf32>
    %c8_409 = arith.constant 8 : index
    %c2_410 = arith.constant 2 : index
    %516 = memref.load %arg0[%c8_409, %c2_410] : memref<16x9xf32, #tpu.memory_space<smem>>
    %c2_411 = arith.constant 2 : index
    %c0_412 = arith.constant 0 : index
    %c0_413 = arith.constant 0 : index
    %517 = vector.load %arg2[%c2_411, %c0_412, %c0_413] : memref<9x2x196xf32, #tpu.memory_space<vmem>>, vector<1x2x196xf32>
    %518 = vector.shape_cast %517 : vector<1x2x196xf32> to vector<2x196xf32>
    %519 = vector.broadcast %516 : f32 to vector<2x196xf32>
    %520 = arith.mulf %519, %518 : vector<2x196xf32>
    %521 = arith.addf %515, %520 : vector<2x196xf32>
    %c8_414 = arith.constant 8 : index
    %c3_415 = arith.constant 3 : index
    %522 = memref.load %arg0[%c8_414, %c3_415] : memref<16x9xf32, #tpu.memory_space<smem>>
    %c3_416 = arith.constant 3 : index
    %c0_417 = arith.constant 0 : index
    %c0_418 = arith.constant 0 : index
    %523 = vector.load %arg2[%c3_416, %c0_417, %c0_418] : memref<9x2x196xf32, #tpu.memory_space<vmem>>, vector<1x2x196xf32>
    %524 = vector.shape_cast %523 : vector<1x2x196xf32> to vector<2x196xf32>
    %525 = vector.broadcast %522 : f32 to vector<2x196xf32>
    %526 = arith.mulf %525, %524 : vector<2x196xf32>
    %527 = arith.addf %521, %526 : vector<2x196xf32>
    %c8_419 = arith.constant 8 : index
    %c4_420 = arith.constant 4 : index
    %528 = memref.load %arg0[%c8_419, %c4_420] : memref<16x9xf32, #tpu.memory_space<smem>>
    %c4_421 = arith.constant 4 : index
    %c0_422 = arith.constant 0 : index
    %c0_423 = arith.constant 0 : index
    %529 = vector.load %arg2[%c4_421, %c0_422, %c0_423] : memref<9x2x196xf32, #tpu.memory_space<vmem>>, vector<1x2x196xf32>
    %530 = vector.shape_cast %529 : vector<1x2x196xf32> to vector<2x196xf32>
    %531 = vector.broadcast %528 : f32 to vector<2x196xf32>
    %532 = arith.mulf %531, %530 : vector<2x196xf32>
    %533 = arith.addf %527, %532 : vector<2x196xf32>
    %c8_424 = arith.constant 8 : index
    %c5_425 = arith.constant 5 : index
    %534 = memref.load %arg0[%c8_424, %c5_425] : memref<16x9xf32, #tpu.memory_space<smem>>
    %c5_426 = arith.constant 5 : index
    %c0_427 = arith.constant 0 : index
    %c0_428 = arith.constant 0 : index
    %535 = vector.load %arg2[%c5_426, %c0_427, %c0_428] : memref<9x2x196xf32, #tpu.memory_space<vmem>>, vector<1x2x196xf32>
    %536 = vector.shape_cast %535 : vector<1x2x196xf32> to vector<2x196xf32>
    %537 = vector.broadcast %534 : f32 to vector<2x196xf32>
    %538 = arith.mulf %537, %536 : vector<2x196xf32>
    %539 = arith.addf %533, %538 : vector<2x196xf32>
    %c8_429 = arith.constant 8 : index
    %c6_430 = arith.constant 6 : index
    %540 = memref.load %arg0[%c8_429, %c6_430] : memref<16x9xf32, #tpu.memory_space<smem>>
    %c6_431 = arith.constant 6 : index
    %c0_432 = arith.constant 0 : index
    %c0_433 = arith.constant 0 : index
    %541 = vector.load %arg2[%c6_431, %c0_432, %c0_433] : memref<9x2x196xf32, #tpu.memory_space<vmem>>, vector<1x2x196xf32>
    %542 = vector.shape_cast %541 : vector<1x2x196xf32> to vector<2x196xf32>
    %543 = vector.broadcast %540 : f32 to vector<2x196xf32>
    %544 = arith.mulf %543, %542 : vector<2x196xf32>
    %545 = arith.addf %539, %544 : vector<2x196xf32>
    %c8_434 = arith.constant 8 : index
    %c7_435 = arith.constant 7 : index
    %546 = memref.load %arg0[%c8_434, %c7_435] : memref<16x9xf32, #tpu.memory_space<smem>>
    %c7_436 = arith.constant 7 : index
    %c0_437 = arith.constant 0 : index
    %c0_438 = arith.constant 0 : index
    %547 = vector.load %arg2[%c7_436, %c0_437, %c0_438] : memref<9x2x196xf32, #tpu.memory_space<vmem>>, vector<1x2x196xf32>
    %548 = vector.shape_cast %547 : vector<1x2x196xf32> to vector<2x196xf32>
    %549 = vector.broadcast %546 : f32 to vector<2x196xf32>
    %550 = arith.mulf %549, %548 : vector<2x196xf32>
    %551 = arith.addf %545, %550 : vector<2x196xf32>
    %c8_439 = arith.constant 8 : index
    %c8_440 = arith.constant 8 : index
    %552 = memref.load %arg0[%c8_439, %c8_440] : memref<16x9xf32, #tpu.memory_space<smem>>
    %c8_441 = arith.constant 8 : index
    %c0_442 = arith.constant 0 : index
    %c0_443 = arith.constant 0 : index
    %553 = vector.load %arg2[%c8_441, %c0_442, %c0_443] : memref<9x2x196xf32, #tpu.memory_space<vmem>>, vector<1x2x196xf32>
    %554 = vector.shape_cast %553 : vector<1x2x196xf32> to vector<2x196xf32>
    %555 = vector.broadcast %552 : f32 to vector<2x196xf32>
    %556 = arith.mulf %555, %554 : vector<2x196xf32>
    %557 = arith.addf %551, %556 : vector<2x196xf32>
    %c8_444 = arith.constant 8 : index
    %558 = memref.load %arg1[%c8_444] : memref<16xf32, #tpu.memory_space<smem>>
    %559 = vector.broadcast %558 : f32 to vector<2x196xf32>
    %560 = arith.addf %557, %559 : vector<2x196xf32>
    %cst_445 = arith.constant 0.000000e+00 : f32
    %561 = vector.broadcast %cst_445 : f32 to vector<2x196xf32>
    %562 = arith.maximumf %560, %561 : vector<2x196xf32>
    %563 = arith.truncf %562 : vector<2x196xf32> to vector<2x196xbf16>
    %c8_446 = arith.constant 8 : index
    %c0_447 = arith.constant 0 : index
    %c0_448 = arith.constant 0 : index
    %564 = vector.load %arg3[%c8_446, %c0_447, %c0_448] : memref<16x196x128xbf16, #tpu.memory_space<vmem>>, vector<1x196x128xbf16>
    %565 = vector.shape_cast %564 : vector<1x196x128xbf16> to vector<196x128xbf16>
    %cst_449 = arith.constant dense<0.000000e+00> : vector<2x128xf32>
    %566 = tpu.matmul %563, %565, %cst_449 {dimension_numbers = #tpu.dot_dimension_numbers<[1], [0], [0], [1], [0, 0, 1, 1], [], []>} : vector<2x196xbf16>, vector<196x128xbf16>, vector<2x128xf32> -> vector<2x128xf32>
    %567 = arith.addf %504, %566 : vector<2x128xf32>
    %c9 = arith.constant 9 : index
    %c0_450 = arith.constant 0 : index
    %568 = memref.load %arg0[%c9, %c0_450] : memref<16x9xf32, #tpu.memory_space<smem>>
    %c0_451 = arith.constant 0 : index
    %c0_452 = arith.constant 0 : index
    %c0_453 = arith.constant 0 : index
    %569 = vector.load %arg2[%c0_451, %c0_452, %c0_453] : memref<9x2x196xf32, #tpu.memory_space<vmem>>, vector<1x2x196xf32>
    %570 = vector.shape_cast %569 : vector<1x2x196xf32> to vector<2x196xf32>
    %571 = vector.broadcast %568 : f32 to vector<2x196xf32>
    %572 = arith.mulf %571, %570 : vector<2x196xf32>
    %c9_454 = arith.constant 9 : index
    %c1_455 = arith.constant 1 : index
    %573 = memref.load %arg0[%c9_454, %c1_455] : memref<16x9xf32, #tpu.memory_space<smem>>
    %c1_456 = arith.constant 1 : index
    %c0_457 = arith.constant 0 : index
    %c0_458 = arith.constant 0 : index
    %574 = vector.load %arg2[%c1_456, %c0_457, %c0_458] : memref<9x2x196xf32, #tpu.memory_space<vmem>>, vector<1x2x196xf32>
    %575 = vector.shape_cast %574 : vector<1x2x196xf32> to vector<2x196xf32>
    %576 = vector.broadcast %573 : f32 to vector<2x196xf32>
    %577 = arith.mulf %576, %575 : vector<2x196xf32>
    %578 = arith.addf %572, %577 : vector<2x196xf32>
    %c9_459 = arith.constant 9 : index
    %c2_460 = arith.constant 2 : index
    %579 = memref.load %arg0[%c9_459, %c2_460] : memref<16x9xf32, #tpu.memory_space<smem>>
    %c2_461 = arith.constant 2 : index
    %c0_462 = arith.constant 0 : index
    %c0_463 = arith.constant 0 : index
    %580 = vector.load %arg2[%c2_461, %c0_462, %c0_463] : memref<9x2x196xf32, #tpu.memory_space<vmem>>, vector<1x2x196xf32>
    %581 = vector.shape_cast %580 : vector<1x2x196xf32> to vector<2x196xf32>
    %582 = vector.broadcast %579 : f32 to vector<2x196xf32>
    %583 = arith.mulf %582, %581 : vector<2x196xf32>
    %584 = arith.addf %578, %583 : vector<2x196xf32>
    %c9_464 = arith.constant 9 : index
    %c3_465 = arith.constant 3 : index
    %585 = memref.load %arg0[%c9_464, %c3_465] : memref<16x9xf32, #tpu.memory_space<smem>>
    %c3_466 = arith.constant 3 : index
    %c0_467 = arith.constant 0 : index
    %c0_468 = arith.constant 0 : index
    %586 = vector.load %arg2[%c3_466, %c0_467, %c0_468] : memref<9x2x196xf32, #tpu.memory_space<vmem>>, vector<1x2x196xf32>
    %587 = vector.shape_cast %586 : vector<1x2x196xf32> to vector<2x196xf32>
    %588 = vector.broadcast %585 : f32 to vector<2x196xf32>
    %589 = arith.mulf %588, %587 : vector<2x196xf32>
    %590 = arith.addf %584, %589 : vector<2x196xf32>
    %c9_469 = arith.constant 9 : index
    %c4_470 = arith.constant 4 : index
    %591 = memref.load %arg0[%c9_469, %c4_470] : memref<16x9xf32, #tpu.memory_space<smem>>
    %c4_471 = arith.constant 4 : index
    %c0_472 = arith.constant 0 : index
    %c0_473 = arith.constant 0 : index
    %592 = vector.load %arg2[%c4_471, %c0_472, %c0_473] : memref<9x2x196xf32, #tpu.memory_space<vmem>>, vector<1x2x196xf32>
    %593 = vector.shape_cast %592 : vector<1x2x196xf32> to vector<2x196xf32>
    %594 = vector.broadcast %591 : f32 to vector<2x196xf32>
    %595 = arith.mulf %594, %593 : vector<2x196xf32>
    %596 = arith.addf %590, %595 : vector<2x196xf32>
    %c9_474 = arith.constant 9 : index
    %c5_475 = arith.constant 5 : index
    %597 = memref.load %arg0[%c9_474, %c5_475] : memref<16x9xf32, #tpu.memory_space<smem>>
    %c5_476 = arith.constant 5 : index
    %c0_477 = arith.constant 0 : index
    %c0_478 = arith.constant 0 : index
    %598 = vector.load %arg2[%c5_476, %c0_477, %c0_478] : memref<9x2x196xf32, #tpu.memory_space<vmem>>, vector<1x2x196xf32>
    %599 = vector.shape_cast %598 : vector<1x2x196xf32> to vector<2x196xf32>
    %600 = vector.broadcast %597 : f32 to vector<2x196xf32>
    %601 = arith.mulf %600, %599 : vector<2x196xf32>
    %602 = arith.addf %596, %601 : vector<2x196xf32>
    %c9_479 = arith.constant 9 : index
    %c6_480 = arith.constant 6 : index
    %603 = memref.load %arg0[%c9_479, %c6_480] : memref<16x9xf32, #tpu.memory_space<smem>>
    %c6_481 = arith.constant 6 : index
    %c0_482 = arith.constant 0 : index
    %c0_483 = arith.constant 0 : index
    %604 = vector.load %arg2[%c6_481, %c0_482, %c0_483] : memref<9x2x196xf32, #tpu.memory_space<vmem>>, vector<1x2x196xf32>
    %605 = vector.shape_cast %604 : vector<1x2x196xf32> to vector<2x196xf32>
    %606 = vector.broadcast %603 : f32 to vector<2x196xf32>
    %607 = arith.mulf %606, %605 : vector<2x196xf32>
    %608 = arith.addf %602, %607 : vector<2x196xf32>
    %c9_484 = arith.constant 9 : index
    %c7_485 = arith.constant 7 : index
    %609 = memref.load %arg0[%c9_484, %c7_485] : memref<16x9xf32, #tpu.memory_space<smem>>
    %c7_486 = arith.constant 7 : index
    %c0_487 = arith.constant 0 : index
    %c0_488 = arith.constant 0 : index
    %610 = vector.load %arg2[%c7_486, %c0_487, %c0_488] : memref<9x2x196xf32, #tpu.memory_space<vmem>>, vector<1x2x196xf32>
    %611 = vector.shape_cast %610 : vector<1x2x196xf32> to vector<2x196xf32>
    %612 = vector.broadcast %609 : f32 to vector<2x196xf32>
    %613 = arith.mulf %612, %611 : vector<2x196xf32>
    %614 = arith.addf %608, %613 : vector<2x196xf32>
    %c9_489 = arith.constant 9 : index
    %c8_490 = arith.constant 8 : index
    %615 = memref.load %arg0[%c9_489, %c8_490] : memref<16x9xf32, #tpu.memory_space<smem>>
    %c8_491 = arith.constant 8 : index
    %c0_492 = arith.constant 0 : index
    %c0_493 = arith.constant 0 : index
    %616 = vector.load %arg2[%c8_491, %c0_492, %c0_493] : memref<9x2x196xf32, #tpu.memory_space<vmem>>, vector<1x2x196xf32>
    %617 = vector.shape_cast %616 : vector<1x2x196xf32> to vector<2x196xf32>
    %618 = vector.broadcast %615 : f32 to vector<2x196xf32>
    %619 = arith.mulf %618, %617 : vector<2x196xf32>
    %620 = arith.addf %614, %619 : vector<2x196xf32>
    %c9_494 = arith.constant 9 : index
    %621 = memref.load %arg1[%c9_494] : memref<16xf32, #tpu.memory_space<smem>>
    %622 = vector.broadcast %621 : f32 to vector<2x196xf32>
    %623 = arith.addf %620, %622 : vector<2x196xf32>
    %cst_495 = arith.constant 0.000000e+00 : f32
    %624 = vector.broadcast %cst_495 : f32 to vector<2x196xf32>
    %625 = arith.maximumf %623, %624 : vector<2x196xf32>
    %626 = arith.truncf %625 : vector<2x196xf32> to vector<2x196xbf16>
    %c9_496 = arith.constant 9 : index
    %c0_497 = arith.constant 0 : index
    %c0_498 = arith.constant 0 : index
    %627 = vector.load %arg3[%c9_496, %c0_497, %c0_498] : memref<16x196x128xbf16, #tpu.memory_space<vmem>>, vector<1x196x128xbf16>
    %628 = vector.shape_cast %627 : vector<1x196x128xbf16> to vector<196x128xbf16>
    %cst_499 = arith.constant dense<0.000000e+00> : vector<2x128xf32>
    %629 = tpu.matmul %626, %628, %cst_499 {dimension_numbers = #tpu.dot_dimension_numbers<[1], [0], [0], [1], [0, 0, 1, 1], [], []>} : vector<2x196xbf16>, vector<196x128xbf16>, vector<2x128xf32> -> vector<2x128xf32>
    %630 = arith.addf %567, %629 : vector<2x128xf32>
    %c10 = arith.constant 10 : index
    %c0_500 = arith.constant 0 : index
    %631 = memref.load %arg0[%c10, %c0_500] : memref<16x9xf32, #tpu.memory_space<smem>>
    %c0_501 = arith.constant 0 : index
    %c0_502 = arith.constant 0 : index
    %c0_503 = arith.constant 0 : index
    %632 = vector.load %arg2[%c0_501, %c0_502, %c0_503] : memref<9x2x196xf32, #tpu.memory_space<vmem>>, vector<1x2x196xf32>
    %633 = vector.shape_cast %632 : vector<1x2x196xf32> to vector<2x196xf32>
    %634 = vector.broadcast %631 : f32 to vector<2x196xf32>
    %635 = arith.mulf %634, %633 : vector<2x196xf32>
    %c10_504 = arith.constant 10 : index
    %c1_505 = arith.constant 1 : index
    %636 = memref.load %arg0[%c10_504, %c1_505] : memref<16x9xf32, #tpu.memory_space<smem>>
    %c1_506 = arith.constant 1 : index
    %c0_507 = arith.constant 0 : index
    %c0_508 = arith.constant 0 : index
    %637 = vector.load %arg2[%c1_506, %c0_507, %c0_508] : memref<9x2x196xf32, #tpu.memory_space<vmem>>, vector<1x2x196xf32>
    %638 = vector.shape_cast %637 : vector<1x2x196xf32> to vector<2x196xf32>
    %639 = vector.broadcast %636 : f32 to vector<2x196xf32>
    %640 = arith.mulf %639, %638 : vector<2x196xf32>
    %641 = arith.addf %635, %640 : vector<2x196xf32>
    %c10_509 = arith.constant 10 : index
    %c2_510 = arith.constant 2 : index
    %642 = memref.load %arg0[%c10_509, %c2_510] : memref<16x9xf32, #tpu.memory_space<smem>>
    %c2_511 = arith.constant 2 : index
    %c0_512 = arith.constant 0 : index
    %c0_513 = arith.constant 0 : index
    %643 = vector.load %arg2[%c2_511, %c0_512, %c0_513] : memref<9x2x196xf32, #tpu.memory_space<vmem>>, vector<1x2x196xf32>
    %644 = vector.shape_cast %643 : vector<1x2x196xf32> to vector<2x196xf32>
    %645 = vector.broadcast %642 : f32 to vector<2x196xf32>
    %646 = arith.mulf %645, %644 : vector<2x196xf32>
    %647 = arith.addf %641, %646 : vector<2x196xf32>
    %c10_514 = arith.constant 10 : index
    %c3_515 = arith.constant 3 : index
    %648 = memref.load %arg0[%c10_514, %c3_515] : memref<16x9xf32, #tpu.memory_space<smem>>
    %c3_516 = arith.constant 3 : index
    %c0_517 = arith.constant 0 : index
    %c0_518 = arith.constant 0 : index
    %649 = vector.load %arg2[%c3_516, %c0_517, %c0_518] : memref<9x2x196xf32, #tpu.memory_space<vmem>>, vector<1x2x196xf32>
    %650 = vector.shape_cast %649 : vector<1x2x196xf32> to vector<2x196xf32>
    %651 = vector.broadcast %648 : f32 to vector<2x196xf32>
    %652 = arith.mulf %651, %650 : vector<2x196xf32>
    %653 = arith.addf %647, %652 : vector<2x196xf32>
    %c10_519 = arith.constant 10 : index
    %c4_520 = arith.constant 4 : index
    %654 = memref.load %arg0[%c10_519, %c4_520] : memref<16x9xf32, #tpu.memory_space<smem>>
    %c4_521 = arith.constant 4 : index
    %c0_522 = arith.constant 0 : index
    %c0_523 = arith.constant 0 : index
    %655 = vector.load %arg2[%c4_521, %c0_522, %c0_523] : memref<9x2x196xf32, #tpu.memory_space<vmem>>, vector<1x2x196xf32>
    %656 = vector.shape_cast %655 : vector<1x2x196xf32> to vector<2x196xf32>
    %657 = vector.broadcast %654 : f32 to vector<2x196xf32>
    %658 = arith.mulf %657, %656 : vector<2x196xf32>
    %659 = arith.addf %653, %658 : vector<2x196xf32>
    %c10_524 = arith.constant 10 : index
    %c5_525 = arith.constant 5 : index
    %660 = memref.load %arg0[%c10_524, %c5_525] : memref<16x9xf32, #tpu.memory_space<smem>>
    %c5_526 = arith.constant 5 : index
    %c0_527 = arith.constant 0 : index
    %c0_528 = arith.constant 0 : index
    %661 = vector.load %arg2[%c5_526, %c0_527, %c0_528] : memref<9x2x196xf32, #tpu.memory_space<vmem>>, vector<1x2x196xf32>
    %662 = vector.shape_cast %661 : vector<1x2x196xf32> to vector<2x196xf32>
    %663 = vector.broadcast %660 : f32 to vector<2x196xf32>
    %664 = arith.mulf %663, %662 : vector<2x196xf32>
    %665 = arith.addf %659, %664 : vector<2x196xf32>
    %c10_529 = arith.constant 10 : index
    %c6_530 = arith.constant 6 : index
    %666 = memref.load %arg0[%c10_529, %c6_530] : memref<16x9xf32, #tpu.memory_space<smem>>
    %c6_531 = arith.constant 6 : index
    %c0_532 = arith.constant 0 : index
    %c0_533 = arith.constant 0 : index
    %667 = vector.load %arg2[%c6_531, %c0_532, %c0_533] : memref<9x2x196xf32, #tpu.memory_space<vmem>>, vector<1x2x196xf32>
    %668 = vector.shape_cast %667 : vector<1x2x196xf32> to vector<2x196xf32>
    %669 = vector.broadcast %666 : f32 to vector<2x196xf32>
    %670 = arith.mulf %669, %668 : vector<2x196xf32>
    %671 = arith.addf %665, %670 : vector<2x196xf32>
    %c10_534 = arith.constant 10 : index
    %c7_535 = arith.constant 7 : index
    %672 = memref.load %arg0[%c10_534, %c7_535] : memref<16x9xf32, #tpu.memory_space<smem>>
    %c7_536 = arith.constant 7 : index
    %c0_537 = arith.constant 0 : index
    %c0_538 = arith.constant 0 : index
    %673 = vector.load %arg2[%c7_536, %c0_537, %c0_538] : memref<9x2x196xf32, #tpu.memory_space<vmem>>, vector<1x2x196xf32>
    %674 = vector.shape_cast %673 : vector<1x2x196xf32> to vector<2x196xf32>
    %675 = vector.broadcast %672 : f32 to vector<2x196xf32>
    %676 = arith.mulf %675, %674 : vector<2x196xf32>
    %677 = arith.addf %671, %676 : vector<2x196xf32>
    %c10_539 = arith.constant 10 : index
    %c8_540 = arith.constant 8 : index
    %678 = memref.load %arg0[%c10_539, %c8_540] : memref<16x9xf32, #tpu.memory_space<smem>>
    %c8_541 = arith.constant 8 : index
    %c0_542 = arith.constant 0 : index
    %c0_543 = arith.constant 0 : index
    %679 = vector.load %arg2[%c8_541, %c0_542, %c0_543] : memref<9x2x196xf32, #tpu.memory_space<vmem>>, vector<1x2x196xf32>
    %680 = vector.shape_cast %679 : vector<1x2x196xf32> to vector<2x196xf32>
    %681 = vector.broadcast %678 : f32 to vector<2x196xf32>
    %682 = arith.mulf %681, %680 : vector<2x196xf32>
    %683 = arith.addf %677, %682 : vector<2x196xf32>
    %c10_544 = arith.constant 10 : index
    %684 = memref.load %arg1[%c10_544] : memref<16xf32, #tpu.memory_space<smem>>
    %685 = vector.broadcast %684 : f32 to vector<2x196xf32>
    %686 = arith.addf %683, %685 : vector<2x196xf32>
    %cst_545 = arith.constant 0.000000e+00 : f32
    %687 = vector.broadcast %cst_545 : f32 to vector<2x196xf32>
    %688 = arith.maximumf %686, %687 : vector<2x196xf32>
    %689 = arith.truncf %688 : vector<2x196xf32> to vector<2x196xbf16>
    %c10_546 = arith.constant 10 : index
    %c0_547 = arith.constant 0 : index
    %c0_548 = arith.constant 0 : index
    %690 = vector.load %arg3[%c10_546, %c0_547, %c0_548] : memref<16x196x128xbf16, #tpu.memory_space<vmem>>, vector<1x196x128xbf16>
    %691 = vector.shape_cast %690 : vector<1x196x128xbf16> to vector<196x128xbf16>
    %cst_549 = arith.constant dense<0.000000e+00> : vector<2x128xf32>
    %692 = tpu.matmul %689, %691, %cst_549 {dimension_numbers = #tpu.dot_dimension_numbers<[1], [0], [0], [1], [0, 0, 1, 1], [], []>} : vector<2x196xbf16>, vector<196x128xbf16>, vector<2x128xf32> -> vector<2x128xf32>
    %693 = arith.addf %630, %692 : vector<2x128xf32>
    %c11 = arith.constant 11 : index
    %c0_550 = arith.constant 0 : index
    %694 = memref.load %arg0[%c11, %c0_550] : memref<16x9xf32, #tpu.memory_space<smem>>
    %c0_551 = arith.constant 0 : index
    %c0_552 = arith.constant 0 : index
    %c0_553 = arith.constant 0 : index
    %695 = vector.load %arg2[%c0_551, %c0_552, %c0_553] : memref<9x2x196xf32, #tpu.memory_space<vmem>>, vector<1x2x196xf32>
    %696 = vector.shape_cast %695 : vector<1x2x196xf32> to vector<2x196xf32>
    %697 = vector.broadcast %694 : f32 to vector<2x196xf32>
    %698 = arith.mulf %697, %696 : vector<2x196xf32>
    %c11_554 = arith.constant 11 : index
    %c1_555 = arith.constant 1 : index
    %699 = memref.load %arg0[%c11_554, %c1_555] : memref<16x9xf32, #tpu.memory_space<smem>>
    %c1_556 = arith.constant 1 : index
    %c0_557 = arith.constant 0 : index
    %c0_558 = arith.constant 0 : index
    %700 = vector.load %arg2[%c1_556, %c0_557, %c0_558] : memref<9x2x196xf32, #tpu.memory_space<vmem>>, vector<1x2x196xf32>
    %701 = vector.shape_cast %700 : vector<1x2x196xf32> to vector<2x196xf32>
    %702 = vector.broadcast %699 : f32 to vector<2x196xf32>
    %703 = arith.mulf %702, %701 : vector<2x196xf32>
    %704 = arith.addf %698, %703 : vector<2x196xf32>
    %c11_559 = arith.constant 11 : index
    %c2_560 = arith.constant 2 : index
    %705 = memref.load %arg0[%c11_559, %c2_560] : memref<16x9xf32, #tpu.memory_space<smem>>
    %c2_561 = arith.constant 2 : index
    %c0_562 = arith.constant 0 : index
    %c0_563 = arith.constant 0 : index
    %706 = vector.load %arg2[%c2_561, %c0_562, %c0_563] : memref<9x2x196xf32, #tpu.memory_space<vmem>>, vector<1x2x196xf32>
    %707 = vector.shape_cast %706 : vector<1x2x196xf32> to vector<2x196xf32>
    %708 = vector.broadcast %705 : f32 to vector<2x196xf32>
    %709 = arith.mulf %708, %707 : vector<2x196xf32>
    %710 = arith.addf %704, %709 : vector<2x196xf32>
    %c11_564 = arith.constant 11 : index
    %c3_565 = arith.constant 3 : index
    %711 = memref.load %arg0[%c11_564, %c3_565] : memref<16x9xf32, #tpu.memory_space<smem>>
    %c3_566 = arith.constant 3 : index
    %c0_567 = arith.constant 0 : index
    %c0_568 = arith.constant 0 : index
    %712 = vector.load %arg2[%c3_566, %c0_567, %c0_568] : memref<9x2x196xf32, #tpu.memory_space<vmem>>, vector<1x2x196xf32>
    %713 = vector.shape_cast %712 : vector<1x2x196xf32> to vector<2x196xf32>
    %714 = vector.broadcast %711 : f32 to vector<2x196xf32>
    %715 = arith.mulf %714, %713 : vector<2x196xf32>
    %716 = arith.addf %710, %715 : vector<2x196xf32>
    %c11_569 = arith.constant 11 : index
    %c4_570 = arith.constant 4 : index
    %717 = memref.load %arg0[%c11_569, %c4_570] : memref<16x9xf32, #tpu.memory_space<smem>>
    %c4_571 = arith.constant 4 : index
    %c0_572 = arith.constant 0 : index
    %c0_573 = arith.constant 0 : index
    %718 = vector.load %arg2[%c4_571, %c0_572, %c0_573] : memref<9x2x196xf32, #tpu.memory_space<vmem>>, vector<1x2x196xf32>
    %719 = vector.shape_cast %718 : vector<1x2x196xf32> to vector<2x196xf32>
    %720 = vector.broadcast %717 : f32 to vector<2x196xf32>
    %721 = arith.mulf %720, %719 : vector<2x196xf32>
    %722 = arith.addf %716, %721 : vector<2x196xf32>
    %c11_574 = arith.constant 11 : index
    %c5_575 = arith.constant 5 : index
    %723 = memref.load %arg0[%c11_574, %c5_575] : memref<16x9xf32, #tpu.memory_space<smem>>
    %c5_576 = arith.constant 5 : index
    %c0_577 = arith.constant 0 : index
    %c0_578 = arith.constant 0 : index
    %724 = vector.load %arg2[%c5_576, %c0_577, %c0_578] : memref<9x2x196xf32, #tpu.memory_space<vmem>>, vector<1x2x196xf32>
    %725 = vector.shape_cast %724 : vector<1x2x196xf32> to vector<2x196xf32>
    %726 = vector.broadcast %723 : f32 to vector<2x196xf32>
    %727 = arith.mulf %726, %725 : vector<2x196xf32>
    %728 = arith.addf %722, %727 : vector<2x196xf32>
    %c11_579 = arith.constant 11 : index
    %c6_580 = arith.constant 6 : index
    %729 = memref.load %arg0[%c11_579, %c6_580] : memref<16x9xf32, #tpu.memory_space<smem>>
    %c6_581 = arith.constant 6 : index
    %c0_582 = arith.constant 0 : index
    %c0_583 = arith.constant 0 : index
    %730 = vector.load %arg2[%c6_581, %c0_582, %c0_583] : memref<9x2x196xf32, #tpu.memory_space<vmem>>, vector<1x2x196xf32>
    %731 = vector.shape_cast %730 : vector<1x2x196xf32> to vector<2x196xf32>
    %732 = vector.broadcast %729 : f32 to vector<2x196xf32>
    %733 = arith.mulf %732, %731 : vector<2x196xf32>
    %734 = arith.addf %728, %733 : vector<2x196xf32>
    %c11_584 = arith.constant 11 : index
    %c7_585 = arith.constant 7 : index
    %735 = memref.load %arg0[%c11_584, %c7_585] : memref<16x9xf32, #tpu.memory_space<smem>>
    %c7_586 = arith.constant 7 : index
    %c0_587 = arith.constant 0 : index
    %c0_588 = arith.constant 0 : index
    %736 = vector.load %arg2[%c7_586, %c0_587, %c0_588] : memref<9x2x196xf32, #tpu.memory_space<vmem>>, vector<1x2x196xf32>
    %737 = vector.shape_cast %736 : vector<1x2x196xf32> to vector<2x196xf32>
    %738 = vector.broadcast %735 : f32 to vector<2x196xf32>
    %739 = arith.mulf %738, %737 : vector<2x196xf32>
    %740 = arith.addf %734, %739 : vector<2x196xf32>
    %c11_589 = arith.constant 11 : index
    %c8_590 = arith.constant 8 : index
    %741 = memref.load %arg0[%c11_589, %c8_590] : memref<16x9xf32, #tpu.memory_space<smem>>
    %c8_591 = arith.constant 8 : index
    %c0_592 = arith.constant 0 : index
    %c0_593 = arith.constant 0 : index
    %742 = vector.load %arg2[%c8_591, %c0_592, %c0_593] : memref<9x2x196xf32, #tpu.memory_space<vmem>>, vector<1x2x196xf32>
    %743 = vector.shape_cast %742 : vector<1x2x196xf32> to vector<2x196xf32>
    %744 = vector.broadcast %741 : f32 to vector<2x196xf32>
    %745 = arith.mulf %744, %743 : vector<2x196xf32>
    %746 = arith.addf %740, %745 : vector<2x196xf32>
    %c11_594 = arith.constant 11 : index
    %747 = memref.load %arg1[%c11_594] : memref<16xf32, #tpu.memory_space<smem>>
    %748 = vector.broadcast %747 : f32 to vector<2x196xf32>
    %749 = arith.addf %746, %748 : vector<2x196xf32>
    %cst_595 = arith.constant 0.000000e+00 : f32
    %750 = vector.broadcast %cst_595 : f32 to vector<2x196xf32>
    %751 = arith.maximumf %749, %750 : vector<2x196xf32>
    %752 = arith.truncf %751 : vector<2x196xf32> to vector<2x196xbf16>
    %c11_596 = arith.constant 11 : index
    %c0_597 = arith.constant 0 : index
    %c0_598 = arith.constant 0 : index
    %753 = vector.load %arg3[%c11_596, %c0_597, %c0_598] : memref<16x196x128xbf16, #tpu.memory_space<vmem>>, vector<1x196x128xbf16>
    %754 = vector.shape_cast %753 : vector<1x196x128xbf16> to vector<196x128xbf16>
    %cst_599 = arith.constant dense<0.000000e+00> : vector<2x128xf32>
    %755 = tpu.matmul %752, %754, %cst_599 {dimension_numbers = #tpu.dot_dimension_numbers<[1], [0], [0], [1], [0, 0, 1, 1], [], []>} : vector<2x196xbf16>, vector<196x128xbf16>, vector<2x128xf32> -> vector<2x128xf32>
    %756 = arith.addf %693, %755 : vector<2x128xf32>
    %c12 = arith.constant 12 : index
    %c0_600 = arith.constant 0 : index
    %757 = memref.load %arg0[%c12, %c0_600] : memref<16x9xf32, #tpu.memory_space<smem>>
    %c0_601 = arith.constant 0 : index
    %c0_602 = arith.constant 0 : index
    %c0_603 = arith.constant 0 : index
    %758 = vector.load %arg2[%c0_601, %c0_602, %c0_603] : memref<9x2x196xf32, #tpu.memory_space<vmem>>, vector<1x2x196xf32>
    %759 = vector.shape_cast %758 : vector<1x2x196xf32> to vector<2x196xf32>
    %760 = vector.broadcast %757 : f32 to vector<2x196xf32>
    %761 = arith.mulf %760, %759 : vector<2x196xf32>
    %c12_604 = arith.constant 12 : index
    %c1_605 = arith.constant 1 : index
    %762 = memref.load %arg0[%c12_604, %c1_605] : memref<16x9xf32, #tpu.memory_space<smem>>
    %c1_606 = arith.constant 1 : index
    %c0_607 = arith.constant 0 : index
    %c0_608 = arith.constant 0 : index
    %763 = vector.load %arg2[%c1_606, %c0_607, %c0_608] : memref<9x2x196xf32, #tpu.memory_space<vmem>>, vector<1x2x196xf32>
    %764 = vector.shape_cast %763 : vector<1x2x196xf32> to vector<2x196xf32>
    %765 = vector.broadcast %762 : f32 to vector<2x196xf32>
    %766 = arith.mulf %765, %764 : vector<2x196xf32>
    %767 = arith.addf %761, %766 : vector<2x196xf32>
    %c12_609 = arith.constant 12 : index
    %c2_610 = arith.constant 2 : index
    %768 = memref.load %arg0[%c12_609, %c2_610] : memref<16x9xf32, #tpu.memory_space<smem>>
    %c2_611 = arith.constant 2 : index
    %c0_612 = arith.constant 0 : index
    %c0_613 = arith.constant 0 : index
    %769 = vector.load %arg2[%c2_611, %c0_612, %c0_613] : memref<9x2x196xf32, #tpu.memory_space<vmem>>, vector<1x2x196xf32>
    %770 = vector.shape_cast %769 : vector<1x2x196xf32> to vector<2x196xf32>
    %771 = vector.broadcast %768 : f32 to vector<2x196xf32>
    %772 = arith.mulf %771, %770 : vector<2x196xf32>
    %773 = arith.addf %767, %772 : vector<2x196xf32>
    %c12_614 = arith.constant 12 : index
    %c3_615 = arith.constant 3 : index
    %774 = memref.load %arg0[%c12_614, %c3_615] : memref<16x9xf32, #tpu.memory_space<smem>>
    %c3_616 = arith.constant 3 : index
    %c0_617 = arith.constant 0 : index
    %c0_618 = arith.constant 0 : index
    %775 = vector.load %arg2[%c3_616, %c0_617, %c0_618] : memref<9x2x196xf32, #tpu.memory_space<vmem>>, vector<1x2x196xf32>
    %776 = vector.shape_cast %775 : vector<1x2x196xf32> to vector<2x196xf32>
    %777 = vector.broadcast %774 : f32 to vector<2x196xf32>
    %778 = arith.mulf %777, %776 : vector<2x196xf32>
    %779 = arith.addf %773, %778 : vector<2x196xf32>
    %c12_619 = arith.constant 12 : index
    %c4_620 = arith.constant 4 : index
    %780 = memref.load %arg0[%c12_619, %c4_620] : memref<16x9xf32, #tpu.memory_space<smem>>
    %c4_621 = arith.constant 4 : index
    %c0_622 = arith.constant 0 : index
    %c0_623 = arith.constant 0 : index
    %781 = vector.load %arg2[%c4_621, %c0_622, %c0_623] : memref<9x2x196xf32, #tpu.memory_space<vmem>>, vector<1x2x196xf32>
    %782 = vector.shape_cast %781 : vector<1x2x196xf32> to vector<2x196xf32>
    %783 = vector.broadcast %780 : f32 to vector<2x196xf32>
    %784 = arith.mulf %783, %782 : vector<2x196xf32>
    %785 = arith.addf %779, %784 : vector<2x196xf32>
    %c12_624 = arith.constant 12 : index
    %c5_625 = arith.constant 5 : index
    %786 = memref.load %arg0[%c12_624, %c5_625] : memref<16x9xf32, #tpu.memory_space<smem>>
    %c5_626 = arith.constant 5 : index
    %c0_627 = arith.constant 0 : index
    %c0_628 = arith.constant 0 : index
    %787 = vector.load %arg2[%c5_626, %c0_627, %c0_628] : memref<9x2x196xf32, #tpu.memory_space<vmem>>, vector<1x2x196xf32>
    %788 = vector.shape_cast %787 : vector<1x2x196xf32> to vector<2x196xf32>
    %789 = vector.broadcast %786 : f32 to vector<2x196xf32>
    %790 = arith.mulf %789, %788 : vector<2x196xf32>
    %791 = arith.addf %785, %790 : vector<2x196xf32>
    %c12_629 = arith.constant 12 : index
    %c6_630 = arith.constant 6 : index
    %792 = memref.load %arg0[%c12_629, %c6_630] : memref<16x9xf32, #tpu.memory_space<smem>>
    %c6_631 = arith.constant 6 : index
    %c0_632 = arith.constant 0 : index
    %c0_633 = arith.constant 0 : index
    %793 = vector.load %arg2[%c6_631, %c0_632, %c0_633] : memref<9x2x196xf32, #tpu.memory_space<vmem>>, vector<1x2x196xf32>
    %794 = vector.shape_cast %793 : vector<1x2x196xf32> to vector<2x196xf32>
    %795 = vector.broadcast %792 : f32 to vector<2x196xf32>
    %796 = arith.mulf %795, %794 : vector<2x196xf32>
    %797 = arith.addf %791, %796 : vector<2x196xf32>
    %c12_634 = arith.constant 12 : index
    %c7_635 = arith.constant 7 : index
    %798 = memref.load %arg0[%c12_634, %c7_635] : memref<16x9xf32, #tpu.memory_space<smem>>
    %c7_636 = arith.constant 7 : index
    %c0_637 = arith.constant 0 : index
    %c0_638 = arith.constant 0 : index
    %799 = vector.load %arg2[%c7_636, %c0_637, %c0_638] : memref<9x2x196xf32, #tpu.memory_space<vmem>>, vector<1x2x196xf32>
    %800 = vector.shape_cast %799 : vector<1x2x196xf32> to vector<2x196xf32>
    %801 = vector.broadcast %798 : f32 to vector<2x196xf32>
    %802 = arith.mulf %801, %800 : vector<2x196xf32>
    %803 = arith.addf %797, %802 : vector<2x196xf32>
    %c12_639 = arith.constant 12 : index
    %c8_640 = arith.constant 8 : index
    %804 = memref.load %arg0[%c12_639, %c8_640] : memref<16x9xf32, #tpu.memory_space<smem>>
    %c8_641 = arith.constant 8 : index
    %c0_642 = arith.constant 0 : index
    %c0_643 = arith.constant 0 : index
    %805 = vector.load %arg2[%c8_641, %c0_642, %c0_643] : memref<9x2x196xf32, #tpu.memory_space<vmem>>, vector<1x2x196xf32>
    %806 = vector.shape_cast %805 : vector<1x2x196xf32> to vector<2x196xf32>
    %807 = vector.broadcast %804 : f32 to vector<2x196xf32>
    %808 = arith.mulf %807, %806 : vector<2x196xf32>
    %809 = arith.addf %803, %808 : vector<2x196xf32>
    %c12_644 = arith.constant 12 : index
    %810 = memref.load %arg1[%c12_644] : memref<16xf32, #tpu.memory_space<smem>>
    %811 = vector.broadcast %810 : f32 to vector<2x196xf32>
    %812 = arith.addf %809, %811 : vector<2x196xf32>
    %cst_645 = arith.constant 0.000000e+00 : f32
    %813 = vector.broadcast %cst_645 : f32 to vector<2x196xf32>
    %814 = arith.maximumf %812, %813 : vector<2x196xf32>
    %815 = arith.truncf %814 : vector<2x196xf32> to vector<2x196xbf16>
    %c12_646 = arith.constant 12 : index
    %c0_647 = arith.constant 0 : index
    %c0_648 = arith.constant 0 : index
    %816 = vector.load %arg3[%c12_646, %c0_647, %c0_648] : memref<16x196x128xbf16, #tpu.memory_space<vmem>>, vector<1x196x128xbf16>
    %817 = vector.shape_cast %816 : vector<1x196x128xbf16> to vector<196x128xbf16>
    %cst_649 = arith.constant dense<0.000000e+00> : vector<2x128xf32>
    %818 = tpu.matmul %815, %817, %cst_649 {dimension_numbers = #tpu.dot_dimension_numbers<[1], [0], [0], [1], [0, 0, 1, 1], [], []>} : vector<2x196xbf16>, vector<196x128xbf16>, vector<2x128xf32> -> vector<2x128xf32>
    %819 = arith.addf %756, %818 : vector<2x128xf32>
    %c13 = arith.constant 13 : index
    %c0_650 = arith.constant 0 : index
    %820 = memref.load %arg0[%c13, %c0_650] : memref<16x9xf32, #tpu.memory_space<smem>>
    %c0_651 = arith.constant 0 : index
    %c0_652 = arith.constant 0 : index
    %c0_653 = arith.constant 0 : index
    %821 = vector.load %arg2[%c0_651, %c0_652, %c0_653] : memref<9x2x196xf32, #tpu.memory_space<vmem>>, vector<1x2x196xf32>
    %822 = vector.shape_cast %821 : vector<1x2x196xf32> to vector<2x196xf32>
    %823 = vector.broadcast %820 : f32 to vector<2x196xf32>
    %824 = arith.mulf %823, %822 : vector<2x196xf32>
    %c13_654 = arith.constant 13 : index
    %c1_655 = arith.constant 1 : index
    %825 = memref.load %arg0[%c13_654, %c1_655] : memref<16x9xf32, #tpu.memory_space<smem>>
    %c1_656 = arith.constant 1 : index
    %c0_657 = arith.constant 0 : index
    %c0_658 = arith.constant 0 : index
    %826 = vector.load %arg2[%c1_656, %c0_657, %c0_658] : memref<9x2x196xf32, #tpu.memory_space<vmem>>, vector<1x2x196xf32>
    %827 = vector.shape_cast %826 : vector<1x2x196xf32> to vector<2x196xf32>
    %828 = vector.broadcast %825 : f32 to vector<2x196xf32>
    %829 = arith.mulf %828, %827 : vector<2x196xf32>
    %830 = arith.addf %824, %829 : vector<2x196xf32>
    %c13_659 = arith.constant 13 : index
    %c2_660 = arith.constant 2 : index
    %831 = memref.load %arg0[%c13_659, %c2_660] : memref<16x9xf32, #tpu.memory_space<smem>>
    %c2_661 = arith.constant 2 : index
    %c0_662 = arith.constant 0 : index
    %c0_663 = arith.constant 0 : index
    %832 = vector.load %arg2[%c2_661, %c0_662, %c0_663] : memref<9x2x196xf32, #tpu.memory_space<vmem>>, vector<1x2x196xf32>
    %833 = vector.shape_cast %832 : vector<1x2x196xf32> to vector<2x196xf32>
    %834 = vector.broadcast %831 : f32 to vector<2x196xf32>
    %835 = arith.mulf %834, %833 : vector<2x196xf32>
    %836 = arith.addf %830, %835 : vector<2x196xf32>
    %c13_664 = arith.constant 13 : index
    %c3_665 = arith.constant 3 : index
    %837 = memref.load %arg0[%c13_664, %c3_665] : memref<16x9xf32, #tpu.memory_space<smem>>
    %c3_666 = arith.constant 3 : index
    %c0_667 = arith.constant 0 : index
    %c0_668 = arith.constant 0 : index
    %838 = vector.load %arg2[%c3_666, %c0_667, %c0_668] : memref<9x2x196xf32, #tpu.memory_space<vmem>>, vector<1x2x196xf32>
    %839 = vector.shape_cast %838 : vector<1x2x196xf32> to vector<2x196xf32>
    %840 = vector.broadcast %837 : f32 to vector<2x196xf32>
    %841 = arith.mulf %840, %839 : vector<2x196xf32>
    %842 = arith.addf %836, %841 : vector<2x196xf32>
    %c13_669 = arith.constant 13 : index
    %c4_670 = arith.constant 4 : index
    %843 = memref.load %arg0[%c13_669, %c4_670] : memref<16x9xf32, #tpu.memory_space<smem>>
    %c4_671 = arith.constant 4 : index
    %c0_672 = arith.constant 0 : index
    %c0_673 = arith.constant 0 : index
    %844 = vector.load %arg2[%c4_671, %c0_672, %c0_673] : memref<9x2x196xf32, #tpu.memory_space<vmem>>, vector<1x2x196xf32>
    %845 = vector.shape_cast %844 : vector<1x2x196xf32> to vector<2x196xf32>
    %846 = vector.broadcast %843 : f32 to vector<2x196xf32>
    %847 = arith.mulf %846, %845 : vector<2x196xf32>
    %848 = arith.addf %842, %847 : vector<2x196xf32>
    %c13_674 = arith.constant 13 : index
    %c5_675 = arith.constant 5 : index
    %849 = memref.load %arg0[%c13_674, %c5_675] : memref<16x9xf32, #tpu.memory_space<smem>>
    %c5_676 = arith.constant 5 : index
    %c0_677 = arith.constant 0 : index
    %c0_678 = arith.constant 0 : index
    %850 = vector.load %arg2[%c5_676, %c0_677, %c0_678] : memref<9x2x196xf32, #tpu.memory_space<vmem>>, vector<1x2x196xf32>
    %851 = vector.shape_cast %850 : vector<1x2x196xf32> to vector<2x196xf32>
    %852 = vector.broadcast %849 : f32 to vector<2x196xf32>
    %853 = arith.mulf %852, %851 : vector<2x196xf32>
    %854 = arith.addf %848, %853 : vector<2x196xf32>
    %c13_679 = arith.constant 13 : index
    %c6_680 = arith.constant 6 : index
    %855 = memref.load %arg0[%c13_679, %c6_680] : memref<16x9xf32, #tpu.memory_space<smem>>
    %c6_681 = arith.constant 6 : index
    %c0_682 = arith.constant 0 : index
    %c0_683 = arith.constant 0 : index
    %856 = vector.load %arg2[%c6_681, %c0_682, %c0_683] : memref<9x2x196xf32, #tpu.memory_space<vmem>>, vector<1x2x196xf32>
    %857 = vector.shape_cast %856 : vector<1x2x196xf32> to vector<2x196xf32>
    %858 = vector.broadcast %855 : f32 to vector<2x196xf32>
    %859 = arith.mulf %858, %857 : vector<2x196xf32>
    %860 = arith.addf %854, %859 : vector<2x196xf32>
    %c13_684 = arith.constant 13 : index
    %c7_685 = arith.constant 7 : index
    %861 = memref.load %arg0[%c13_684, %c7_685] : memref<16x9xf32, #tpu.memory_space<smem>>
    %c7_686 = arith.constant 7 : index
    %c0_687 = arith.constant 0 : index
    %c0_688 = arith.constant 0 : index
    %862 = vector.load %arg2[%c7_686, %c0_687, %c0_688] : memref<9x2x196xf32, #tpu.memory_space<vmem>>, vector<1x2x196xf32>
    %863 = vector.shape_cast %862 : vector<1x2x196xf32> to vector<2x196xf32>
    %864 = vector.broadcast %861 : f32 to vector<2x196xf32>
    %865 = arith.mulf %864, %863 : vector<2x196xf32>
    %866 = arith.addf %860, %865 : vector<2x196xf32>
    %c13_689 = arith.constant 13 : index
    %c8_690 = arith.constant 8 : index
    %867 = memref.load %arg0[%c13_689, %c8_690] : memref<16x9xf32, #tpu.memory_space<smem>>
    %c8_691 = arith.constant 8 : index
    %c0_692 = arith.constant 0 : index
    %c0_693 = arith.constant 0 : index
    %868 = vector.load %arg2[%c8_691, %c0_692, %c0_693] : memref<9x2x196xf32, #tpu.memory_space<vmem>>, vector<1x2x196xf32>
    %869 = vector.shape_cast %868 : vector<1x2x196xf32> to vector<2x196xf32>
    %870 = vector.broadcast %867 : f32 to vector<2x196xf32>
    %871 = arith.mulf %870, %869 : vector<2x196xf32>
    %872 = arith.addf %866, %871 : vector<2x196xf32>
    %c13_694 = arith.constant 13 : index
    %873 = memref.load %arg1[%c13_694] : memref<16xf32, #tpu.memory_space<smem>>
    %874 = vector.broadcast %873 : f32 to vector<2x196xf32>
    %875 = arith.addf %872, %874 : vector<2x196xf32>
    %cst_695 = arith.constant 0.000000e+00 : f32
    %876 = vector.broadcast %cst_695 : f32 to vector<2x196xf32>
    %877 = arith.maximumf %875, %876 : vector<2x196xf32>
    %878 = arith.truncf %877 : vector<2x196xf32> to vector<2x196xbf16>
    %c13_696 = arith.constant 13 : index
    %c0_697 = arith.constant 0 : index
    %c0_698 = arith.constant 0 : index
    %879 = vector.load %arg3[%c13_696, %c0_697, %c0_698] : memref<16x196x128xbf16, #tpu.memory_space<vmem>>, vector<1x196x128xbf16>
    %880 = vector.shape_cast %879 : vector<1x196x128xbf16> to vector<196x128xbf16>
    %cst_699 = arith.constant dense<0.000000e+00> : vector<2x128xf32>
    %881 = tpu.matmul %878, %880, %cst_699 {dimension_numbers = #tpu.dot_dimension_numbers<[1], [0], [0], [1], [0, 0, 1, 1], [], []>} : vector<2x196xbf16>, vector<196x128xbf16>, vector<2x128xf32> -> vector<2x128xf32>
    %882 = arith.addf %819, %881 : vector<2x128xf32>
    %c14 = arith.constant 14 : index
    %c0_700 = arith.constant 0 : index
    %883 = memref.load %arg0[%c14, %c0_700] : memref<16x9xf32, #tpu.memory_space<smem>>
    %c0_701 = arith.constant 0 : index
    %c0_702 = arith.constant 0 : index
    %c0_703 = arith.constant 0 : index
    %884 = vector.load %arg2[%c0_701, %c0_702, %c0_703] : memref<9x2x196xf32, #tpu.memory_space<vmem>>, vector<1x2x196xf32>
    %885 = vector.shape_cast %884 : vector<1x2x196xf32> to vector<2x196xf32>
    %886 = vector.broadcast %883 : f32 to vector<2x196xf32>
    %887 = arith.mulf %886, %885 : vector<2x196xf32>
    %c14_704 = arith.constant 14 : index
    %c1_705 = arith.constant 1 : index
    %888 = memref.load %arg0[%c14_704, %c1_705] : memref<16x9xf32, #tpu.memory_space<smem>>
    %c1_706 = arith.constant 1 : index
    %c0_707 = arith.constant 0 : index
    %c0_708 = arith.constant 0 : index
    %889 = vector.load %arg2[%c1_706, %c0_707, %c0_708] : memref<9x2x196xf32, #tpu.memory_space<vmem>>, vector<1x2x196xf32>
    %890 = vector.shape_cast %889 : vector<1x2x196xf32> to vector<2x196xf32>
    %891 = vector.broadcast %888 : f32 to vector<2x196xf32>
    %892 = arith.mulf %891, %890 : vector<2x196xf32>
    %893 = arith.addf %887, %892 : vector<2x196xf32>
    %c14_709 = arith.constant 14 : index
    %c2_710 = arith.constant 2 : index
    %894 = memref.load %arg0[%c14_709, %c2_710] : memref<16x9xf32, #tpu.memory_space<smem>>
    %c2_711 = arith.constant 2 : index
    %c0_712 = arith.constant 0 : index
    %c0_713 = arith.constant 0 : index
    %895 = vector.load %arg2[%c2_711, %c0_712, %c0_713] : memref<9x2x196xf32, #tpu.memory_space<vmem>>, vector<1x2x196xf32>
    %896 = vector.shape_cast %895 : vector<1x2x196xf32> to vector<2x196xf32>
    %897 = vector.broadcast %894 : f32 to vector<2x196xf32>
    %898 = arith.mulf %897, %896 : vector<2x196xf32>
    %899 = arith.addf %893, %898 : vector<2x196xf32>
    %c14_714 = arith.constant 14 : index
    %c3_715 = arith.constant 3 : index
    %900 = memref.load %arg0[%c14_714, %c3_715] : memref<16x9xf32, #tpu.memory_space<smem>>
    %c3_716 = arith.constant 3 : index
    %c0_717 = arith.constant 0 : index
    %c0_718 = arith.constant 0 : index
    %901 = vector.load %arg2[%c3_716, %c0_717, %c0_718] : memref<9x2x196xf32, #tpu.memory_space<vmem>>, vector<1x2x196xf32>
    %902 = vector.shape_cast %901 : vector<1x2x196xf32> to vector<2x196xf32>
    %903 = vector.broadcast %900 : f32 to vector<2x196xf32>
    %904 = arith.mulf %903, %902 : vector<2x196xf32>
    %905 = arith.addf %899, %904 : vector<2x196xf32>
    %c14_719 = arith.constant 14 : index
    %c4_720 = arith.constant 4 : index
    %906 = memref.load %arg0[%c14_719, %c4_720] : memref<16x9xf32, #tpu.memory_space<smem>>
    %c4_721 = arith.constant 4 : index
    %c0_722 = arith.constant 0 : index
    %c0_723 = arith.constant 0 : index
    %907 = vector.load %arg2[%c4_721, %c0_722, %c0_723] : memref<9x2x196xf32, #tpu.memory_space<vmem>>, vector<1x2x196xf32>
    %908 = vector.shape_cast %907 : vector<1x2x196xf32> to vector<2x196xf32>
    %909 = vector.broadcast %906 : f32 to vector<2x196xf32>
    %910 = arith.mulf %909, %908 : vector<2x196xf32>
    %911 = arith.addf %905, %910 : vector<2x196xf32>
    %c14_724 = arith.constant 14 : index
    %c5_725 = arith.constant 5 : index
    %912 = memref.load %arg0[%c14_724, %c5_725] : memref<16x9xf32, #tpu.memory_space<smem>>
    %c5_726 = arith.constant 5 : index
    %c0_727 = arith.constant 0 : index
    %c0_728 = arith.constant 0 : index
    %913 = vector.load %arg2[%c5_726, %c0_727, %c0_728] : memref<9x2x196xf32, #tpu.memory_space<vmem>>, vector<1x2x196xf32>
    %914 = vector.shape_cast %913 : vector<1x2x196xf32> to vector<2x196xf32>
    %915 = vector.broadcast %912 : f32 to vector<2x196xf32>
    %916 = arith.mulf %915, %914 : vector<2x196xf32>
    %917 = arith.addf %911, %916 : vector<2x196xf32>
    %c14_729 = arith.constant 14 : index
    %c6_730 = arith.constant 6 : index
    %918 = memref.load %arg0[%c14_729, %c6_730] : memref<16x9xf32, #tpu.memory_space<smem>>
    %c6_731 = arith.constant 6 : index
    %c0_732 = arith.constant 0 : index
    %c0_733 = arith.constant 0 : index
    %919 = vector.load %arg2[%c6_731, %c0_732, %c0_733] : memref<9x2x196xf32, #tpu.memory_space<vmem>>, vector<1x2x196xf32>
    %920 = vector.shape_cast %919 : vector<1x2x196xf32> to vector<2x196xf32>
    %921 = vector.broadcast %918 : f32 to vector<2x196xf32>
    %922 = arith.mulf %921, %920 : vector<2x196xf32>
    %923 = arith.addf %917, %922 : vector<2x196xf32>
    %c14_734 = arith.constant 14 : index
    %c7_735 = arith.constant 7 : index
    %924 = memref.load %arg0[%c14_734, %c7_735] : memref<16x9xf32, #tpu.memory_space<smem>>
    %c7_736 = arith.constant 7 : index
    %c0_737 = arith.constant 0 : index
    %c0_738 = arith.constant 0 : index
    %925 = vector.load %arg2[%c7_736, %c0_737, %c0_738] : memref<9x2x196xf32, #tpu.memory_space<vmem>>, vector<1x2x196xf32>
    %926 = vector.shape_cast %925 : vector<1x2x196xf32> to vector<2x196xf32>
    %927 = vector.broadcast %924 : f32 to vector<2x196xf32>
    %928 = arith.mulf %927, %926 : vector<2x196xf32>
    %929 = arith.addf %923, %928 : vector<2x196xf32>
    %c14_739 = arith.constant 14 : index
    %c8_740 = arith.constant 8 : index
    %930 = memref.load %arg0[%c14_739, %c8_740] : memref<16x9xf32, #tpu.memory_space<smem>>
    %c8_741 = arith.constant 8 : index
    %c0_742 = arith.constant 0 : index
    %c0_743 = arith.constant 0 : index
    %931 = vector.load %arg2[%c8_741, %c0_742, %c0_743] : memref<9x2x196xf32, #tpu.memory_space<vmem>>, vector<1x2x196xf32>
    %932 = vector.shape_cast %931 : vector<1x2x196xf32> to vector<2x196xf32>
    %933 = vector.broadcast %930 : f32 to vector<2x196xf32>
    %934 = arith.mulf %933, %932 : vector<2x196xf32>
    %935 = arith.addf %929, %934 : vector<2x196xf32>
    %c14_744 = arith.constant 14 : index
    %936 = memref.load %arg1[%c14_744] : memref<16xf32, #tpu.memory_space<smem>>
    %937 = vector.broadcast %936 : f32 to vector<2x196xf32>
    %938 = arith.addf %935, %937 : vector<2x196xf32>
    %cst_745 = arith.constant 0.000000e+00 : f32
    %939 = vector.broadcast %cst_745 : f32 to vector<2x196xf32>
    %940 = arith.maximumf %938, %939 : vector<2x196xf32>
    %941 = arith.truncf %940 : vector<2x196xf32> to vector<2x196xbf16>
    %c14_746 = arith.constant 14 : index
    %c0_747 = arith.constant 0 : index
    %c0_748 = arith.constant 0 : index
    %942 = vector.load %arg3[%c14_746, %c0_747, %c0_748] : memref<16x196x128xbf16, #tpu.memory_space<vmem>>, vector<1x196x128xbf16>
    %943 = vector.shape_cast %942 : vector<1x196x128xbf16> to vector<196x128xbf16>
    %cst_749 = arith.constant dense<0.000000e+00> : vector<2x128xf32>
    %944 = tpu.matmul %941, %943, %cst_749 {dimension_numbers = #tpu.dot_dimension_numbers<[1], [0], [0], [1], [0, 0, 1, 1], [], []>} : vector<2x196xbf16>, vector<196x128xbf16>, vector<2x128xf32> -> vector<2x128xf32>
    %945 = arith.addf %882, %944 : vector<2x128xf32>
    %c15 = arith.constant 15 : index
    %c0_750 = arith.constant 0 : index
    %946 = memref.load %arg0[%c15, %c0_750] : memref<16x9xf32, #tpu.memory_space<smem>>
    %c0_751 = arith.constant 0 : index
    %c0_752 = arith.constant 0 : index
    %c0_753 = arith.constant 0 : index
    %947 = vector.load %arg2[%c0_751, %c0_752, %c0_753] : memref<9x2x196xf32, #tpu.memory_space<vmem>>, vector<1x2x196xf32>
    %948 = vector.shape_cast %947 : vector<1x2x196xf32> to vector<2x196xf32>
    %949 = vector.broadcast %946 : f32 to vector<2x196xf32>
    %950 = arith.mulf %949, %948 : vector<2x196xf32>
    %c15_754 = arith.constant 15 : index
    %c1_755 = arith.constant 1 : index
    %951 = memref.load %arg0[%c15_754, %c1_755] : memref<16x9xf32, #tpu.memory_space<smem>>
    %c1_756 = arith.constant 1 : index
    %c0_757 = arith.constant 0 : index
    %c0_758 = arith.constant 0 : index
    %952 = vector.load %arg2[%c1_756, %c0_757, %c0_758] : memref<9x2x196xf32, #tpu.memory_space<vmem>>, vector<1x2x196xf32>
    %953 = vector.shape_cast %952 : vector<1x2x196xf32> to vector<2x196xf32>
    %954 = vector.broadcast %951 : f32 to vector<2x196xf32>
    %955 = arith.mulf %954, %953 : vector<2x196xf32>
    %956 = arith.addf %950, %955 : vector<2x196xf32>
    %c15_759 = arith.constant 15 : index
    %c2_760 = arith.constant 2 : index
    %957 = memref.load %arg0[%c15_759, %c2_760] : memref<16x9xf32, #tpu.memory_space<smem>>
    %c2_761 = arith.constant 2 : index
    %c0_762 = arith.constant 0 : index
    %c0_763 = arith.constant 0 : index
    %958 = vector.load %arg2[%c2_761, %c0_762, %c0_763] : memref<9x2x196xf32, #tpu.memory_space<vmem>>, vector<1x2x196xf32>
    %959 = vector.shape_cast %958 : vector<1x2x196xf32> to vector<2x196xf32>
    %960 = vector.broadcast %957 : f32 to vector<2x196xf32>
    %961 = arith.mulf %960, %959 : vector<2x196xf32>
    %962 = arith.addf %956, %961 : vector<2x196xf32>
    %c15_764 = arith.constant 15 : index
    %c3_765 = arith.constant 3 : index
    %963 = memref.load %arg0[%c15_764, %c3_765] : memref<16x9xf32, #tpu.memory_space<smem>>
    %c3_766 = arith.constant 3 : index
    %c0_767 = arith.constant 0 : index
    %c0_768 = arith.constant 0 : index
    %964 = vector.load %arg2[%c3_766, %c0_767, %c0_768] : memref<9x2x196xf32, #tpu.memory_space<vmem>>, vector<1x2x196xf32>
    %965 = vector.shape_cast %964 : vector<1x2x196xf32> to vector<2x196xf32>
    %966 = vector.broadcast %963 : f32 to vector<2x196xf32>
    %967 = arith.mulf %966, %965 : vector<2x196xf32>
    %968 = arith.addf %962, %967 : vector<2x196xf32>
    %c15_769 = arith.constant 15 : index
    %c4_770 = arith.constant 4 : index
    %969 = memref.load %arg0[%c15_769, %c4_770] : memref<16x9xf32, #tpu.memory_space<smem>>
    %c4_771 = arith.constant 4 : index
    %c0_772 = arith.constant 0 : index
    %c0_773 = arith.constant 0 : index
    %970 = vector.load %arg2[%c4_771, %c0_772, %c0_773] : memref<9x2x196xf32, #tpu.memory_space<vmem>>, vector<1x2x196xf32>
    %971 = vector.shape_cast %970 : vector<1x2x196xf32> to vector<2x196xf32>
    %972 = vector.broadcast %969 : f32 to vector<2x196xf32>
    %973 = arith.mulf %972, %971 : vector<2x196xf32>
    %974 = arith.addf %968, %973 : vector<2x196xf32>
    %c15_774 = arith.constant 15 : index
    %c5_775 = arith.constant 5 : index
    %975 = memref.load %arg0[%c15_774, %c5_775] : memref<16x9xf32, #tpu.memory_space<smem>>
    %c5_776 = arith.constant 5 : index
    %c0_777 = arith.constant 0 : index
    %c0_778 = arith.constant 0 : index
    %976 = vector.load %arg2[%c5_776, %c0_777, %c0_778] : memref<9x2x196xf32, #tpu.memory_space<vmem>>, vector<1x2x196xf32>
    %977 = vector.shape_cast %976 : vector<1x2x196xf32> to vector<2x196xf32>
    %978 = vector.broadcast %975 : f32 to vector<2x196xf32>
    %979 = arith.mulf %978, %977 : vector<2x196xf32>
    %980 = arith.addf %974, %979 : vector<2x196xf32>
    %c15_779 = arith.constant 15 : index
    %c6_780 = arith.constant 6 : index
    %981 = memref.load %arg0[%c15_779, %c6_780] : memref<16x9xf32, #tpu.memory_space<smem>>
    %c6_781 = arith.constant 6 : index
    %c0_782 = arith.constant 0 : index
    %c0_783 = arith.constant 0 : index
    %982 = vector.load %arg2[%c6_781, %c0_782, %c0_783] : memref<9x2x196xf32, #tpu.memory_space<vmem>>, vector<1x2x196xf32>
    %983 = vector.shape_cast %982 : vector<1x2x196xf32> to vector<2x196xf32>
    %984 = vector.broadcast %981 : f32 to vector<2x196xf32>
    %985 = arith.mulf %984, %983 : vector<2x196xf32>
    %986 = arith.addf %980, %985 : vector<2x196xf32>
    %c15_784 = arith.constant 15 : index
    %c7_785 = arith.constant 7 : index
    %987 = memref.load %arg0[%c15_784, %c7_785] : memref<16x9xf32, #tpu.memory_space<smem>>
    %c7_786 = arith.constant 7 : index
    %c0_787 = arith.constant 0 : index
    %c0_788 = arith.constant 0 : index
    %988 = vector.load %arg2[%c7_786, %c0_787, %c0_788] : memref<9x2x196xf32, #tpu.memory_space<vmem>>, vector<1x2x196xf32>
    %989 = vector.shape_cast %988 : vector<1x2x196xf32> to vector<2x196xf32>
    %990 = vector.broadcast %987 : f32 to vector<2x196xf32>
    %991 = arith.mulf %990, %989 : vector<2x196xf32>
    %992 = arith.addf %986, %991 : vector<2x196xf32>
    %c15_789 = arith.constant 15 : index
    %c8_790 = arith.constant 8 : index
    %993 = memref.load %arg0[%c15_789, %c8_790] : memref<16x9xf32, #tpu.memory_space<smem>>
    %c8_791 = arith.constant 8 : index
    %c0_792 = arith.constant 0 : index
    %c0_793 = arith.constant 0 : index
    %994 = vector.load %arg2[%c8_791, %c0_792, %c0_793] : memref<9x2x196xf32, #tpu.memory_space<vmem>>, vector<1x2x196xf32>
    %995 = vector.shape_cast %994 : vector<1x2x196xf32> to vector<2x196xf32>
    %996 = vector.broadcast %993 : f32 to vector<2x196xf32>
    %997 = arith.mulf %996, %995 : vector<2x196xf32>
    %998 = arith.addf %992, %997 : vector<2x196xf32>
    %c15_794 = arith.constant 15 : index
    %999 = memref.load %arg1[%c15_794] : memref<16xf32, #tpu.memory_space<smem>>
    %1000 = vector.broadcast %999 : f32 to vector<2x196xf32>
    %1001 = arith.addf %998, %1000 : vector<2x196xf32>
    %cst_795 = arith.constant 0.000000e+00 : f32
    %1002 = vector.broadcast %cst_795 : f32 to vector<2x196xf32>
    %1003 = arith.maximumf %1001, %1002 : vector<2x196xf32>
    %1004 = arith.truncf %1003 : vector<2x196xf32> to vector<2x196xbf16>
    %c15_796 = arith.constant 15 : index
    %c0_797 = arith.constant 0 : index
    %c0_798 = arith.constant 0 : index
    %1005 = vector.load %arg3[%c15_796, %c0_797, %c0_798] : memref<16x196x128xbf16, #tpu.memory_space<vmem>>, vector<1x196x128xbf16>
    %1006 = vector.shape_cast %1005 : vector<1x196x128xbf16> to vector<196x128xbf16>
    %cst_799 = arith.constant dense<0.000000e+00> : vector<2x128xf32>
    %1007 = tpu.matmul %1004, %1006, %cst_799 {dimension_numbers = #tpu.dot_dimension_numbers<[1], [0], [0], [1], [0, 0, 1, 1], [], []>} : vector<2x196xbf16>, vector<196x128xbf16>, vector<2x128xf32> -> vector<2x128xf32>
    %1008 = arith.addf %945, %1007 : vector<2x128xf32>
    %c0_800 = arith.constant 0 : index
    %c0_801 = arith.constant 0 : index
    %1009 = vector.load %arg4[%c0_800, %c0_801] : memref<1x128xf32, #tpu.memory_space<vmem>>, vector<1x128xf32>
    %1010 = vector.broadcast %1009 : vector<1x128xf32> to vector<2x128xf32>
    %1011 = arith.addf %1008, %1010 : vector<2x128xf32>
    %cst_802 = arith.constant 0.000000e+00 : f32
    %1012 = vector.broadcast %cst_802 : f32 to vector<2x128xf32>
    %1013 = arith.maximumf %1011, %1012 : vector<2x128xf32>
    %1014 = arith.truncf %1013 : vector<2x128xf32> to vector<2x128xbf16>
    %c0_803 = arith.constant 0 : index
    %c0_804 = arith.constant 0 : index
    %1015 = vector.load %arg5[%c0_803, %c0_804] : memref<128x128xbf16, #tpu.memory_space<vmem>>, vector<128x128xbf16>
    %cst_805 = arith.constant dense<0.000000e+00> : vector<2x128xf32>
    %1016 = tpu.matmul %1014, %1015, %cst_805 {dimension_numbers = #tpu.dot_dimension_numbers<[1], [0], [0], [1], [0, 0, 1, 1], [], []>} : vector<2x128xbf16>, vector<128x128xbf16>, vector<2x128xf32> -> vector<2x128xf32>
    %c0_806 = arith.constant 0 : index
    %c0_807 = arith.constant 0 : index
    %1017 = vector.load %arg6[%c0_806, %c0_807] : memref<1x128xf32, #tpu.memory_space<vmem>>, vector<1x128xf32>
    %1018 = vector.broadcast %1017 : vector<1x128xf32> to vector<2x128xf32>
    %1019 = arith.addf %1016, %1018 : vector<2x128xf32>
    %cst_808 = arith.constant 0.000000e+00 : f32
    %1020 = vector.broadcast %cst_808 : f32 to vector<2x128xf32>
    %1021 = arith.subf %1019, %1020 : vector<2x128xf32>
    %c0_809 = arith.constant 0 : index
    %c0_810 = arith.constant 0 : index
    %1022 = vector.load %arg7[%c0_809, %c0_810] : memref<2x128xf32, #tpu.memory_space<vmem>>, vector<2x128xf32>
    %cst_811 = arith.constant 9.99999996E-13 : f32
    %1023 = vector.broadcast %cst_811 : f32 to vector<2x128xf32>
    %1024 = arith.addf %1022, %1023 : vector<2x128xf32>
    %1025 = math.log %1024 : vector<2x128xf32>
    %cst_812 = arith.constant 0.000000e+00 : f32
    %1026 = vector.broadcast %cst_812 : f32 to vector<2x128xf32>
    %1027 = arith.subf %1026, %1025 : vector<2x128xf32>
    %cst_813 = arith.constant 9.99999996E-13 : f32
    %1028 = vector.broadcast %cst_813 : f32 to vector<2x128xf32>
    %1029 = arith.addf %1027, %1028 : vector<2x128xf32>
    %1030 = math.log %1029 : vector<2x128xf32>
    %cst_814 = arith.constant 0.000000e+00 : f32
    %1031 = vector.broadcast %cst_814 : f32 to vector<2x128xf32>
    %1032 = arith.subf %1031, %1030 : vector<2x128xf32>
    %1033 = arith.addf %1021, %1032 : vector<2x128xf32>
    %cst_815 = arith.constant 1.000000e+00 : f32
    %1034 = vector.broadcast %cst_815 : f32 to vector<2x128xf32>
    %1035 = arith.mulf %1033, %1034 : vector<2x128xf32>
    %1036 = tpu.iota {dimensions = array<i32: 1>} : vector<2x128xi32>
    %c10_i32 = arith.constant 10 : i32
    %1037 = vector.broadcast %c10_i32 : i32 to vector<2x128xi32>
    %1038 = arith.cmpi slt, %1036, %1037 : vector<2x128xi32>
    %cst_816 = arith.constant -1.000000e+30 : f32
    %1039 = vector.broadcast %cst_816 : f32 to vector<2x128xf32>
    %1040 = arith.select %1038, %1035, %1039 : vector<2x128xi1>, vector<2x128xf32>
    %cst_817 = arith.constant dense<0xFF800000> : vector<2xf32>
    %1041 = vector.multi_reduction <maximumf>, %1040, %cst_817 [1] : vector<2x128xf32> to vector<2xf32>
    %1042 = vector.shape_cast %1041 : vector<2xf32> to vector<2x1xf32>
    %1043 = vector.broadcast %1042 : vector<2x1xf32> to vector<2x128xf32>
    %1044 = arith.subf %1040, %1043 : vector<2x128xf32>
    %1045 = math.exp %1044 : vector<2x128xf32>
    %cst_818 = arith.constant dense<0.000000e+00> : vector<2xf32>
    %1046 = vector.multi_reduction <add>, %1045, %cst_818 [1] : vector<2x128xf32> to vector<2xf32>
    %1047 = vector.shape_cast %1046 : vector<2xf32> to vector<2x1xf32>
    %1048 = vector.broadcast %1047 : vector<2x1xf32> to vector<2x128xf32>
    %1049 = arith.divf %1045, %1048 : vector<2x128xf32>
    %c0_819 = arith.constant 0 : index
    %c0_820 = arith.constant 0 : index
    %1050 = vector.load %arg8[%c0_819, %c0_820] : memref<2x128xf32, #tpu.memory_space<vmem>>, vector<2x128xf32>
    tpu.vector_store %arg8[%c0_819, %c0_820], %1049 {strides = array<i32>} : memref<2x128xf32, #tpu.memory_space<vmem>>, vector<2x128xf32>,
    return
  }
}

</mosaic_0001>

<bundles_post_ra>
// kernel: mnist_classifier_forward.1
= control target key start
LH: loop header
LB: loop body
LE: loop exit
PB: predicated region body
PF: predicated region fallthrough
CT: control target
= control target key end

     0   :  { %13 = vsyncpa [#allocation4], 0  ;;  %s6334_s0 = inlined_call_operand.vmem [shape: f32[16,9], index: 0, kind: input, shape index: {}]   ;;  %s6335_s1 = inlined_call_operand.vmem [shape: f32[16], index: 1, kind: input, shape index: {}]   ;;  %s6336_s2 = inlined_call_operand.vmem [shape: f32[9,2,196], index: 2, kind: input, shape index: {}]   ;;  %s6337_s3 = inlined_call_operand.vmem [shape: bf16[16,196,128], index: 3, kind: input, shape index: {}]   ;;  %s6338_s4 = inlined_call_operand.vmem [shape: f32[1,128], index: 4, kind: input, shape index: {}]   ;;  %s6339_s5 = inlined_call_operand.vmem [shape: bf16[128,128], index: 5, kind: input, shape index: {}]   ;;  %s6340_s6 = inlined_call_operand.vmem [shape: f32[1,128], index: 6, kind: input, shape index: {}]   ;;  %s6341_s7 = inlined_call_operand.vmem [shape: f32[2,128], index: 7, kind: input, shape index: {}]   ;;  %s6342_s8 = inlined_call_operand.hbm [shape: f32[2,128], index: 8, kind: output, shape index: {}]  }
   0x1   :  { %14 = vsyncpa [#allocation6], 0 }
   0x2   :  { %15 = vsyncpa [#allocation3], 0  ;;  %s21_s29 = sshll.u32 %s6334_s0, 4  ;;  %s34_s10 = sshll.u32 %s6335_s1, 4  ;;  %s22_s29 = int_to_ptr.vmem [resolvable:$true] %s21_s29  ;;  %s35_s10 = int_to_ptr.vmem [resolvable:$true] %s34_s10 }
   0x3   :  { %s4492_s11 = scalar_lea.vmem %s22_s29, 256  ;;  %p4497_p1 = scmp.lt.s32.totalorder %s22_s29, %s22_s29 }
   0x4   :  { %p4493_p0 = scmp.ne.s32.totalorder %s22_s29, %s4492_s11  ;;  %p4498_p2 = scmp.lt.s32.totalorder %s4492_s11, %s4492_s11 }
   0x6   :  { %p4499_p3 = por %p4498_p2, %p4497_p1 }
   0x8   :  { %p4500_p4 = pnand %p4499_p3, %p4493_p0 }
   0xa   :  { %4503 = shalt.err (!%p4500_p4)
}
   0xb   :  { %s4542_s12 = smov [#allocation2]   ;;  %s4543_s13 = smov 128  }
   0xc   :  { %s4544_s14 = smov 8   ;;  %s4504_s15 = scalar_lea.vmem %s35_s10, 16 }
   0xd   :  { %27 = dma.vmem_to_smem %s22_s29, 256, %s4542_s12, [#allocation4], %s4543_s13, %s4543_s13, %s4544_s14  }
   0xe   :  { %p4505_p5 = scmp.ne.s32.totalorder %s35_s10, %s4504_s15  ;;  %p4509_p6 = scmp.lt.s32.totalorder %s35_s10, %s35_s10 }
   0xf   :  { %p4510_p7 = scmp.lt.s32.totalorder %s4504_s15, %s4504_s15 }
  0x11   :  { %p4511_p8 = por %p4510_p7, %p4509_p6 }
  0x13   :  { %p4512_p9 = pnand %p4511_p8, %p4505_p5 }
  0x15   :  { %4515 = shalt.err (!%p4512_p9)
}
  0x16   :  { %s4545_s0 = smov [#allocation5]  }
  0x17   :  { %37 = dma.vmem_to_smem %s35_s10, 16, %s4545_s0, [#allocation6]  }
  0x18   :  { %4536 = dma.done.wait [#allocation4], 256  }
  0x19   :  { %4537 = vsyncadd [#allocation4], 4294967040 }
  0x1a   :  { %4538 = dma.done.wait [#allocation6], 16  }
  0x1b   :  { %4539 = vsyncadd [#allocation6], 4294967280 }
  0x1c   :  { %56 = sfence }
  0x1d   :  { %v4250_v0 = vld [vmem:[%s6337_s3 + $0x9c] sm:$0xff]   ;;  %v4546_v1 = vmov 0   ;;  %v4252_v3 = vld [vmem:[%s6337_s3 + $0x94] sm:$0xff]   ;;  %v4254_v5 = vld [vmem:[%s6337_s3 + $0x8c] sm:$0xff]   ;;  %vm309_vm0 = vcmask 1041408   ;;  %s3453_s27 = sld [smem:[#allocation2 + $0x80]]  ;;  %v118_v59 = vlaneseq }
  0x1e   :  { %313 = vmatprep.subr.bf16.mxu0 %v4546_v1  ;;  %434 = vmatprep.subr.bf16.mxu1 %v4546_v1  ;;  %v4251_v2 = vld [vmem:[%s6337_s3 + $0x38] sm:$0xff]   ;;  %v4253_v4 = vld [vmem:[%s6337_s3 + $0x30] sm:$0xff]   ;;  %v4255_v6 = vld [vmem:[%s6337_s3 + $0x28] sm:$0xff]   ;;  %s3454_s28 = sld [smem:[#allocation2 + $0x81]]  ;;  %v4547_v57 = vmov 1983009808  }
  0x1f   :  { %314 = vmatpush1.bf16.msra.mxu0 %v4250_v0  ;;  %435 = vmatpush1.bf16.msra.mxu1 %v4251_v2  ;;  %v4256_v7 = vld [vmem:[%s6337_s3 + $0x84] sm:$0xff]   ;;  %v4258_v9 = vld [vmem:[%s6337_s3 + $0x7c] sm:$0xff]   ;;  %v4260_v11 = vld [vmem:[%s6337_s3 + $0x74] sm:$0xff]   ;;  %s3455_s9 = sld [smem:[#allocation2 + $0x82]]  ;;  %v116_v58 = vunpack.c.l.s4 %v4547_v57  ;;  %vm305_vm1 = vcmask 556032   ;;  %vm4549_vm2 = vmmov 0  }
  0x20   :  { %315 = vmatprep.subr.bf16.mxu0 %v4546_v1  ;;  %436 = vmatprep.subr.bf16.mxu1 %v4546_v1  ;;  %v4257_v8 = vld [vmem:[%s6337_s3 + $0x20] sm:$0xff]   ;;  %v4259_v10 = vld [vmem:[%s6337_s3 + $0x18] sm:$0xff]   ;;  %v4261_v12 = vld [vmem:[%s6337_s3 + $0x10] sm:$0xff]   ;;  %s3456_s12 = sld [smem:[#allocation2 + $0x83]] }
  0x21   :  { %v4262_v13 = vld [vmem:[%s6337_s3 + $0x6c] sm:$0xff]   ;;  %v4266_v14 = vld [vmem:[%s6337_s3 + $0xc4] ss:$0 sps:$4 sm:$0x33]   ;;  %v4677_v21 = vld [vmem:[%s6336_s2] sm:$0xf] }
  0x22   :  { %v4267_v15 = vld [vmem:[%s6337_s3 + $0x60] ss:$0 sps:$4 sm:$0x33]   ;;  %v4263_v16 = vld [vmem:[%s6337_s3 + $0x8] sm:$0xff]   ;;  %v311_v19 = vsel %vm309_vm0, %v4266_v14, 0  ;;  %s4694_s1 = sld [smem:[#allocation2 + $0x84]]  ;;  %v117_v14 = vunpack.c.0.s8 %v116_v58 }
  0x23   :  { %316 = vmatpush1.bf16.msra.mxu0 %v4252_v3  ;;  %437 = vmatpush1.bf16.msra.mxu1 %v4253_v4  ;;  %v4264_v17 = vld [vmem:[%s6337_s3 + $0x64] sm:$0xff]   ;;  %v432_v20 = vsel %vm309_vm0, %v4267_v15, 0  ;;  %v4268_v23 = vld [vmem:[%s6337_s3 + $0xbc] sm:$0xff]   ;;  %v4702_v26 = vld [vmem:[%s6336_s2 + $0xc] sm:$0xf]  ;;  %s4704_s20 = sld [smem:[#allocation2 + $0x85]]  ;;  %v153_v27 = vstv %s3453_s27 }
  0x24   :  { %317 = vmatprep.subr.bf16.mxu0 %v4546_v1  ;;  %438 = vmatprep.subr.bf16.mxu1 %v4546_v1  ;;  %v4265_v18 = vld [vmem:[%s6337_s3] sm:$0xff]   ;;  %v4692_v24 = vld [vmem:[%s6336_s2 + $0x8] sm:$0xf]  ;;  %v4269_v25 = vld [vmem:[%s6337_s3 + $0x58] sm:$0xff]   ;;  %s4706_s21 = sld [smem:[#allocation2 + $0x86]]  ;;  %v154_v29 = vmul.f32 %v153_v27, %v4677_v21  ;;  %v156_v30 = vstv %s3454_s28 }
  0x25   :  { %v4683_v22 = vld [vmem:[%s6336_s2 + $0x4] sm:$0xf]  ;;  %v4712_v28 = vld [vmem:[%s6336_s2 + $0x10] sm:$0xf]  ;;  %s4715_s24 = sld [smem:[#allocation2 + $0x87]]  ;;  %v4270_v31 = vld [vmem:[%s6337_s3 + $0xb4] sm:$0xff]   ;;  %v160_v33 = vstv %s3455_s9 }
  0x26   :  { %v157_v32 = vmul.f32 %v4683_v22, %v156_v30  ;;  %s4722_s27 = sld [smem:[#allocation2 + $0x88]]  ;;  %v4271_v34 = vld [vmem:[%s6337_s3 + $0x50] sm:$0xff]   ;;  %v161_v36 = vmul.f32 %v4692_v24, %v160_v33  ;;  %v164_v37 = vstv %s3456_s12  ;;  %v4750_v43 = vld [vmem:[%s6336_s2 + $0x18] sm:$0xf]  ;;  %v4273_v46 = vld [vmem:[%s6337_s3 + $0x48] sm:$0xff]  }
  0x27   :  { %318 = vmatpush1.bf16.msra.mxu0 %v4254_v5  ;;  %439 = vmatpush1.bf16.msra.mxu1 %v4255_v6  ;;  %v4730_v35 = vld [vmem:[%s6336_s2 + $0x14] sm:$0xf]  ;;  %s4733_s11 = sld [smem:[#allocation5 + $0x1]]  ;;  %v165_v39 = vmul.f32 %v4702_v26, %v164_v37  ;;  %v4272_v42 = vld [vmem:[%s6337_s3 + $0xac] sm:$0xff]   ;;  %v4761_v47 = vld [vmem:[%s6336_s2 + $0x1c] sm:$0xf] }
  0x28   :  { %319 = vmatprep.subr.bf16.mxu0 %v4546_v1  ;;  %440 = vmatprep.subr.bf16.mxu1 %v4546_v1  ;;  %v158_v38 = vadd.f32 %v157_v32, %v154_v29  ;;  %v168_v40 = vstv %s4694_s1  ;;  %s4737_s9 = sld [smem:[#allocation2]]  ;;  %v4769_v49 = vld [vmem:[%s6336_s2 + $0x20] sm:$0xf]  ;;  %v4274_v62 = vld [vmem:[%s6337_s3 + $0xa4] sm:$0xff]  }
  0x29   :  { %v172_v41 = vstv %s4704_s20  ;;  %s4741_s13 = sld [smem:[#allocation2 + $0x1]]  ;;  %v169_v45 = vmul.f32 %v4712_v28, %v168_v40  ;;  %v4275_v4 = vld [vmem:[%s6337_s3 + $0x40] sm:$0xff]  }
  0x2a   :  { %v162_v44 = vadd.f32 %v161_v36, %v158_v38  ;;  %s4753_s1 = sld [smem:[#allocation2 + $0x2]]  ;;  %v176_v48 = vstv %s4706_s21  ;;  %v173_v51 = vmul.f32 %v4730_v35, %v172_v41 }
  0x2b   :  { %320 = vmatpush1.bf16.msra.mxu0 %v4256_v7  ;;  %441 = vmatpush1.bf16.msra.mxu1 %v4257_v8  ;;  %s4764_s20 = sld [smem:[#allocation2 + $0x3]]  ;;  %v180_v52 = vstv %s4715_s24  ;;  %v177_v54 = vmul.f32 %v4750_v43, %v176_v48 }
  0x2c   :  { %321 = vmatprep.subr.bf16.mxu0 %v4546_v1  ;;  %442 = vmatprep.subr.bf16.mxu1 %v4546_v1  ;;  %v166_v50 = vadd.f32 %v165_v39, %v162_v44  ;;  %s4772_s25 = sld [smem:[#allocation2 + $0x4]]  ;;  %v184_v55 = vstv %s4722_s27  ;;  %v181_v0 = vmul.f32 %v4761_v47, %v180_v52 }
  0x2d   :  { %s4776_s26 = sld [smem:[#allocation2 + $0x5]]  ;;  %v185_v5 = vmul.f32 %v4769_v49, %v184_v55 }
  0x2e   :  { %v170_v53 = vadd.f32 %v169_v45, %v166_v50  ;;  %v60_v56 = vstv %s4737_s9  ;;  %s4782_s21 = sld [smem:[#allocation2 + $0x6]] }
  0x2f   :  { %322 = vmatpush1.bf16.msra.mxu0 %v4258_v9  ;;  %443 = vmatpush1.bf16.msra.mxu1 %v4259_v10  ;;  %v61_v60 = vmul.f32 %v60_v56, %v4677_v21  ;;  %v65_v61 = vstv %s4741_s13  ;;  %s4786_s24 = sld [smem:[#allocation2 + $0x7]]  ;;  %v4278_v56 = vld [vmem:[%s6337_s3 + $0xf8] sm:$0xff]  }
  0x30   :  { %323 = vmatprep.subr.bf16.mxu0 %v4546_v1  ;;  %444 = vmatprep.subr.bf16.mxu1 %v4546_v1  ;;  %v174_v63 = vadd.f32 %v173_v51, %v170_v53  ;;  %v66_v2 = vmul.f32 %v4683_v22, %v65_v61  ;;  %v71_v3 = vstv %s4753_s1  ;;  %s4801_s28 = sld [smem:[#allocation2 + $0x8]] }
  0x31   :  { %v72_v6 = vmul.f32 %v4692_v24, %v71_v3  ;;  %v77_v7 = vstv %s4764_s20  ;;  %s110_s9 = sld [smem:[#allocation5]] }
  0x32   :  { %v178_v8 = vadd.f32 %v177_v54, %v174_v63  ;;  %v67_v9 = vadd.f32 %v66_v2, %v61_v60  ;;  %v78_v10 = vmul.f32 %v4702_v26, %v77_v7  ;;  %s3517_s13 = sld [smem:[#allocation2 + $0x101]] }
  0x33   :  { %324 = vmatpush1.bf16.msra.mxu0 %v4260_v11  ;;  %445 = vmatpush1.bf16.msra.mxu1 %v4261_v12  ;;  %v83_v11 = vstv %s4772_s25  ;;  %v119_v12 = vshrl.u32 %v118_v59, 7  ;;  %s3518_s14 = sld [smem:[#allocation2 + $0x102]] }
  0x34   :  { %325 = vmatprep.subr.bf16.mxu0 %v4546_v1  ;;  %446 = vmatprep.subr.bf16.mxu1 %v4546_v1  ;;  %v182_v15 = vadd.f32 %v181_v0, %v178_v8  ;;  %s3519_s0 = sld [smem:[#allocation2 + $0x103]] }
  0x35   :  { %v101_v27 = vstv %s4786_s24  ;;  %v4815_v29 = vsub.s32 %v117_v14, %v119_v12  ;;  %s4825_s1 = sld [smem:[#allocation2 + $0x104]] }
  0x36   :  { %v107_v33 = vstv %s4801_s28  ;;  %v102_v37 = vmul.f32 %v4761_v47, %v101_v27  ;;  %s4827_s16 = sld [smem:[#allocation2 + $0x105]] }
  0x37   :  { %326 = vmatpush1.bf16.msra.mxu0 %v4262_v13  ;;  %447 = vmatpush1.bf16.msra.mxu1 %v4263_v16  ;;  %v89_v13 = vstv %s4776_s26  ;;  %v73_v16 = vadd.f32 %v72_v6, %v67_v9  ;;  %v108_v40 = vmul.f32 %v4769_v49, %v107_v33  ;;  %v111_v44 = vstv %s110_s9  ;;  %s4830_s17 = sld [smem:[#allocation2 + $0x106]]  ;;  %v4280_v6 = vld [vmem:[%s6337_s3 + $0xf0] sm:$0xff]   ;;  %v4284_v33 = vld [vmem:[%s6337_s3 + $0xe0] sm:$0xff]  }
  0x38   :  { %327 = vmatprep.subr.bf16.mxu0 %v4546_v1  ;;  %448 = vmatprep.subr.bf16.mxu1 %v4546_v1  ;;  %v478_v54 = vstv %s3517_s13  ;;  %s4833_s18 = sld [smem:[#allocation2 + $0x107]] }
  0x39   :  { %v479_v57 = vmul.f32 %v4683_v22, %v478_v54  ;;  %v482_v58 = vstv %s3518_s14  ;;  %s4839_s22 = sld [smem:[#allocation2 + $0x108]] }
  0x3a   :  { %v483_v60 = vmul.f32 %v4692_v24, %v482_v58  ;;  %v486_v61 = vstv %s3519_s0  ;;  %s4843_s23 = sld [smem:[#allocation5 + $0x2]] }
  0x3b   :  { %328 = vmatpush1.bf16.msra.mxu0 %v4264_v17  ;;  %449 = vmatpush1.bf16.msra.mxu1 %v4265_v18  ;;  %v84_v17 = vmul.f32 %v4712_v28, %v83_v11  ;;  %v188_v18 = vstv %s4733_s11  ;;  %s3516_s11 = sld [smem:[#allocation2 + $0x100]]  ;;  %v487_v0 = vmul.f32 %v4702_v26, %v486_v61  ;;  %v490_v2 = vstv %s4825_s1 }
  0x3c   :  { %335 = vmatprep.subr.bf16.mxu0 %v4546_v1  ;;  %456 = vmatprep.subr.bf16.mxu1 %v4546_v1  ;;  %s3565_s25 = sld [smem:[#allocation2 + $0x180]]  ;;  %v494_v3 = vstv %s4827_s16  ;;  %v491_v8 = vmul.f32 %v4712_v28, %v490_v2 }
  0x3d   :  { %s4849_s26 = sld [smem:[#allocation2 + $0x181]] }
  0x3e   :  { %s4858_s27 = sld [smem:[#allocation2 + $0x182]]  ;;  %v502_v14 = vstv %s4833_s18 }
  0x3f   :  { %336 = vmatpush2.bf16.msra.mxu0 %v311_v19  ;;  %457 = vmatpush2.bf16.msra.mxu1 %v432_v20  ;;  %v95_v19 = vstv %s4782_s21  ;;  %v186_v20 = vadd.f32 %v185_v5, %v182_v15  ;;  %v4277_v5 = vld [vmem:[%s6337_s3 + $0x164] sm:$0xff]   ;;  %s4862_s10 = sld [smem:[#allocation2 + $0x183]] }
  0x40   :  { %337 = vmatprep.subr.bf16.mxu0 %v4546_v1  ;;  %458 = vmatprep.subr.bf16.mxu1 %v4546_v1  ;;  %v96_v32 = vmul.f32 %v4750_v43, %v95_v19  ;;  %s4865_s28 = sld [smem:[#allocation2 + $0x184]]  ;;  %v4282_v15 = vld [vmem:[%s6337_s3 + $0xe8] sm:$0xff]  }
  0x41   :  { %v189_v30 = vadd.f32 %v188_v18, %v186_v20  ;;  %v475_v52 = vstv %s3516_s11  ;;  %s4868_s9 = sld [smem:[#allocation2 + $0x185]]  ;;  %v506_v18 = vstv %s4839_s22 }
  0x42   :  { %v476_v53 = vmul.f32 %v475_v52, %v4677_v21  ;;  %v675_v19 = vstv %s3565_s25  ;;  %s4876_s14 = sld [smem:[#allocation2 + $0x186]]  ;;  %v4286_v52 = vld [vmem:[%s6337_s3 + $0xd8] sm:$0xff]  }
  0x43   :  { %338 = vmatpush2.bf16.msra.mxu0 %v4268_v23  ;;  %459 = vmatpush2.bf16.msra.mxu1 %v4269_v25  ;;  %v79_v23 = vadd.f32 %v78_v10, %v73_v16  ;;  %v90_v25 = vmul.f32 %v4730_v35, %v89_v13  ;;  %v498_v10 = vstv %s4830_s17  ;;  %v495_v13 = vmul.f32 %v4730_v35, %v494_v3  ;;  %s4881_s12 = sld [smem:[#allocation2 + $0x187]] }
  0x44   :  { %339 = vmatprep.subr.bf16.mxu0 %v4546_v1  ;;  %460 = vmatprep.subr.bf16.mxu1 %v4546_v1  ;;  %v480_v63 = vadd.f32 %v479_v57, %v476_v53  ;;  %v676_v20 = vmul.f32 %v675_v19, %v4677_v21  ;;  %s4896_s17 = sld [smem:[#allocation2 + $0x188]]  ;;  %v4283_v57 = vld [vmem:[%s6337_s3 + $0x14c] sm:$0xff]  }
  0x45   :  { %s4915_s25 = sld [smem:[#allocation5 + $0x3]] }
  0x46   :  { %v484_v7 = vadd.f32 %v483_v60, %v480_v63  ;;  %v4288_v63 = vld [vmem:[%s6337_s3 + $0xd0] sm:$0xff]   ;;  %s3616_s15 = sld [smem:[#allocation2 + $0x202]] }
  0x47   :  { %340 = vmatpush2.bf16.msra.mxu0 %v4270_v31  ;;  %461 = vmatpush2.bf16.msra.mxu1 %v4271_v34  ;;  %v85_v31 = vadd.f32 %v84_v17, %v79_v23  ;;  %v190_v34 = vmax.f32 %v189_v30, 0.0  ;;  %v499_v17 = vmul.f32 %v4750_v43, %v498_v10  ;;  %v678_v23 = vstv %s4849_s26  ;;  %v4290_v10 = vld [vmem:[%s6337_s3 + $0xc8] sm:$0xff]   ;;  %s4951_s0 = sld [smem:[#allocation2 + $0x203]] }
  0x48   :  { %341 = vmatprep.subr.bf16.mxu0 %v4546_v1  ;;  %462 = vmatprep.subr.bf16.mxu1 %v4546_v1  ;;  %v488_v12 = vadd.f32 %v487_v0, %v484_v7  ;;  %v503_v30 = vmul.f32 %v4761_v47, %v502_v14  ;;  %s4953_s1 = sld [smem:[#allocation2 + $0x204]] }
  0x49   :  { %v91_v36 = vadd.f32 %v90_v25, %v85_v31  ;;  %v198_v38 = vrot.slane %v190_v34, %v4815_v29  ;;  %v4279_v25 = vld [vmem:[%s6337_s3 + $0x15c] sm:$0xff]   ;;  %v679_v31 = vmul.f32 %v4683_v22, %v678_v23  ;;  %v507_v34 = vmul.f32 %v4769_v49, %v506_v18  ;;  %s4956_s16 = sld [smem:[#allocation2 + $0x205]]  ;;  %v4289_v18 = vld [vmem:[%s6337_s3 + $0x134] sm:$0xff]  }
  0x4a   :  { %v492_v16 = vadd.f32 %v491_v8, %v488_v12  ;;  %v4292_v8 = vld [vmem:[%s6337_s3 + $0x128] ss:$0 sps:$4 sm:$0x33]   ;;  %s4968_s20 = sld [smem:[#allocation2 + $0x207]] }
  0x4b   :  { %342 = vmatpush2.bf16.msra.mxu0 %v4272_v42  ;;  %463 = vmatpush2.bf16.msra.mxu1 %v4273_v46  ;;  %v97_v39 = vadd.f32 %v96_v32, %v91_v36  ;;  %v199_v41 = vcombine.high %v198_v38, %v198_v38  ;;  %v202_v45 = vpack.c.bf16 %v198_v38, %v198_v38  ;;  %v4276_v46 = vld [vmem:[%s6337_s3 + $0x100] sm:$0xff]   ;;  %v682_v32 = vstv %s4858_s27  ;;  %s3614_s27 = sld [smem:[#allocation2 + $0x200]] }
  0x4c   :  { %343 = vmatprep.subr.bf16.mxu0 %v4546_v1  ;;  %464 = vmatprep.subr.bf16.mxu1 %v4546_v1  ;;  %v496_v27 = vadd.f32 %v495_v13, %v492_v16  ;;  %v683_v36 = vmul.f32 %v4692_v24, %v682_v32  ;;  %v710_v13 = vstv %s4915_s25  ;;  %v631_v19 = vsel %vm309_vm0, %v4292_v8, 0  ;;  %s4982_s24 = sld [smem:[#allocation5 + $0x4]] }
  0x4d   :  { %v103_v42 = vadd.f32 %v102_v37, %v97_v39  ;;  %v203_v48 = vpack.c.bf16 %v199_v41, %v199_v41  ;;  %v686_v37 = vstv %s4862_s10  ;;  %v680_v39 = vadd.f32 %v679_v31, %v676_v20  ;;  %s4989_s29 = sld [smem:[#allocation2 + $0x280]] }
  0x4e   :  { %v500_v38 = vadd.f32 %v499_v17, %v496_v27  ;;  %v690_v41 = vstv %s4865_s28  ;;  %v4294_v27 = vld [vmem:[%s6337_s3 + $0x120] sm:$0xff]   ;;  %v882_v32 = vstv %s3616_s15  ;;  %s4996_s10 = sld [smem:[#allocation2 + $0x281]] }
  0x4f   :  { %344 = vmatpush2.bf16.msra.mxu0 %v4274_v62  ;;  %465 = vmatpush2.bf16.msra.mxu1 %v4275_v4  ;;  %v109_v50 = vadd.f32 %v108_v40, %v103_v42  ;;  %v687_v40 = vmul.f32 %v4702_v26, %v686_v37  ;;  %v694_v42 = vstv %s4868_s9  ;;  %s4939_s9 = sld [smem:[#allocation2 + $0x201]] }
  0x50   :  { %633 = vmatprep.subr.bf16.mxu0 %v4546_v1  ;;  %833 = vmatprep.subr.bf16.mxu1 %v4546_v1  ;;  %s5001_s28 = sld [smem:[#allocation2 + $0x282]] }
  0x51   :  { %3501 = vmatprep.mubr.msk.bf16.mxu0 %vm305_vm1, %v203_v48  ;;  %v112_v51 = vadd.f32 %v111_v44, %v109_v50  ;;  %v4281_v44 = vld [vmem:[%s6337_s3 + $0x154] sm:$0xff]   ;;  %v691_v48 = vmul.f32 %v4712_v28, %v690_v41  ;;  %v510_v50 = vstv %s4843_s23  ;;  %v875_v17 = vstv %s3614_s27  ;;  %s4977_s23 = sld [smem:[#allocation2 + $0x208]] }
  0x52   :  { %346 = vmatmul.mubr.bf16.vlgmr.msra.gmra.mxu0 %v202_v45  ;;  %v504_v45 = vadd.f32 %v503_v30, %v500_v38  ;;  %v876_v20 = vmul.f32 %v875_v17, %v4677_v21  ;;  %v894_v41 = vstv %s4956_s16  ;;  %s5022_s15 = sld [smem:[#allocation2 + $0x286]] }
  0x53   :  { %v113_v55 = vmax.f32 %v112_v51, 0.0  ;;  %634 = vmatpush1.bf16.msra.mxu0 %v4276_v46  ;;  %v684_v46 = vadd.f32 %v683_v36, %v680_v39  ;;  %v698_v51 = vstv %s4876_s14  ;;  %v890_v39 = vstv %s4953_s1  ;;  %s5012_s14 = sld [smem:[#allocation2 + $0x284]] }
  0x54   :  { %635 = vmatprep.subr.bf16.mxu0 %v4546_v1  ;;  %v508_v53 = vadd.f32 %v507_v34, %v504_v45  ;;  %v699_v61 = vmul.f32 %v4750_v43, %v698_v51  ;;  %v886_v34 = vstv %s4951_s0  ;;  %v891_v45 = vmul.f32 %v4712_v28, %v890_v39  ;;  %s5027_s0 = sld [smem:[#allocation2 + $0x287]]  ;;  %v4306_v39 = vld [vmem:[%s6337_s3 + $0x1b8] sm:$0xff]  }
  0x55   :  { %v121_v62 = vrot.slane %v113_v55, %v4815_v29  ;;  %v688_v54 = vadd.f32 %v687_v40, %v684_v46  ;;  %v695_v55 = vmul.f32 %v4730_v35, %v694_v42  ;;  %v878_v23 = vstv %s4939_s9  ;;  %v4291_v40 = vld [vmem:[%s6337_s3 + $0x12c] sm:$0xff]   ;;  %s5005_s9 = sld [smem:[#allocation2 + $0x283]] }
  0x56   :  { %v511_v58 = vadd.f32 %v510_v50, %v508_v53  ;;  %v879_v31 = vmul.f32 %v4683_v22, %v878_v23  ;;  %v887_v38 = vmul.f32 %v4702_v26, %v886_v34  ;;  %v4296_v50 = vld [vmem:[%s6337_s3 + $0x118] sm:$0xff]   ;;  %v895_v53 = vmul.f32 %v4730_v35, %v894_v41  ;;  %s5042_s19 = sld [smem:[#allocation2 + $0x288]]  ;;  %v4302_v23 = vld [vmem:[%s6337_s3 + $0x1c8] sm:$0xff]  }
  0x57   :  { %v122_v4 = vcombine.high %v121_v62, %v121_v62  ;;  %636 = vmatpush1.bf16.msra.mxu0 %v4278_v56  ;;  %v125_v9 = vpack.c.bf16 %v121_v62, %v121_v62  ;;  %v702_v56 = vstv %s4881_s12  ;;  %v692_v60 = vadd.f32 %v691_v48, %v688_v54  ;;  %s5016_s12 = sld [smem:[#allocation2 + $0x285]] }
  0x58   :  { %637 = vmatprep.subr.bf16.mxu0 %v4546_v1  ;;  %v706_v62 = vstv %s4896_s17  ;;  %v512_v0 = vmax.f32 %v511_v58, 0.0  ;;  %v703_v3 = vmul.f32 %v4761_v47, %v702_v56  ;;  %s4959_s17 = sld [smem:[#allocation2 + $0x206]]  ;;  %v880_v37 = vadd.f32 %v879_v31, %v876_v20 }
  0x59   :  { %v126_v11 = vpack.c.bf16 %v122_v4, %v122_v4  ;;  %v696_v2 = vadd.f32 %v695_v55, %v692_v60  ;;  %v4285_v4 = vld [vmem:[%s6337_s3 + $0x144] sm:$0xff]   ;;  %v707_v7 = vmul.f32 %v4769_v49, %v706_v62  ;;  %v902_v54 = vstv %s4968_s20  ;;  %v4298_v62 = vld [vmem:[%s6337_s3 + $0x110] sm:$0xff]   ;;  %s5063_s21 = sld [smem:[#allocation5 + $0x5]] }
  0x5a   :  { %v1075_v58 = vstv %s4989_s29  ;;  %s5100_s1 = sld [smem:[#allocation2 + $0x304]] }
  0x5b   :  { %3515 = vmatprep.mubr.msk.bf16.mxu1 %vm305_vm1, %v126_v11  ;;  %638 = vmatpush1.bf16.msra.mxu0 %v4280_v6  ;;  %v700_v6 = vadd.f32 %v699_v61, %v696_v2  ;;  %v1076_v60 = vmul.f32 %v1075_v58, %v4677_v21  ;;  %v1078_v61 = vstv %s4996_s10  ;;  %v4295_v21 = vld [vmem:[%s6337_s3 + $0x184] sm:$0xff]   ;;  %s5108_s18 = sld [smem:[#allocation2 + $0x305]] }
  0x5c   :  { %467 = vmatmul.mubr.bf16.vlgmr.msra.gmra.mxu1 %v125_v9  ;;  %639 = vmatprep.subr.bf16.mxu0 %v4546_v1  ;;  %v4287_v9 = vld [vmem:[%s6337_s3 + $0x13c] sm:$0xff]   ;;  %v1079_v2 = vmul.f32 %v4683_v22, %v1078_v61  ;;  %s5134_s30 = sld [smem:[#allocation2 + $0x307]] }
  0x5d   :  { %834 = vmatpush1.bf16.msra.mxu1 %v4277_v5  ;;  %v4932_v5 = vrot.slane %v512_v0, %v4815_v29  ;;  %v704_v12 = vadd.f32 %v703_v3, %v700_v6  ;;  %v903_v0 = vmul.f32 %v4761_v47, %v902_v54  ;;  %v1082_v3 = vstv %s5001_s28  ;;  %s3712_s28 = sld [smem:[#allocation2 + $0x300]]  ;;  %v4308_v54 = vld [vmem:[%s6337_s3 + $0x1b0] sm:$0xff]  }
  0x5e   :  { %835 = vmatprep.subr.bf16.mxu1 %v4546_v1  ;;  %v898_v46 = vstv %s4959_s17  ;;  %v1083_v6 = vmul.f32 %v4692_v24, %v1082_v3  ;;  %s5156_s13 = sld [smem:[#allocation2 + $0x380]] }
  0x5f   :  { %640 = vmatpush1.bf16.msra.mxu0 %v4282_v15  ;;  %v521_v11 = vcombine.high %v4932_v5, %v4932_v5  ;;  %v708_v15 = vadd.f32 %v707_v7, %v704_v12  ;;  %v899_v56 = vmul.f32 %v4750_v43, %v898_v46  ;;  %v1086_v7 = vstv %s5005_s9  ;;  %s5084_s9 = sld [smem:[#allocation2 + $0x301]]  ;;  %v4303_v46 = vld [vmem:[%s6337_s3 + $0x22c] sm:$0xff]  }
  0x60   :  { %641 = vmatprep.subr.bf16.mxu0 %v4546_v1  ;;  %v1087_v22 = vmul.f32 %v4702_v26, %v1086_v7  ;;  %v4297_v26 = vld [vmem:[%s6337_s3 + $0x17c] sm:$0xff]   ;;  %v524_v20 = vpack.c.bf16 %v4932_v5, %v4932_v5  ;;  %v4299_v5 = vld [vmem:[%s6337_s3 + $0x174] sm:$0xff]   ;;  %s5177_s17 = sld [smem:[#allocation2 + $0x383]] }
  0x61   :  { %836 = vmatpush1.bf16.msra.mxu1 %v4279_v25  ;;  %v525_v14 = vpack.c.bf16 %v521_v11, %v521_v11  ;;  %v711_v16 = vadd.f32 %v710_v13, %v708_v15  ;;  %v4293_v25 = vld [vmem:[%s6337_s3 + $0x18c] ss:$0 sps:$4 sm:$0x33]   ;;  %v1094_v11 = vstv %s5016_s12  ;;  %v910_v15 = vstv %s4982_s24  ;;  %s5191_s26 = sld [smem:[#allocation2 + $0x385]] }
  0x62   :  { %837 = vmatprep.subr.bf16.mxu1 %v4546_v1  ;;  %v831_v48 = vsel %vm309_vm0, %v4293_v25, 0  ;;  %s5205_s27 = sld [smem:[#allocation2 + $0x386]] }
  0x63   :  { %642 = vmatpush1.bf16.msra.mxu0 %v4284_v33  ;;  %3564 = vmatprep.mubr.msk.bf16.mxu0 %vm305_vm1, %v525_v14  ;;  %v712_v30 = vmax.f32 %v711_v16, 0.0  ;;  %v883_v33 = vmul.f32 %v4692_v24, %v882_v32  ;;  %v4300_v24 = vld [vmem:[%s6337_s3 + $0x108] sm:$0xff]   ;;  %v1098_v16 = vstv %s5022_s15  ;;  %s5094_s15 = sld [smem:[#allocation2 + $0x302]] }
  0x64   :  { %643 = vmatprep.subr.bf16.mxu0 %v4546_v1  ;;  %s5227_s12 = sld [smem:[#allocation2 + $0x387]] }
  0x65   :  { %838 = vmatpush1.bf16.msra.mxu1 %v4281_v44  ;;  %v4985_v36 = vrot.slane %v712_v30, %v4815_v29  ;;  %v884_v44 = vadd.f32 %v883_v33, %v880_v37  ;;  %v1099_v30 = vmul.f32 %v4750_v43, %v1098_v16  ;;  %v4304_v43 = vld [vmem:[%s6337_s3 + $0x1c0] sm:$0xff]   ;;  %s3770_s24 = sld [smem:[#allocation5 + $0x7]] }
  0x66   :  { %839 = vmatprep.subr.bf16.mxu1 %v4546_v1  ;;  %s5313_s25 = sld [smem:[#allocation2 + $0x480]] }
  0x67   :  { %644 = vmatpush1.bf16.msra.mxu0 %v4286_v52  ;;  %v721_v42 = vcombine.high %v4985_v36, %v4985_v36  ;;  %v888_v52 = vadd.f32 %v887_v38, %v884_v44  ;;  %s5407_s29 = sld [smem:[#allocation2 + $0x486]] }
  0x68   :  { %645 = vmatprep.subr.bf16.mxu0 %v4546_v1  ;;  %s5437_s16 = sld [smem:[#allocation2 + $0x488]] }
  0x69   :  { %840 = vmatpush1.bf16.msra.mxu1 %v4283_v57  ;;  %v725_v51 = vpack.c.bf16 %v721_v42, %v721_v42  ;;  %v892_v55 = vadd.f32 %v891_v45, %v888_v52  ;;  %v906_v57 = vstv %s4977_s23  ;;  %v724_v45 = vpack.c.bf16 %v4985_v36, %v4985_v36  ;;  %v5117_v36 = vld [vmem:[%s6336_s2] sm:$0xf]  ;;  %s5465_s23 = sld [smem:[#allocation2 + $0x500]] }
  0x6a   :  { %841 = vmatprep.subr.bf16.mxu1 %v4546_v1  ;;  %v1278_v52 = vstv %s5084_s9  ;;  %v1282_v58 = vstv %s5094_s15  ;;  %s5163_s15 = sld [smem:[#allocation2 + $0x381]] }
  0x6b   :  { %646 = vmatpush1.bf16.msra.mxu0 %v4288_v63  ;;  %3613 = vmatprep.mubr.msk.bf16.mxu1 %vm305_vm1, %v725_v51  ;;  %v896_v63 = vadd.f32 %v895_v53, %v892_v55  ;;  %v4305_v53 = vld [vmem:[%s6337_s3 + $0x224] sm:$0xff]   ;;  %s5478_s9 = sld [smem:[#allocation2 + $0x501]] }
  0x6c   :  { %647 = vmatprep.subr.bf16.mxu0 %v4546_v1  ;;  %s5547_s11 = sld [smem:[#allocation2 + $0x582]] }
  0x6d   :  { %842 = vmatpush1.bf16.msra.mxu1 %v4285_v4  ;;  %v907_v4 = vmul.f32 %v4769_v49, %v906_v57  ;;  %v900_v8 = vadd.f32 %v899_v56, %v896_v63  ;;  %v5130_v56 = vld [vmem:[%s6336_s2 + $0x4] sm:$0xf]  ;;  %s5645_s22 = sld [smem:[#allocation2 + $0x586]] }
  0x6e   :  { %843 = vmatprep.subr.bf16.mxu1 %v4546_v1  ;;  %v1279_v57 = vmul.f32 %v5130_v56, %v1278_v52  ;;  %s5732_s10 = sld [smem:[#allocation2 + $0x600]] }
  0x6f   :  { %648 = vmatpush1.bf16.msra.mxu0 %v4290_v10  ;;  %v1090_v10 = vstv %s5012_s14  ;;  %v904_v12 = vadd.f32 %v903_v0, %v900_v8  ;;  %s5352_s14 = sld [smem:[#allocation2 + $0x483]] }
  0x70   :  { %655 = vmatprep.subr.bf16.mxu0 %v4546_v1  ;;  %v1091_v14 = vmul.f32 %v4712_v28, %v1090_v10  ;;  %v1102_v28 = vstv %s5027_s0  ;;  %s5098_s0 = sld [smem:[#allocation2 + $0x303]] }
  0x71   :  { %844 = vmatpush1.bf16.msra.mxu1 %v4287_v9  ;;  %v1080_v9 = vadd.f32 %v1079_v2, %v1076_v60  ;;  %v908_v17 = vadd.f32 %v907_v4, %v904_v12  ;;  %v1103_v33 = vmul.f32 %v4761_v47, %v1102_v28  ;;  %v4301_v47 = vld [vmem:[%s6337_s3 + $0x16c] sm:$0xff]   ;;  %v5140_v60 = vld [vmem:[%s6336_s2 + $0x8] sm:$0xf]  ;;  %v1478_v28 = vstv %s5163_s15  ;;  %s5233_s15 = sld [smem:[#allocation5 + $0x6]] }
  0x72   :  { %845 = vmatprep.subr.bf16.mxu1 %v4546_v1  ;;  %v1283_v61 = vmul.f32 %v5140_v60, %v1282_v58  ;;  %v5152_v2 = vld [vmem:[%s6336_s2 + $0xc] sm:$0xf]  ;;  %v1502_v58 = vstv %s5227_s12  ;;  %s5288_s12 = sld [smem:[#allocation2 + $0x400]] }
  0x73   :  { %656 = vmatpush2.bf16.msra.mxu0 %v631_v19  ;;  %v1084_v13 = vadd.f32 %v1083_v6, %v1080_v9  ;;  %v1095_v19 = vmul.f32 %v4730_v35, %v1094_v11  ;;  %v911_v25 = vadd.f32 %v910_v15, %v908_v17  ;;  %v1106_v35 = vstv %s5042_s19  ;;  %s5111_s19 = sld [smem:[#allocation2 + $0x306]]  ;;  %v4310_v4 = vld [vmem:[%s6337_s3 + $0x1a8] sm:$0xff]   ;;  %v5170_v9 = vld [vmem:[%s6336_s2 + $0x10] sm:$0xf]  ;;  %v4307_v11 = vld [vmem:[%s6337_s3 + $0x21c] sm:$0xff]  }
  0x74   :  { %657 = vmatprep.subr.bf16.mxu0 %v4546_v1  ;;  %v1107_v38 = vmul.f32 %v4769_v49, %v1106_v35  ;;  %v1110_v49 = vstv %s5063_s21  ;;  %v1294_v6 = vstv %s5108_s18  ;;  %v4312_v15 = vld [vmem:[%s6337_s3 + $0x1a0] sm:$0xff]   ;;  %v4314_v35 = vld [vmem:[%s6337_s3 + $0x198] sm:$0xff]   ;;  %s5307_s18 = sld [smem:[#allocation2 + $0x403]] }
  0x75   :  { %846 = vmatpush1.bf16.msra.mxu1 %v4289_v18  ;;  %v1088_v18 = vadd.f32 %v1087_v22, %v1084_v13  ;;  %v912_v31 = vmax.f32 %v911_v25, 0.0  ;;  %v5185_v13 = vld [vmem:[%s6336_s2 + $0x14] sm:$0xf]  ;;  %s5459_s21 = sld [smem:[#allocation5 + $0x9]] }
  0x76   :  { %847 = vmatprep.subr.bf16.mxu1 %v4546_v1  ;;  %s5773_s20 = sld [smem:[#allocation2 + $0x681]] }
  0x77   :  { %658 = vmatpush2.bf16.msra.mxu0 %v4294_v27  ;;  %v1092_v27 = vadd.f32 %v1091_v14, %v1088_v18  ;;  %v5080_v34 = vrot.slane %v912_v31, %v4815_v29  ;;  %v1295_v14 = vmul.f32 %v5185_v13, %v1294_v6  ;;  %v1302_v18 = vstv %s5134_s30  ;;  %s5340_s30 = sld [smem:[#allocation2 + $0x482]] }
  0x78   :  { %659 = vmatprep.subr.bf16.mxu0 %v4546_v1 }
  0x79   :  { %848 = vmatpush1.bf16.msra.mxu1 %v4291_v40  ;;  %v1096_v32 = vadd.f32 %v1095_v19, %v1092_v27  ;;  %v921_v40 = vcombine.high %v5080_v34, %v5080_v34  ;;  %v1298_v10 = vstv %s5111_s19  ;;  %s5188_s19 = sld [smem:[#allocation2 + $0x384]]  ;;  %v1475_v19 = vstv %s5156_s13 }
  0x7a   :  { %855 = vmatprep.subr.bf16.mxu1 %v4546_v1  ;;  %v1479_v27 = vmul.f32 %v5130_v56, %v1478_v28  ;;  %s5423_s13 = sld [smem:[#allocation2 + $0x487]] }
  0x7b   :  { %660 = vmatpush2.bf16.msra.mxu0 %v4296_v50  ;;  %v1100_v37 = vadd.f32 %v1099_v30, %v1096_v32  ;;  %v925_v42 = vpack.c.bf16 %v921_v40, %v921_v40  ;;  %v1275_v50 = vstv %s3712_s28  ;;  %s5144_s28 = sld [smem:[#allocation2 + $0x308]]  ;;  %v1494_v40 = vstv %s5191_s26 }
  0x7c   :  { %661 = vmatprep.subr.bf16.mxu0 %v4546_v1  ;;  %v1276_v51 = vmul.f32 %v5117_v36, %v1275_v50  ;;  %v5253_v50 = vld [vmem:[%s6336_s2 + $0x20] sm:$0xf]  ;;  %s5322_s26 = sld [smem:[#allocation2 + $0x404]] }
  0x7d   :  { %856 = vmatpush2.bf16.msra.mxu1 %v831_v48  ;;  %v1104_v41 = vadd.f32 %v1103_v33, %v1100_v37  ;;  %v1486_v33 = vstv %s5177_s17  ;;  %s5378_s17 = sld [smem:[#allocation2 + $0x406]] }
  0x7e   :  { %857 = vmatprep.subr.bf16.mxu1 %v4546_v1  ;;  %v1280_v0 = vadd.f32 %v1279_v57, %v1276_v51 }
  0x7f   :  { %662 = vmatpush2.bf16.msra.mxu0 %v4298_v62  ;;  %v1108_v44 = vadd.f32 %v1107_v38, %v1104_v41  ;;  %v1286_v62 = vstv %s5098_s0  ;;  %v1487_v38 = vmul.f32 %v5152_v2, %v1486_v33  ;;  %v4311_v41 = vld [vmem:[%s6337_s3 + $0x20c] sm:$0xff]   ;;  %v924_v33 = vpack.c.bf16 %v5080_v34, %v5080_v34  ;;  %s5492_s0 = sld [smem:[#allocation2 + $0x502]] }
  0x80   :  { %663 = vmatprep.subr.bf16.mxu0 %v4546_v1  ;;  %v1287_v3 = vmul.f32 %v5152_v2, %v1286_v62  ;;  %v1284_v8 = vadd.f32 %v1283_v61, %v1280_v0 }
  0x81   :  { %858 = vmatpush2.bf16.msra.mxu1 %v4295_v21  ;;  %v1111_v48 = vadd.f32 %v1110_v49, %v1108_v44  ;;  %v1290_v21 = vstv %s5100_s1  ;;  %s5173_s1 = sld [smem:[#allocation2 + $0x382]]  ;;  %v4318_v44 = vld [vmem:[%s6337_s3 + $0x1f0] ss:$0 sps:$4 sm:$0x33]  }
  0x82   :  { %859 = vmatprep.subr.bf16.mxu1 %v4546_v1  ;;  %v1291_v22 = vmul.f32 %v5170_v9, %v1290_v21  ;;  %v1288_v12 = vadd.f32 %v1287_v3, %v1284_v8  ;;  %v1031_v0 = vsel %vm309_vm0, %v4318_v44, 0  ;;  %v1310_v3 = vstv %s5233_s15  ;;  %v4315_v21 = vld [vmem:[%s6337_s3 + $0x1fc] sm:$0xff]   ;;  %v4320_v8 = vld [vmem:[%s6337_s3 + $0x1e8] sm:$0xff]   ;;  %s5291_s15 = sld [smem:[#allocation2 + $0x401]] }
  0x83   :  { %664 = vmatpush2.bf16.msra.mxu0 %v4300_v24  ;;  %v1112_v55 = vmax.f32 %v1111_v48, 0.0 }
  0x84   :  { %1033 = vmatprep.subr.bf16.mxu0 %v4546_v1  ;;  %v1292_v16 = vadd.f32 %v1291_v22, %v1288_v12 }
  0x85   :  { %860 = vmatpush2.bf16.msra.mxu1 %v4297_v26  ;;  %v5147_v63 = vrot.slane %v1112_v55, %v4815_v29  ;;  %v5200_v26 = vld [vmem:[%s6336_s2 + $0x18] sm:$0xf] }
  0x86   :  { %861 = vmatprep.subr.bf16.mxu1 %v4546_v1  ;;  %666 = vmatmul.mubr.bf16.vlgmr.msra.gmra.mxu0 %v524_v20  ;;  %v1299_v17 = vmul.f32 %v5200_v26, %v1298_v10  ;;  %v1476_v20 = vmul.f32 %v5117_v36, %v1475_v19  ;;  %v1296_v25 = vadd.f32 %v1295_v14, %v1292_v16  ;;  %v4319_v10 = vld [vmem:[%s6337_s3 + $0x254] ss:$0 sps:$4 sm:$0x33]   ;;  %v4322_v14 = vld [vmem:[%s6337_s3 + $0x1e0] sm:$0xff]   ;;  %v4321_v19 = vld [vmem:[%s6337_s3 + $0x24c] sm:$0xff]  }
  0x87   :  { %1034 = vmatpush1.bf16.msra.mxu0 %v4302_v23  ;;  %3662 = vmatprep.mubr.msk.bf16.mxu0 %vm305_vm1, %v925_v42  ;;  %v1121_v7 = vcombine.high %v5147_v63, %v5147_v63  ;;  %v4309_v23 = vld [vmem:[%s6337_s3 + $0x214] sm:$0xff]   ;;  %v1482_v30 = vstv %s5173_s1  ;;  %s5372_s1 = sld [smem:[#allocation2 + $0x484]] }
  0x88   :  { %1035 = vmatprep.subr.bf16.mxu0 %v4546_v1  ;;  %v1483_v32 = vmul.f32 %v5140_v60, %v1482_v30  ;;  %v1480_v37 = vadd.f32 %v1479_v27, %v1476_v20  ;;  %v4324_v20 = vld [vmem:[%s6337_s3 + $0x1d8] sm:$0xff]   ;;  %v1675_v30 = vstv %s5288_s12 }
  0x89   :  { %862 = vmatpush2.bf16.msra.mxu1 %v4299_v5  ;;  %v1125_v24 = vpack.c.bf16 %v1121_v7, %v1121_v7  ;;  %v5222_v5 = vld [vmem:[%s6336_s2 + $0x1c] sm:$0xf] }
  0x8a   :  { %863 = vmatprep.subr.bf16.mxu1 %v4546_v1  ;;  %v1303_v31 = vmul.f32 %v5222_v5, %v1302_v18  ;;  %v1484_v49 = vadd.f32 %v1483_v32, %v1480_v37  ;;  %v1503_v6 = vmul.f32 %v5222_v5, %v1502_v58  ;;  %v1510_v18 = vstv %s3770_s24  ;;  %v4325_v37 = vld [vmem:[%s6337_s3 + $0x23c] sm:$0xff]   ;;  %s5664_s24 = sld [smem:[#allocation2 + $0x587]] }
  0x8b   :  { %1036 = vmatpush1.bf16.msra.mxu0 %v4304_v43  ;;  %v1300_v43 = vadd.f32 %v1299_v17, %v1296_v25  ;;  %v1231_v17 = vsel %vm309_vm0, %v4319_v10, 0  ;;  %v4326_v25 = vld [vmem:[%s6337_s3 + $0x1d0] sm:$0xff]   ;;  %v1882_v58 = vstv %s5340_s30  ;;  %s5610_s30 = sld [smem:[#allocation2 + $0x507]] }
  0x8c   :  { %1037 = vmatprep.subr.bf16.mxu0 %v4546_v1  ;;  %v1488_v52 = vadd.f32 %v1487_v38, %v1484_v49  ;;  %v1875_v49 = vstv %s5313_s25  ;;  %s5390_s25 = sld [smem:[#allocation2 + $0x485]]  ;;  %v4331_v10 = vld [vmem:[%s6337_s3 + $0x2ec] sm:$0xff]  }
  0x8d   :  { %864 = vmatpush2.bf16.msra.mxu1 %v4301_v47  ;;  %v1490_v47 = vstv %s5188_s19  ;;  %v1304_v48 = vadd.f32 %v1303_v31, %v1300_v43  ;;  %s5317_s19 = sld [smem:[#allocation2 + $0x481]]  ;;  %v4323_v31 = vld [vmem:[%s6337_s3 + $0x244] sm:$0xff]   ;;  %v4328_v43 = vld [vmem:[%s6337_s3 + $0x290] sm:$0xff]  }
  0x8e   :  { %1233 = vmatprep.subr.bf16.mxu1 %v4546_v1  ;;  %v1491_v42 = vmul.f32 %v5170_v9, %v1490_v47  ;;  %v1676_v47 = vmul.f32 %v5117_v36, %v1675_v30 }
  0x8f   :  { %1038 = vmatpush1.bf16.msra.mxu0 %v4306_v39  ;;  %v1306_v39 = vstv %s5144_s28  ;;  %s5245_s28 = sld [smem:[#allocation2 + $0x388]] }
  0x90   :  { %866 = vmatmul.mubr.bf16.vlgmr.msra.gmra.mxu1 %v724_v45  ;;  %1039 = vmatprep.subr.bf16.mxu0 %v4546_v1  ;;  %v1498_v45 = vstv %s5205_s27  ;;  %v1307_v51 = vmul.f32 %v5253_v50, %v1306_v39  ;;  %v1492_v55 = vadd.f32 %v1491_v42, %v1488_v52  ;;  %s5333_s27 = sld [smem:[#allocation2 + $0x405]]  ;;  %v4327_v42 = vld [vmem:[%s6337_s3 + $0x234] sm:$0xff]   ;;  %v4332_v52 = vld [vmem:[%s6337_s3 + $0x280] sm:$0xff]  }
  0x91   :  { %1234 = vmatpush1.bf16.msra.mxu1 %v4303_v46  ;;  %3711 = vmatprep.mubr.msk.bf16.mxu1 %vm305_vm1, %v1125_v24  ;;  %v4316_v46 = vld [vmem:[%s6337_s3 + $0x190] sm:$0xff]   ;;  %v1499_v57 = vmul.f32 %v5200_v26, %v1498_v45 }
  0x92   :  { %1235 = vmatprep.subr.bf16.mxu1 %v4546_v1  ;;  %v1308_v61 = vadd.f32 %v1307_v51, %v1304_v48  ;;  %v1686_v48 = vstv %s5307_s18  ;;  %s5578_s18 = sld [smem:[#allocation2 + $0x506]] }
  0x93   :  { %1040 = vmatpush1.bf16.msra.mxu0 %v4308_v54  ;;  %v4313_v54 = vld [vmem:[%s6337_s3 + $0x204] sm:$0xff]  }
  0x94   :  { %1041 = vmatprep.subr.bf16.mxu0 %v4546_v1  ;;  %v1311_v22 = vadd.f32 %v1310_v3, %v1308_v61  ;;  %v1124_v61 = vpack.c.bf16 %v5147_v63, %v5147_v63  ;;  %v1883_v63 = vmul.f32 %v5140_v60, %v1882_v58  ;;  %v4343_v58 = vld [vmem:[%s6337_s3 + $0x2bc] sm:$0xff]  }
  0x95   :  { %1236 = vmatpush1.bf16.msra.mxu1 %v4305_v53  ;;  %v1495_v53 = vmul.f32 %v5185_v13, %v1494_v40  ;;  %v1506_v7 = vstv %s5245_s28  ;;  %s5305_s28 = sld [smem:[#allocation2 + $0x402]] }
  0x96   :  { %1237 = vmatprep.subr.bf16.mxu1 %v4546_v1  ;;  %v1507_v12 = vmul.f32 %v5253_v50, %v1506_v7 }
  0x97   :  { %1042 = vmatpush1.bf16.msra.mxu0 %v4310_v4  ;;  %v1496_v62 = vadd.f32 %v1495_v53, %v1492_v55  ;;  %v1876_v53 = vmul.f32 %v5117_v36, %v1875_v49  ;;  %v4342_v49 = vld [vmem:[%s6337_s3 + $0x258] sm:$0xff]  }
  0x98   :  { %1043 = vmatprep.subr.bf16.mxu0 %v4546_v1 }
  0x99   :  { %1238 = vmatpush1.bf16.msra.mxu1 %v4307_v11  ;;  %v1500_v4 = vadd.f32 %v1499_v57, %v1496_v62  ;;  %v4317_v11 = vld [vmem:[%s6337_s3 + $0x1f4] sm:$0xff]   ;;  %v1687_v57 = vmul.f32 %v5152_v2, %v1686_v48  ;;  %v1690_v62 = vstv %s5322_s26  ;;  %s5791_s26 = sld [smem:[#allocation2 + $0x682]] }
  0x9a   :  { %1239 = vmatprep.subr.bf16.mxu1 %v4546_v1  ;;  %v1691_v7 = vmul.f32 %v5170_v9, %v1690_v62  ;;  %v4345_v62 = vld [vmem:[%s6337_s3 + $0x31c] ss:$0 sps:$4 sm:$0x33]  }
  0x9b   :  { %1044 = vmatpush1.bf16.msra.mxu0 %v4312_v15  ;;  %v1504_v24 = vadd.f32 %v1503_v6, %v1500_v4  ;;  %v1312_v15 = vmax.f32 %v1311_v22, 0.0  ;;  %v1682_v34 = vstv %s5305_s28  ;;  %v1694_v22 = vstv %s5333_s27  ;;  %s5411_s27 = sld [smem:[#allocation2 + $0x408]] }
  0x9c   :  { %1045 = vmatprep.subr.bf16.mxu0 %v4546_v1  ;;  %v1683_v45 = vmul.f32 %v5140_v60, %v1682_v34  ;;  %s5444_s28 = sld [smem:[#allocation5 + $0x8]] }
  0x9d   :  { %1240 = vmatpush1.bf16.msra.mxu1 %v4309_v23  ;;  %v1508_v16 = vadd.f32 %v1507_v12, %v1504_v24  ;;  %v5302_v28 = vrot.slane %v1312_v15, %v4815_v29  ;;  %v1695_v15 = vmul.f32 %v5185_v13, %v1694_v22  ;;  %v4352_v22 = vld [vmem:[%s6337_s3 + $0x298] sm:$0xff]  }
  0x9e   :  { %1241 = vmatprep.subr.bf16.mxu1 %v4546_v1 }
  0x9f   :  { %1046 = vmatpush1.bf16.msra.mxu0 %v4314_v35  ;;  %v1511_v23 = vadd.f32 %v1510_v18, %v1508_v16  ;;  %v1321_v27 = vcombine.high %v5302_v28, %v5302_v28  ;;  %v1678_v35 = vstv %s5291_s15  ;;  %v1890_v16 = vstv %s5372_s1  ;;  %v4333_v18 = vld [vmem:[%s6337_s3 + $0x2e4] sm:$0xff]   ;;  %s5563_s15 = sld [smem:[#allocation2 + $0x583]] }
  0xa0   :  { %1047 = vmatprep.subr.bf16.mxu0 %v4546_v1  ;;  %v1679_v39 = vmul.f32 %v5130_v56, %v1678_v35  ;;  %s5976_s1 = sld [smem:[#allocation2 + $0x781]] }
  0xa1   :  { %1242 = vmatpush1.bf16.msra.mxu1 %v4311_v41  ;;  %v1512_v32 = vmax.f32 %v1511_v23, 0.0  ;;  %v1325_v38 = vpack.c.bf16 %v1321_v27, %v1321_v27  ;;  %v4330_v41 = vld [vmem:[%s6337_s3 + $0x288] sm:$0xff]   ;;  %v1894_v27 = vstv %s5390_s25  ;;  %s5715_s25 = sld [smem:[#allocation5 + $0xb]] }
  0xa2   :  { %1243 = vmatprep.subr.bf16.mxu1 %v4546_v1  ;;  %v1680_v44 = vadd.f32 %v1679_v39, %v1676_v47  ;;  %v1706_v47 = vstv %s5411_s27  ;;  %s5531_s27 = sld [smem:[#allocation2 + $0x581]] }
  0xa3   :  { %1048 = vmatpush1.bf16.msra.mxu0 %v4316_v46  ;;  %v5345_v40 = vrot.slane %v1512_v32, %v4815_v29  ;;  %v1878_v46 = vstv %s5317_s19  ;;  %s5394_s19 = sld [smem:[#allocation2 + $0x407]]  ;;  %v4340_v32 = vld [vmem:[%s6337_s3 + $0x260] sm:$0xff]  }
  0xa4   :  { %1055 = vmatprep.subr.bf16.mxu0 %v4546_v1  ;;  %v1684_v55 = vadd.f32 %v1683_v45, %v1680_v44  ;;  %v1707_v44 = vmul.f32 %v5253_v50, %v1706_v47  ;;  %v1902_v45 = vstv %s5423_s13  ;;  %s5553_s13 = sld [smem:[#allocation2 + $0x505]] }
  0xa5   :  { %1244 = vmatpush1.bf16.msra.mxu1 %v4313_v54  ;;  %v1521_v51 = vcombine.high %v5345_v40, %v5345_v40  ;;  %v1879_v54 = vmul.f32 %v5130_v56, %v1878_v46  ;;  %v1903_v48 = vmul.f32 %v5222_v5, %v1902_v45 }
  0xa6   :  { %1245 = vmatprep.subr.bf16.mxu1 %v4546_v1  ;;  %v1688_v6 = vadd.f32 %v1687_v57, %v1684_v55 }
  0xa7   :  { %1056 = vmatpush2.bf16.msra.mxu0 %v1031_v0  ;;  %v4329_v0 = vld [vmem:[%s6337_s3 + $0x2f4] sm:$0xff]   ;;  %v1525_v3 = vpack.c.bf16 %v1521_v51, %v1521_v51  ;;  %v1880_v4 = vadd.f32 %v1879_v54, %v1876_v53  ;;  %v4341_v51 = vld [vmem:[%s6337_s3 + $0x2c4] sm:$0xff]   ;;  %v1906_v53 = vstv %s5437_s16  ;;  %v1710_v54 = vstv %s5444_s28  ;;  %s5495_s16 = sld [smem:[#allocation2 + $0x503]] }
  0xa8   :  { %1057 = vmatprep.subr.bf16.mxu0 %v4546_v1  ;;  %v1907_v57 = vmul.f32 %v5253_v50, %v1906_v53  ;;  %v4348_v50 = vld [vmem:[%s6337_s3 + $0x2a8] sm:$0xff]   ;;  %s5502_s28 = sld [smem:[#allocation2 + $0x504]]  ;;  %v2286_v53 = vstv %s5563_s15 }
  0xa9   :  { %1246 = vmatpush1.bf16.msra.mxu1 %v4315_v21  ;;  %v4334_v21 = vld [vmem:[%s6337_s3 + $0x278] sm:$0xff]   ;;  %v1884_v24 = vadd.f32 %v1883_v63, %v1880_v4  ;;  %v1702_v30 = vstv %s5394_s19  ;;  %v1631_v4 = vsel %vm309_vm0, %v4345_v62, 0  ;;  %v4350_v63 = vld [vmem:[%s6337_s3 + $0x2a0] sm:$0xff]   ;;  %s5515_s19 = sld [smem:[#allocation2 + $0x580]] }
  0xaa   :  { %1247 = vmatprep.subr.bf16.mxu1 %v4546_v1  ;;  %s5637_s15 = sld [smem:[#allocation2 + $0x508]] }
  0xab   :  { %1058 = vmatpush2.bf16.msra.mxu0 %v4320_v8  ;;  %v1886_v8 = vstv %s5352_s14  ;;  %s5685_s14 = sld [smem:[#allocation2 + $0x588]] }
  0xac   :  { %1059 = vmatprep.subr.bf16.mxu0 %v4546_v1  ;;  %v1887_v12 = vmul.f32 %v5152_v2, %v1886_v8 }
  0xad   :  { %1248 = vmatpush1.bf16.msra.mxu1 %v4317_v11  ;;  %v4336_v11 = vld [vmem:[%s6337_s3 + $0x270] sm:$0xff]  }
  0xae   :  { %1255 = vmatprep.subr.bf16.mxu1 %v4546_v1  ;;  %v1888_v2 = vadd.f32 %v1887_v12, %v1884_v24  ;;  %v2075_v12 = vstv %s5465_s23  ;;  %s5677_s23 = sld [smem:[#allocation5 + $0xa]] }
  0xaf   :  { %1060 = vmatpush2.bf16.msra.mxu0 %v4322_v14  ;;  %v1692_v14 = vadd.f32 %v1691_v7, %v1688_v6  ;;  %v4347_v7 = vld [vmem:[%s6337_s3 + $0x314] sm:$0xff]  }
  0xb0   :  { %1061 = vmatprep.subr.bf16.mxu0 %v4546_v1 }
  0xb1   :  { %1256 = vmatpush2.bf16.msra.mxu1 %v1231_v17  ;;  %v1698_v17 = vstv %s5378_s17  ;;  %v1696_v23 = vadd.f32 %v1695_v15, %v1692_v14  ;;  %v2078_v14 = vstv %s5478_s9  ;;  %v1324_v15 = vpack.c.bf16 %v5302_v28, %v5302_v28  ;;  %s5768_s17 = sld [smem:[#allocation2 + $0x680]] }
  0xb2   :  { %1257 = vmatprep.subr.bf16.mxu1 %v4546_v1  ;;  %v2082_v28 = vstv %s5492_s0  ;;  %s5820_s9 = sld [smem:[#allocation2 + $0x606]] }
  0xb3   :  { %1062 = vmatpush2.bf16.msra.mxu0 %v4324_v20  ;;  %v4338_v20 = vld [vmem:[%s6337_s3 + $0x268] sm:$0xff]  }
  0xb4   :  { %1063 = vmatprep.subr.bf16.mxu0 %v4546_v1 }
  0xb5   :  { %1258 = vmatpush2.bf16.msra.mxu1 %v4321_v19  ;;  %v1891_v19 = vmul.f32 %v5170_v9, %v1890_v16  ;;  %v4335_v9 = vld [vmem:[%s6337_s3 + $0x2dc] sm:$0xff]  }
  0xb6   :  { %1259 = vmatprep.subr.bf16.mxu1 %v4546_v1  ;;  %v4354_v16 = vld [vmem:[%s6337_s3 + $0x358] sm:$0xff]  }
  0xb7   :  { %1064 = vmatpush2.bf16.msra.mxu0 %v4326_v25  ;;  %v1699_v25 = vmul.f32 %v5200_v26, %v1698_v17  ;;  %v1892_v35 = vadd.f32 %v1891_v19, %v1888_v2  ;;  %v4351_v17 = vld [vmem:[%s6337_s3 + $0x304] sm:$0xff]   ;;  %v2076_v2 = vmul.f32 %v5117_v36, %v2075_v12  ;;  %v2079_v19 = vmul.f32 %v5130_v56, %v2078_v14  ;;  %v5672_v14 = vld [vmem:[%s6336_s2 + $0x1c] sm:$0xf] }
  0xb8   :  { %1433 = vmatprep.subr.bf16.mxu0 %v4546_v1  ;;  %v2083_v56 = vmul.f32 %v5140_v60, %v2082_v28  ;;  %v4358_v60 = vld [vmem:[%s6337_s3 + $0x348] sm:$0xff]   ;;  %v4368_v28 = vld [vmem:[%s6337_s3 + $0x320] sm:$0xff]  }
  0xb9   :  { %1260 = vmatpush2.bf16.msra.mxu1 %v4323_v31  ;;  %v1895_v31 = vmul.f32 %v5185_v13, %v1894_v27  ;;  %v4337_v13 = vld [vmem:[%s6337_s3 + $0x2d4] sm:$0xff]   ;;  %v2080_v36 = vadd.f32 %v2079_v19, %v2076_v2  ;;  %v4353_v27 = vld [vmem:[%s6337_s3 + $0x2fc] sm:$0xff]   ;;  %v2298_v19 = vstv %s5645_s22  ;;  %s5854_s22 = sld [smem:[#allocation2 + $0x608]] }
  0xba   :  { %1261 = vmatprep.subr.bf16.mxu1 %v4546_v1  ;;  %1066 = vmatmul.mubr.bf16.vlgmr.msra.gmra.mxu0 %v924_v33  ;;  %v1700_v33 = vadd.f32 %v1699_v25, %v1696_v23  ;;  %v4356_v23 = vld [vmem:[%s6337_s3 + $0x350] sm:$0xff]   ;;  %v2086_v25 = vstv %s5495_s16  ;;  %s5761_s16 = sld [smem:[#allocation2 + $0x603]] }
  0xbb   :  { %1434 = vmatpush1.bf16.msra.mxu0 %v4328_v43  ;;  %3760 = vmatprep.mubr.msk.bf16.mxu0 %vm305_vm1, %v1325_v38  ;;  %v1703_v43 = vmul.f32 %v5222_v5, %v1702_v30  ;;  %v4344_v38 = vld [vmem:[%s6337_s3 + $0x2b8] ss:$0 sps:$4 sm:$0x33]   ;;  %v1896_v39 = vadd.f32 %v1895_v31, %v1892_v35  ;;  %v4346_v5 = vld [vmem:[%s6337_s3 + $0x2b0] sm:$0xff]   ;;  %v2278_v35 = vstv %s5531_s27  ;;  %v2084_v31 = vadd.f32 %v2083_v56, %v2080_v36  ;;  %v5693_v36 = vld [vmem:[%s6336_s2 + $0x20] sm:$0xf] }
  0xbc   :  { %1435 = vmatprep.subr.bf16.mxu0 %v4546_v1 }
  0xbd   :  { %1262 = vmatpush2.bf16.msra.mxu1 %v4325_v37  ;;  %v1898_v37 = vstv %s5407_s29  ;;  %s5876_s29 = sld [smem:[#allocation2 + $0x687]] }
  0xbe   :  { %1263 = vmatprep.subr.bf16.mxu1 %v4546_v1  ;;  %v1899_v34 = vmul.f32 %v5200_v26, %v1898_v37  ;;  %v1431_v26 = vsel %vm309_vm0, %v4344_v38, 0  ;;  %v2090_v37 = vstv %s5502_s28  ;;  %v4355_v38 = vld [vmem:[%s6337_s3 + $0x3bc] sm:$0xff]   ;;  %s5597_s28 = sld [smem:[#allocation2 + $0x584]] }
  0xbf   :  { %1436 = vmatpush1.bf16.msra.mxu0 %v4330_v41  ;;  %v4339_v41 = vld [vmem:[%s6337_s3 + $0x2cc] sm:$0xff]  }
  0xc0   :  { %1437 = vmatprep.subr.bf16.mxu0 %v4546_v1  ;;  %v1900_v46 = vadd.f32 %v1899_v34, %v1896_v39 }
  0xc1   :  { %1264 = vmatpush2.bf16.msra.mxu1 %v4327_v42  ;;  %v1704_v42 = vadd.f32 %v1703_v43, %v1700_v33  ;;  %v1524_v43 = vpack.c.bf16 %v5345_v40, %v5345_v40  ;;  %v5592_v40 = vld [vmem:[%s6336_s2 + $0x4] sm:$0xf] }
  0xc2   :  { %1633 = vmatprep.subr.bf16.mxu1 %v4546_v1  ;;  %v1904_v55 = vadd.f32 %v1903_v48, %v1900_v46  ;;  %v2279_v34 = vmul.f32 %v5592_v40, %v2278_v35  ;;  %v4357_v46 = vld [vmem:[%s6337_s3 + $0x3b4] sm:$0xff]   ;;  %v2302_v35 = vstv %s5664_s24  ;;  %s5800_s24 = sld [smem:[#allocation2 + $0x605]] }
  0xc3   :  { %1438 = vmatpush1.bf16.msra.mxu0 %v4332_v52  ;;  %v1708_v52 = vadd.f32 %v1707_v44, %v1704_v42  ;;  %v5605_v44 = vld [vmem:[%s6336_s2 + $0x10] sm:$0xf] }
  0xc4   :  { %1266 = vmatmul.mubr.bf16.vlgmr.msra.gmra.mxu1 %v1124_v61  ;;  %1439 = vmatprep.subr.bf16.mxu0 %v4546_v1  ;;  %v2091_v45 = vmul.f32 %v5605_v44, %v2090_v37 }
  0xc5   :  { %1634 = vmatpush1.bf16.msra.mxu1 %v4329_v0  ;;  %3809 = vmatprep.mubr.msk.bf16.mxu1 %vm305_vm1, %v1525_v3  ;;  %v1711_v61 = vadd.f32 %v1710_v54, %v1708_v52  ;;  %v1908_v0 = vadd.f32 %v1907_v57, %v1904_v55  ;;  %v4362_v54 = vld [vmem:[%s6337_s3 + $0x338] sm:$0xff]   ;;  %v5632_v55 = vld [vmem:[%s6336_s2 + $0x14] sm:$0xf] }
  0xc6   :  { %1635 = vmatprep.subr.bf16.mxu1 %v4546_v1 }
  0xc7   :  { %1440 = vmatpush1.bf16.msra.mxu0 %v4334_v21  ;;  %v1712_v3 = vmax.f32 %v1711_v61, 0.0  ;;  %v1910_v21 = vstv %s5459_s21  ;;  %v4359_v61 = vld [vmem:[%s6337_s3 + $0x3ac] sm:$0xff]   ;;  %s6079_s21 = sld [smem:[#allocation2 + $0x787]] }
  0xc8   :  { %1441 = vmatprep.subr.bf16.mxu0 %v4546_v1  ;;  %v1911_v6 = vadd.f32 %v1910_v21, %v1908_v0 }
  0xc9   :  { %1636 = vmatpush1.bf16.msra.mxu1 %v4331_v10  ;;  %v5508_v8 = vrot.slane %v1712_v3, %v4815_v29  ;;  %v4364_v3 = vld [vmem:[%s6337_s3 + $0x330] sm:$0xff]  }
  0xca   :  { %1637 = vmatprep.subr.bf16.mxu1 %v4546_v1  ;;  %v1912_v10 = vmax.f32 %v1911_v6, 0.0  ;;  %v2102_v6 = vstv %s5610_s30  ;;  %s5735_s30 = sld [smem:[#allocation2 + $0x601]] }
  0xcb   :  { %1442 = vmatpush1.bf16.msra.mxu0 %v4336_v11  ;;  %v4349_v11 = vld [vmem:[%s6337_s3 + $0x30c] sm:$0xff]   ;;  %v1721_v24 = vcombine.high %v5508_v8, %v5508_v8 }
  0xcc   :  { %1443 = vmatprep.subr.bf16.mxu0 %v4546_v1 }
  0xcd   :  { %1638 = vmatpush1.bf16.msra.mxu1 %v4333_v18  ;;  %v1725_v18 = vpack.c.bf16 %v1721_v24, %v1721_v24  ;;  %v4366_v24 = vld [vmem:[%s6337_s3 + $0x328] sm:$0xff]  }
  0xce   :  { %1639 = vmatprep.subr.bf16.mxu1 %v4546_v1 }
  0xcf   :  { %1444 = vmatpush1.bf16.msra.mxu0 %v4338_v20  ;;  %v5541_v20 = vrot.slane %v1912_v10, %v4815_v29 }
  0xd0   :  { %1445 = vmatprep.subr.bf16.mxu0 %v4546_v1 }
  0xd1   :  { %1640 = vmatpush1.bf16.msra.mxu1 %v4335_v9  ;;  %v1921_v30 = vcombine.high %v5541_v20, %v5541_v20  ;;  %v2275_v9 = vstv %s5515_s19 }
  0xd2   :  { %1641 = vmatprep.subr.bf16.mxu1 %v4546_v1 }
  0xd3   :  { %1446 = vmatpush1.bf16.msra.mxu0 %v4340_v32  ;;  %v5571_v32 = vld [vmem:[%s6336_s2 + $0xc] sm:$0xf]  ;;  %v1925_v47 = vpack.c.bf16 %v1921_v30, %v1921_v30 }
  0xd4   :  { %1447 = vmatprep.subr.bf16.mxu0 %v4546_v1  ;;  %v2087_v33 = vmul.f32 %v5571_v32, %v2086_v25  ;;  %v2287_v0 = vmul.f32 %v5571_v32, %v2286_v53  ;;  %v4370_v25 = vld [vmem:[%s6337_s3 + $0x380] ss:$0 sps:$4 sm:$0x33]  }
  0xd5   :  { %1642 = vmatpush1.bf16.msra.mxu1 %v4337_v13  ;;  %v5586_v13 = vld [vmem:[%s6336_s2] sm:$0xf] }
  0xd6   :  { %1643 = vmatprep.subr.bf16.mxu1 %v4546_v1  ;;  %v2276_v39 = vmul.f32 %v5586_v13, %v2275_v9  ;;  %v2088_v42 = vadd.f32 %v2087_v33, %v2084_v31  ;;  %v1831_v31 = vsel %vm309_vm0, %v4370_v25, 0  ;;  %v2110_v33 = vstv %s5677_s23 }
  0xd7   :  { %1448 = vmatpush1.bf16.msra.mxu0 %v4342_v49  ;;  %v4360_v49 = vld [vmem:[%s6337_s3 + $0x340] sm:$0xff]  }
  0xd8   :  { %1455 = vmatprep.subr.bf16.mxu0 %v4546_v1  ;;  %v2280_v48 = vadd.f32 %v2279_v34, %v2276_v39  ;;  %v4372_v39 = vld [vmem:[%s6337_s3 + $0x378] sm:$0xff]  }
  0xd9   :  { %1644 = vmatpush1.bf16.msra.mxu1 %v4339_v41  ;;  %v2282_v41 = vstv %s5547_s11  ;;  %s5747_s11 = sld [smem:[#allocation2 + $0x602]] }
  0xda   :  { %1645 = vmatprep.subr.bf16.mxu1 %v4546_v1 }
  0xdb   :  { %1456 = vmatpush2.bf16.msra.mxu0 %v1431_v26  ;;  %v2094_v26 = vstv %s5553_s13  ;;  %s5624_s13 = sld [smem:[#allocation2 + $0x585]] }
  0xdc   :  { %1457 = vmatprep.subr.bf16.mxu0 %v4546_v1  ;;  %v2095_v57 = vmul.f32 %v5632_v55, %v2094_v26 }
  0xdd   :  { %1646 = vmatpush1.bf16.msra.mxu1 %v4341_v51  ;;  %v5619_v51 = vld [vmem:[%s6336_s2 + $0x8] sm:$0xf] }
  0xde   :  { %1647 = vmatprep.subr.bf16.mxu1 %v4546_v1  ;;  %v2283_v52 = vmul.f32 %v5619_v51, %v2282_v41  ;;  %v4369_v41 = vld [vmem:[%s6337_s3 + $0x384] sm:$0xff]  }
  0xdf   :  { %1458 = vmatpush2.bf16.msra.mxu0 %v4346_v5  ;;  %v2092_v5 = vadd.f32 %v2091_v45, %v2088_v42  ;;  %v4371_v45 = vld [vmem:[%s6337_s3 + $0x3e4] ss:$0 sps:$4 sm:$0x33]  }
  0xe0   :  { %1459 = vmatprep.subr.bf16.mxu0 %v4546_v1  ;;  %v2284_v62 = vadd.f32 %v2283_v52, %v2280_v48 }
  0xe1   :  { %1648 = vmatpush1.bf16.msra.mxu1 %v4343_v58  ;;  %v2098_v58 = vstv %s5578_s18  ;;  %v2096_v21 = vadd.f32 %v2095_v57, %v2092_v5  ;;  %v2310_v57 = vstv %s5715_s25  ;;  %s5782_s25 = sld [smem:[#allocation2 + $0x604]] }
  0xe2   :  { %1655 = vmatprep.subr.bf16.mxu1 %v4546_v1  ;;  %s5862_s18 = sld [smem:[#allocation2 + $0x686]] }
  0xe3   :  { %1460 = vmatpush2.bf16.msra.mxu0 %v4348_v50  ;;  %v2290_v50 = vstv %s5597_s28 }
  0xe4   :  { %1461 = vmatprep.subr.bf16.mxu0 %v4546_v1  ;;  %v2291_v10 = vmul.f32 %v5605_v44, %v2290_v50 }
  0xe5   :  { %1656 = vmatpush2.bf16.msra.mxu1 %v1631_v4  ;;  %v5653_v4 = vld [vmem:[%s6336_s2 + $0x18] sm:$0xf] }
  0xe6   :  { %1657 = vmatprep.subr.bf16.mxu1 %v4546_v1  ;;  %v2299_v9 = vmul.f32 %v5653_v4, %v2298_v19  ;;  %v2482_v19 = vstv %s5747_s11  ;;  %s5892_s11 = sld [smem:[#allocation2 + $0x688]] }
  0xe7   :  { %1462 = vmatpush2.bf16.msra.mxu0 %v4350_v63  ;;  %v2099_v63 = vmul.f32 %v5653_v4, %v2098_v58  ;;  %v4376_v58 = vld [vmem:[%s6337_s3 + $0x368] sm:$0xff]  }
  0xe8   :  { %1463 = vmatprep.subr.bf16.mxu0 %v4546_v1 }
  0xe9   :  { %1658 = vmatpush2.bf16.msra.mxu1 %v4347_v7  ;;  %v4361_v7 = vld [vmem:[%s6337_s3 + $0x3a4] sm:$0xff]   ;;  %v2100_v12 = vadd.f32 %v2099_v63, %v2096_v21 }
  0xea   :  { %1659 = vmatprep.subr.bf16.mxu1 %v4546_v1 }
  0xeb   :  { %1464 = vmatpush2.bf16.msra.mxu0 %v4352_v22  ;;  %v2288_v22 = vadd.f32 %v2287_v0, %v2284_v62  ;;  %v4373_v0 = vld [vmem:[%s6337_s3 + $0x3dc] sm:$0xff]  }
  0xec   :  { %1833 = vmatprep.subr.bf16.mxu0 %v4546_v1 }
  0xed   :  { %1660 = vmatpush2.bf16.msra.mxu1 %v4349_v11  ;;  %v2294_v11 = vstv %s5624_s13  ;;  %s5829_s13 = sld [smem:[#allocation2 + $0x684]] }
  0xee   :  { %1661 = vmatprep.subr.bf16.mxu1 %v4546_v1  ;;  %1466 = vmatmul.mubr.bf16.vlgmr.msra.gmra.mxu0 %v1324_v15  ;;  %v2103_v15 = vmul.f32 %v5672_v14, %v2102_v6  ;;  %v2295_v2 = vmul.f32 %v5632_v55, %v2294_v11  ;;  %v2475_v6 = vstv %s5732_s10  ;;  %s5810_s10 = sld [smem:[#allocation2 + $0x683]] }
  0xef   :  { %1834 = vmatpush1.bf16.msra.mxu0 %v4354_v16  ;;  %3858 = vmatprep.mubr.msk.bf16.mxu0 %vm305_vm1, %v1725_v18  ;;  %v2106_v16 = vstv %s5637_s15  ;;  %v2292_v18 = vadd.f32 %v2291_v10, %v2288_v22  ;;  %v4375_v10 = vld [vmem:[%s6337_s3 + $0x3d4] sm:$0xff]  }
  0xf0   :  { %1835 = vmatprep.subr.bf16.mxu0 %v4546_v1  ;;  %v2107_v56 = vmul.f32 %v5693_v36, %v2106_v16 }
  0xf1   :  { %1662 = vmatpush2.bf16.msra.mxu1 %v4351_v17  ;;  %v4363_v17 = vld [vmem:[%s6337_s3 + $0x39c] sm:$0xff]   ;;  %v2296_v30 = vadd.f32 %v2295_v2, %v2292_v18 }
  0xf2   :  { %1663 = vmatprep.subr.bf16.mxu1 %v4546_v1 }
  0xf3   :  { %1836 = vmatpush1.bf16.msra.mxu0 %v4356_v23  ;;  %v2104_v23 = vadd.f32 %v2103_v15, %v2100_v12  ;;  %v2300_v37 = vadd.f32 %v2299_v9, %v2296_v30  ;;  %v1724_v12 = vpack.c.bf16 %v5508_v8, %v5508_v8  ;;  %v4380_v15 = vld [vmem:[%s6337_s3 + $0x420] sm:$0xff]   ;;  %v4377_v8 = vld [vmem:[%s6337_s3 + $0x3cc] sm:$0xff]   ;;  %v2486_v30 = vstv %s5761_s16  ;;  %s5837_s16 = sld [smem:[#allocation2 + $0x607]] }
  0xf4   :  { %1837 = vmatprep.subr.bf16.mxu0 %v4546_v1  ;;  %v4379_v9 = vld [vmem:[%s6337_s3 + $0x3c4] sm:$0xff]  }
  0xf5   :  { %1664 = vmatpush2.bf16.msra.mxu1 %v4353_v27  ;;  %v4365_v27 = vld [vmem:[%s6337_s3 + $0x394] sm:$0xff]  }
  0xf6   :  { %2033 = vmatprep.subr.bf16.mxu1 %v4546_v1 }
  0xf7   :  { %1838 = vmatpush1.bf16.msra.mxu0 %v4358_v60  ;;  %v2108_v60 = vadd.f32 %v2107_v56, %v2104_v23  ;;  %v4382_v56 = vld [vmem:[%s6337_s3 + $0x418] sm:$0xff]  }
  0xf8   :  { %1666 = vmatmul.mubr.bf16.vlgmr.msra.gmra.mxu1 %v1524_v43  ;;  %1839 = vmatprep.subr.bf16.mxu0 %v4546_v1  ;;  %v4367_v43 = vld [vmem:[%s6337_s3 + $0x38c] sm:$0xff]  }
  0xf9   :  { %2034 = vmatpush1.bf16.msra.mxu1 %v4355_v38  ;;  %3907 = vmatprep.mubr.msk.bf16.mxu1 %vm305_vm1, %v1925_v47  ;;  %v2303_v38 = vmul.f32 %v5672_v14, %v2302_v35  ;;  %v2306_v47 = vstv %s5685_s14  ;;  %v2111_v34 = vadd.f32 %v2110_v33, %v2108_v60  ;;  %v2675_v60 = vstv %s5768_s17  ;;  %v4384_v33 = vld [vmem:[%s6337_s3 + $0x410] sm:$0xff]   ;;  %s5846_s17 = sld [smem:[#allocation2 + $0x685]] }
  0xfa   :  { %2035 = vmatprep.subr.bf16.mxu1 %v4546_v1  ;;  %v2307_v42 = vmul.f32 %v5693_v36, %v2306_v47  ;;  %v2490_v47 = vstv %s5782_s25  ;;  %s5994_s25 = sld [smem:[#allocation2 + $0x782]] }
  0xfb   :  { %1840 = vmatpush1.bf16.msra.mxu0 %v4360_v49  ;;  %v2304_v49 = vadd.f32 %v2303_v38, %v2300_v37  ;;  %v2112_v48 = vmax.f32 %v2111_v34, 0.0  ;;  %v2487_v37 = vmul.f32 %v5571_v32, %v2486_v30  ;;  %v1924_v38 = vpack.c.bf16 %v5541_v20, %v5541_v20  ;;  %v4386_v20 = vld [vmem:[%s6337_s3 + $0x408] sm:$0xff]  }
  0xfc   :  { %1841 = vmatprep.subr.bf16.mxu0 %v4546_v1 }
  0xfd   :  { %2036 = vmatpush1.bf16.msra.mxu1 %v4357_v46  ;;  %v4374_v46 = vld [vmem:[%s6337_s3 + $0x370] sm:$0xff]   ;;  %v2308_v53 = vadd.f32 %v2307_v42, %v2304_v49  ;;  %v2682_v42 = vstv %s5791_s26  ;;  %s6003_s26 = sld [smem:[#allocation2 + $0x705]] }
  0xfe   :  { %2037 = vmatprep.subr.bf16.mxu1 %v4546_v1 }
  0xff   :  { %1842 = vmatpush1.bf16.msra.mxu0 %v4362_v54  ;;  %v2031_v54 = vsel %vm309_vm0, %v4371_v45, 0  ;;  %v2311_v50 = vadd.f32 %v2310_v57, %v2308_v53  ;;  %v2683_v53 = vmul.f32 %v5619_v51, %v2682_v42 }
 0x100   :  { %1843 = vmatprep.subr.bf16.mxu0 %v4546_v1 }
 0x101   :  { %2038 = vmatpush1.bf16.msra.mxu1 %v4359_v61  ;;  %v5744_v61 = vrot.slane %v2112_v48, %v4815_v29  ;;  %v2312_v11 = vmax.f32 %v2311_v50, 0.0  ;;  %v4383_v48 = vld [vmem:[%s6337_s3 + $0x47c] sm:$0xff]  }
 0x102   :  { %2039 = vmatprep.subr.bf16.mxu1 %v4546_v1 }
 0x103   :  { %1844 = vmatpush1.bf16.msra.mxu0 %v4364_v3  ;;  %v4378_v3 = vld [vmem:[%s6337_s3 + $0x360] sm:$0xff]   ;;  %v2121_v21 = vcombine.high %v5744_v61, %v5744_v61 }
 0x104   :  { %1845 = vmatprep.subr.bf16.mxu0 %v4546_v1 }
 0x105   :  { %2040 = vmatpush1.bf16.msra.mxu1 %v4361_v7  ;;  %v2478_v7 = vstv %s5735_s30  ;;  %v2125_v16 = vpack.c.bf16 %v2121_v21, %v2121_v21  ;;  %v2690_v21 = vstv %s5829_s13  ;;  %s5884_s30 = sld [smem:[#allocation5 + $0xc]] }
 0x106   :  { %2041 = vmatprep.subr.bf16.mxu1 %v4546_v1  ;;  %v2479_v18 = vmul.f32 %v5592_v40, %v2478_v7  ;;  %s5964_s13 = sld [smem:[#allocation2 + $0x703]] }
 0x107   :  { %1846 = vmatpush1.bf16.msra.mxu0 %v4366_v24 }
 0x108   :  { %1847 = vmatprep.subr.bf16.mxu0 %v4546_v1 }
 0x109   :  { %2042 = vmatpush1.bf16.msra.mxu1 %v4363_v17  ;;  %v2476_v17 = vmul.f32 %v5586_v13, %v2475_v6 }
 0x10a   :  { %2043 = vmatprep.subr.bf16.mxu1 %v4546_v1 }
 0x10b   :  { %1848 = vmatpush1.bf16.msra.mxu0 %v4368_v28  ;;  %v5788_v28 = vrot.slane %v2312_v11, %v4815_v29  ;;  %v2480_v25 = vadd.f32 %v2479_v18, %v2476_v17  ;;  %v4387_v11 = vld [vmem:[%s6337_s3 + $0x46c] sm:$0xff]  }
 0x10c   :  { %1855 = vmatprep.subr.bf16.mxu0 %v4546_v1 }
 0x10d   :  { %2044 = vmatpush1.bf16.msra.mxu1 %v4365_v27  ;;  %v2483_v27 = vmul.f32 %v5619_v51, %v2482_v19  ;;  %v2321_v35 = vcombine.high %v5788_v28, %v5788_v28  ;;  %v4389_v19 = vld [vmem:[%s6337_s3 + $0x464] sm:$0xff]  }
 0x10e   :  { %2045 = vmatprep.subr.bf16.mxu1 %v4546_v1 }
 0x10f   :  { %1856 = vmatpush2.bf16.msra.mxu0 %v1831_v31  ;;  %v2678_v31 = vstv %s5773_s20  ;;  %v2325_v34 = vpack.c.bf16 %v2321_v35, %v2321_v35  ;;  %v4391_v35 = vld [vmem:[%s6337_s3 + $0x45c] sm:$0xff]   ;;  %s5917_s20 = sld [smem:[#allocation5 + $0xd]] }
 0x110   :  { %1857 = vmatprep.subr.bf16.mxu0 %v4546_v1  ;;  %v2679_v49 = vmul.f32 %v5592_v40, %v2678_v31 }
 0x111   :  { %2046 = vmatpush1.bf16.msra.mxu1 %v4367_v43  ;;  %v2484_v43 = vadd.f32 %v2483_v27, %v2480_v25  ;;  %v4394_v25 = vld [vmem:[%s6337_s3 + $0x3e8] sm:$0xff]  }
 0x112   :  { %2047 = vmatprep.subr.bf16.mxu1 %v4546_v1  ;;  %v347_v26 = vpop.f32.mrf.mxu0 }
 0x113   :  { %1858 = vmatpush2.bf16.msra.mxu0 %v4372_v39  ;;  %v4381_v39 = vld [vmem:[%s6337_s3 + $0x484] sm:$0xff]   ;;  %v2488_v45 = vadd.f32 %v2487_v37, %v2484_v43 }
 0x114   :  { %v349_v52 = vpop.f32.mrf.mxu0  ;;  %1859 = vmatprep.subr.bf16.mxu0 %v4546_v1 }
 0x115   :  { %2048 = vmatpush1.bf16.msra.mxu1 %v4369_v41  ;;  %v2676_v41 = vmul.f32 %v5586_v13, %v2675_v60 }
 0x116   :  { %2055 = vmatprep.subr.bf16.mxu1 %v4546_v1  ;;  %v350_v5 = vpop.f32.mrf.mxu0 }
 0x117   :  { %1860 = vmatpush2.bf16.msra.mxu0 %v4374_v46  ;;  %v2494_v46 = vstv %s5800_s24  ;;  %v2680_v52 = vadd.f32 %v2679_v49, %v2676_v41  ;;  %v4388_v5 = vld [vmem:[%s6337_s3 + $0x400] sm:$0xff]   ;;  %v2706_v41 = vstv %s5892_s11  ;;  %s5935_s24 = sld [smem:[#allocation2 + $0x700]] }
 0x118   :  { %v351_v62 = vpop.f32.mrf.mxu0  ;;  %1861 = vmatprep.subr.bf16.mxu0 %v4546_v1  ;;  %v4398_v49 = vld [vmem:[%s6337_s3 + $0x440] sm:$0xff]  }
 0x119   :  { %2056 = vmatpush2.bf16.msra.mxu1 %v2031_v54  ;;  %v2686_v54 = vstv %s5810_s10  ;;  %v2498_v62 = vstv %s5820_s9  ;;  %v2684_v50 = vadd.f32 %v2683_v53, %v2680_v52  ;;  %v4400_v53 = vld [vmem:[%s6337_s3 + $0x438] sm:$0xff]   ;;  %s6023_s10 = sld [smem:[#allocation2 + $0x706]] }
 0x11a   :  { %2057 = vmatprep.subr.bf16.mxu1 %v4546_v1  ;;  %v2499_v7 = vmul.f32 %v5653_v4, %v2498_v62  ;;  %v2710_v62 = vstv %s5917_s20  ;;  %s5985_s20 = sld [smem:[#allocation2 + $0x704]] }
 0x11b   :  { %1862 = vmatpush2.bf16.msra.mxu0 %v4376_v58  ;;  %v2495_v58 = vmul.f32 %v5632_v55, %v2494_v46  ;;  %v4397_v46 = vld [vmem:[%s6337_s3 + $0x4ac] ss:$0 sps:$4 sm:$0x33]   ;;  %s6032_s9 = sld [smem:[#allocation2 + $0x784]] }
 0x11c   :  { %v468_v63 = vpop.f32.mrf.mxu1  ;;  %1863 = vmatprep.subr.bf16.mxu0 %v4546_v1 }
 0x11d   :  { %v5763_v22 = vadd.f32 %v468_v63, %v347_v26  ;;  %2058 = vmatpush2.bf16.msra.mxu1 %v4373_v0  ;;  %v2491_v26 = vmul.f32 %v5605_v44, %v2490_v47  ;;  %v4385_v0 = vld [vmem:[%s6337_s3 + $0x474] sm:$0xff]  }
 0x11e   :  { %v470_v24 = vpop.f32.mrf.mxu1  ;;  %2059 = vmatprep.subr.bf16.mxu1 %v4546_v1  ;;  %v4390_v63 = vld [vmem:[%s6337_s3 + $0x3f8] sm:$0xff]  }
 0x11f   :  { %1864 = vmatpush2.bf16.msra.mxu0 %v4378_v3  ;;  %v2492_v57 = vadd.f32 %v2491_v26, %v2488_v45  ;;  %v2687_v3 = vmul.f32 %v5571_v32, %v2686_v54  ;;  %v4393_v47 = vld [vmem:[%s6337_s3 + $0x454] sm:$0xff]   ;;  %v2707_v26 = vmul.f32 %v5693_v36, %v2706_v41  ;;  %v2324_v41 = vpack.c.bf16 %v5788_v28, %v5788_v28 }
 0x120   :  { %v471_v2 = vpop.f32.mrf.mxu1  ;;  %2233 = vmatprep.subr.bf16.mxu0 %v4546_v1  ;;  %v4412_v28 = vld [vmem:[%s6337_s3 + $0x4d0] sm:$0xff]  }
 0x121   :  { %2060 = vmatpush2.bf16.msra.mxu1 %v4375_v10  ;;  %v2496_v6 = vadd.f32 %v2495_v58, %v2492_v57  ;;  %v2502_v10 = vstv %s5837_s16  ;;  %v2688_v24 = vadd.f32 %v2687_v3, %v2684_v50  ;;  %v2506_v2 = vstv %s5854_s22  ;;  %s5971_s16 = sld [smem:[#allocation2 + $0x780]] }
 0x122   :  { %v472_v23 = vpop.f32.mrf.mxu1  ;;  %2061 = vmatprep.subr.bf16.mxu1 %v4546_v1  ;;  %1866 = vmatmul.mubr.bf16.vlgmr.msra.gmra.mxu0 %v1724_v12  ;;  %v2691_v12 = vmul.f32 %v5605_v44, %v2690_v21  ;;  %v2503_v18 = vmul.f32 %v5672_v14, %v2502_v10  ;;  %v2507_v30 = vmul.f32 %v5693_v36, %v2506_v2  ;;  %v2431_v58 = vsel %vm309_vm0, %v4397_v46, 0  ;;  %v4399_v21 = vld [vmem:[%s6337_s3 + $0x4a4] sm:$0xff]   ;;  %s6065_s22 = sld [smem:[#allocation2 + $0x786]] }
 0x123   :  { %2234 = vmatpush1.bf16.msra.mxu0 %v4380_v15  ;;  %3956 = vmatprep.mubr.msk.bf16.mxu0 %vm305_vm1, %v2125_v16  ;;  %v2694_v15 = vstv %s5846_s17  ;;  %v4392_v16 = vld [vmem:[%s6337_s3 + $0x3f0] sm:$0xff]   ;;  %v2500_v17 = vadd.f32 %v2499_v7, %v2496_v6  ;;  %v4404_v6 = vld [vmem:[%s6337_s3 + $0x428] sm:$0xff]   ;;  %v3082_v46 = vstv %s5994_s25  ;;  %s6057_s17 = sld [smem:[#allocation2 + $0x708]] }
 0x124   :  { %2235 = vmatprep.subr.bf16.mxu0 %v4546_v1  ;;  %v2695_v23 = vmul.f32 %v5632_v55, %v2694_v15  ;;  %v4401_v15 = vld [vmem:[%s6337_s3 + $0x49c] sm:$0xff]   ;;  %v4406_v2 = vld [vmem:[%s6337_s3 + $0x4e8] sm:$0xff]  }
 0x125   :  { %2062 = vmatpush2.bf16.msra.mxu1 %v4377_v8  ;;  %v2692_v8 = vadd.f32 %v2691_v12, %v2688_v24  ;;  %v2504_v27 = vadd.f32 %v2503_v18, %v2500_v17  ;;  %v2124_v18 = vpack.c.bf16 %v5744_v61, %v5744_v61  ;;  %v4403_v61 = vld [vmem:[%s6337_s3 + $0x494] sm:$0xff]  }
 0x126   :  { %2063 = vmatprep.subr.bf16.mxu1 %v4546_v1 }
 0x127   :  { %2236 = vmatpush1.bf16.msra.mxu0 %v4382_v56  ;;  %v2698_v56 = vstv %s5862_s18  ;;  %v2696_v60 = vadd.f32 %v2695_v23, %v2692_v8  ;;  %v2508_v43 = vadd.f32 %v2507_v30, %v2504_v27 }
 0x128   :  { %2237 = vmatprep.subr.bf16.mxu0 %v4546_v1  ;;  %v2699_v31 = vmul.f32 %v5653_v4, %v2698_v56 }
 0x129   :  { %2064 = vmatpush2.bf16.msra.mxu1 %v4379_v9  ;;  %v4396_v9 = vld [vmem:[%s6337_s3 + $0x448] ss:$0 sps:$4 sm:$0x33]  }
 0x12a   :  { %2433 = vmatprep.subr.bf16.mxu1 %v4546_v1  ;;  %v2231_v37 = vsel %vm309_vm0, %v4396_v9, 0  ;;  %v4408_v9 = vld [vmem:[%s6337_s3 + $0x4e0] sm:$0xff]  }
 0x12b   :  { %2238 = vmatpush1.bf16.msra.mxu0 %v4384_v33  ;;  %v2702_v33 = vstv %s5876_s29  ;;  %s5938_s29 = sld [smem:[#allocation2 + $0x701]] }
 0x12c   :  { %2066 = vmatmul.mubr.bf16.vlgmr.msra.gmra.mxu1 %v1924_v38  ;;  %2239 = vmatprep.subr.bf16.mxu0 %v4546_v1  ;;  %v2510_v38 = vstv %s5884_s30  ;;  %s5950_s30 = sld [smem:[#allocation2 + $0x702]] }
 0x12d   :  { %2434 = vmatpush1.bf16.msra.mxu1 %v4381_v39  ;;  %4005 = vmatprep.mubr.msk.bf16.mxu1 %vm305_vm1, %v2325_v34  ;;  %v2700_v39 = vadd.f32 %v2699_v31, %v2696_v60  ;;  %v2703_v34 = vmul.f32 %v5672_v14, %v2702_v33  ;;  %v2511_v42 = vadd.f32 %v2510_v38, %v2508_v43  ;;  %v2886_v31 = vstv %s5964_s13  ;;  %v4405_v33 = vld [vmem:[%s6337_s3 + $0x48c] sm:$0xff]   ;;  %s6040_s13 = sld [smem:[#allocation2 + $0x707]] }
 0x12e   :  { %2435 = vmatprep.subr.bf16.mxu1 %v4546_v1  ;;  %v3078_v38 = vstv %s5976_s1  ;;  %s6120_s1 = sld [smem:[#allocation5 + $0xf]] }
 0x12f   :  { %2240 = vmatpush1.bf16.msra.mxu0 %v4386_v20  ;;  %v4395_v20 = vld [vmem:[%s6337_s3 + $0x44c] sm:$0xff]   ;;  %v2704_v45 = vadd.f32 %v2703_v34, %v2700_v39  ;;  %v2512_v54 = vmax.f32 %v2511_v42, 0.0  ;;  %v2887_v34 = vmul.f32 %v5571_v32, %v2886_v31 }
 0x130   :  { %2241 = vmatprep.subr.bf16.mxu0 %v4546_v1  ;;  %v4407_v42 = vld [vmem:[%s6337_s3 + $0x54c] sm:$0xff]  }
 0x131   :  { %2436 = vmatpush1.bf16.msra.mxu1 %v4383_v48  ;;  %v2708_v57 = vadd.f32 %v2707_v26, %v2704_v45  ;;  %v5947_v50 = vrot.slane %v2512_v54, %v4815_v29  ;;  %v2878_v24 = vstv %s5938_s29  ;;  %v3079_v26 = vmul.f32 %v5592_v40, %v3078_v38  ;;  %s6087_s29 = sld [smem:[#allocation5 + $0xe]] }
 0x132   :  { %2437 = vmatprep.subr.bf16.mxu1 %v4546_v1  ;;  %v2879_v23 = vmul.f32 %v5592_v40, %v2878_v24  ;;  %v4409_v40 = vld [vmem:[%s6337_s3 + $0x544] sm:$0xff]   ;;  %v3083_v54 = vmul.f32 %v5619_v51, %v3082_v46 }
 0x133   :  { %2242 = vmatpush1.bf16.msra.mxu0 %v4388_v5  ;;  %v2521_v7 = vcombine.high %v5947_v50, %v5947_v50 }
 0x134   :  { %2243 = vmatprep.subr.bf16.mxu0 %v4546_v1 }
 0x135   :  { %2438 = vmatpush1.bf16.msra.mxu1 %v4385_v0  ;;  %v4402_v0 = vld [vmem:[%s6337_s3 + $0x430] sm:$0xff]  }
 0x136   :  { %2439 = vmatprep.subr.bf16.mxu1 %v4546_v1 }
 0x137   :  { %2244 = vmatpush1.bf16.msra.mxu0 %v4390_v63  ;;  %v2711_v63 = vadd.f32 %v2710_v62, %v2708_v57  ;;  %v4414_v57 = vld [vmem:[%s6337_s3 + $0x4c8] sm:$0xff]   ;;  %v2898_v62 = vstv %s6023_s10 }
 0x138   :  { %2245 = vmatprep.subr.bf16.mxu0 %v4546_v1 }
 0x139   :  { %2440 = vmatpush1.bf16.msra.mxu1 %v4387_v11  ;;  %v2875_v11 = vstv %s5935_s24  ;;  %s6013_s24 = sld [smem:[#allocation2 + $0x783]] }
 0x13a   :  { %2441 = vmatprep.subr.bf16.mxu1 %v4546_v1  ;;  %v2876_v8 = vmul.f32 %v5586_v13, %v2875_v11 }
 0x13b   :  { %2246 = vmatpush1.bf16.msra.mxu0 %v4392_v16  ;;  %v2712_v16 = vmax.f32 %v2711_v63, 0.0  ;;  %v4416_v63 = vld [vmem:[%s6337_s3 + $0x4c0] sm:$0xff]  }
 0x13c   :  { %2247 = vmatprep.subr.bf16.mxu0 %v4546_v1 }
 0x13d   :  { %2442 = vmatpush1.bf16.msra.mxu1 %v4389_v19  ;;  %v2525_v19 = vpack.c.bf16 %v2521_v7, %v2521_v7  ;;  %v5991_v27 = vrot.slane %v2712_v16, %v4815_v29  ;;  %v2899_v7 = vmul.f32 %v5653_v4, %v2898_v62  ;;  %v4418_v16 = vld [vmem:[%s6337_s3 + $0x4b8] sm:$0xff]  }
 0x13e   :  { %2443 = vmatprep.subr.bf16.mxu1 %v4546_v1 }
 0x13f   :  { %2248 = vmatpush1.bf16.msra.mxu0 %v4394_v25  ;;  %v2882_v25 = vstv %s5950_s30  ;;  %v2721_v43 = vcombine.high %v5991_v27, %v5991_v27  ;;  %s6095_s30 = sld [smem:[#allocation2 + $0x788]] }
 0x140   :  { %2255 = vmatprep.subr.bf16.mxu0 %v4546_v1  ;;  %v2883_v60 = vmul.f32 %v5619_v51, %v2882_v25  ;;  %v4411_v51 = vld [vmem:[%s6337_s3 + $0x53c] sm:$0xff]  }
 0x141   :  { %2444 = vmatpush1.bf16.msra.mxu1 %v4391_v35  ;;  %v2880_v35 = vadd.f32 %v2879_v23, %v2876_v8  ;;  %v3098_v23 = vstv %s6065_s22 }
 0x142   :  { %2445 = vmatprep.subr.bf16.mxu1 %v4546_v1 }
 0x143   :  { %2256 = vmatpush2.bf16.msra.mxu0 %v2231_v37  ;;  %v3075_v37 = vstv %s5971_s16  ;;  %v2884_v39 = vadd.f32 %v2883_v60, %v2880_v35  ;;  %s6049_s16 = sld [smem:[#allocation2 + $0x785]]  ;;  %v3099_v35 = vmul.f32 %v5653_v4, %v3098_v23  ;;  %v3102_v60 = vstv %s6079_s21  ;;  %v4439_v23 = vld [vmem:[%s6337_s3 + $0x5fc] sm:$0xff]  }
 0x144   :  { %2257 = vmatprep.subr.bf16.mxu0 %v4546_v1  ;;  %v3076_v45 = vmul.f32 %v5586_v13, %v3075_v37  ;;  %v2894_v13 = vstv %s6003_s26  ;;  %v4419_v37 = vld [vmem:[%s6337_s3 + $0x51c] sm:$0xff]  }
 0x145   :  { %2446 = vmatpush1.bf16.msra.mxu1 %v4393_v47  ;;  %v4410_v47 = vld [vmem:[%s6337_s3 + $0x4d8] sm:$0xff]   ;;  %v3106_v4 = vstv %s6095_s30 }
 0x146   :  { %2447 = vmatprep.subr.bf16.mxu1 %v4546_v1  ;;  %v667_v48 = vpop.f32.mrf.mxu0 }
 0x147   :  { %v673_v52 = vadd.f32 %v667_v48, %v5763_v22  ;;  %2258 = vmatpush2.bf16.msra.mxu0 %v4398_v49  ;;  %v2890_v49 = vstv %s5985_s20  ;;  %v2888_v48 = vadd.f32 %v2887_v34, %v2884_v39  ;;  %v4424_v39 = vld [vmem:[%s6337_s3 + $0x508] sm:$0xff]  }
 0x148   :  { %v669_v5 = vpop.f32.mrf.mxu0  ;;  %2259 = vmatprep.subr.bf16.mxu0 %v4546_v1 }
 0x149   :  { %2448 = vmatpush1.bf16.msra.mxu1 %v4395_v20  ;;  %v2725_v20 = vpack.c.bf16 %v2721_v43, %v2721_v43  ;;  %v3086_v5 = vstv %s6013_s24  ;;  %v2910_v43 = vstv %s6087_s29 }
 0x14a   :  { %2455 = vmatprep.subr.bf16.mxu1 %v4546_v1  ;;  %v670_v22 = vpop.f32.mrf.mxu0 }
 0x14b   :  { %2260 = vmatpush2.bf16.msra.mxu0 %v4400_v53  ;;  %v3080_v53 = vadd.f32 %v3079_v26, %v3076_v45  ;;  %v2895_v22 = vmul.f32 %v5632_v55, %v2894_v13  ;;  %v4426_v26 = vld [vmem:[%s6337_s3 + $0x500] sm:$0xff]   ;;  %v3110_v13 = vstv %s6120_s1 }
 0x14c   :  { %v671_v3 = vpop.f32.mrf.mxu0  ;;  %2261 = vmatprep.subr.bf16.mxu0 %v4546_v1 }
 0x14d   :  { %2456 = vmatpush2.bf16.msra.mxu1 %v2431_v58  ;;  %v3087_v3 = vmul.f32 %v5571_v32, %v3086_v5  ;;  %v4413_v32 = vld [vmem:[%s6337_s3 + $0x534] sm:$0xff]  }
 0x14e   :  { %2457 = vmatprep.subr.bf16.mxu1 %v4546_v1 }
 0x14f   :  { %2262 = vmatpush2.bf16.msra.mxu0 %v4402_v0  ;;  %v3084_v0 = vadd.f32 %v3083_v54, %v3080_v53  ;;  %v4425_v54 = vld [vmem:[%s6337_s3 + $0x56c] sm:$0xff]  }
 0x150   :  { %v867_v10 = vpop.f32.mrf.mxu1  ;;  %2263 = vmatprep.subr.bf16.mxu0 %v4546_v1 }
 0x151   :  { %v5966_v12 = vadd.f32 %v867_v10, %v673_v52  ;;  %2458 = vmatpush2.bf16.msra.mxu1 %v4399_v21  ;;  %v2891_v52 = vmul.f32 %v5605_v44, %v2890_v49  ;;  %v3090_v21 = vstv %s6032_s9  ;;  %v2902_v10 = vstv %s6040_s13 }
 0x152   :  { %v869_v17 = vpop.f32.mrf.mxu1  ;;  %2459 = vmatprep.subr.bf16.mxu1 %v4546_v1  ;;  %v3088_v11 = vadd.f32 %v3087_v3, %v3084_v0  ;;  %v3091_v24 = vmul.f32 %v5605_v44, %v3090_v21  ;;  %v4415_v44 = vld [vmem:[%s6337_s3 + $0x52c] sm:$0xff]   ;;  %v2524_v21 = vpack.c.bf16 %v5947_v50, %v5947_v50 }
 0x153   :  { %2264 = vmatpush2.bf16.msra.mxu0 %v4404_v6  ;;  %v2892_v58 = vadd.f32 %v2891_v52, %v2888_v48  ;;  %v4434_v50 = vld [vmem:[%s6337_s3 + $0x5a8] sm:$0xff]  }
 0x154   :  { %v870_v56 = vpop.f32.mrf.mxu1  ;;  %2633 = vmatprep.subr.bf16.mxu0 %v4546_v1 }
 0x155   :  { %2460 = vmatpush2.bf16.msra.mxu1 %v4401_v15  ;;  %v2896_v6 = vadd.f32 %v2895_v22, %v2892_v58  ;;  %v3094_v15 = vstv %s6049_s16  ;;  %v4420_v56 = vld [vmem:[%s6337_s3 + $0x4b0] sm:$0xff]  }
 0x156   :  { %v871_v30 = vpop.f32.mrf.mxu1  ;;  %2461 = vmatprep.subr.bf16.mxu1 %v4546_v1  ;;  %2266 = vmatmul.mubr.bf16.vlgmr.msra.gmra.mxu0 %v2124_v18  ;;  %v2903_v18 = vmul.f32 %v5672_v14, %v2902_v10  ;;  %v3095_v8 = vmul.f32 %v5632_v55, %v3094_v15  ;;  %v4422_v55 = vld [vmem:[%s6337_s3 + $0x510] ss:$0 sps:$4 sm:$0x33]   ;;  %v4429_v10 = vld [vmem:[%s6337_s3 + $0x55c] sm:$0xff]  }
 0x157   :  { %2634 = vmatpush1.bf16.msra.mxu0 %v4406_v2  ;;  %4054 = vmatprep.mubr.msk.bf16.mxu0 %vm305_vm1, %v2525_v19  ;;  %v2900_v17 = vadd.f32 %v2899_v7, %v2896_v6  ;;  %v2906_v2 = vstv %s6057_s17  ;;  %v3092_v19 = vadd.f32 %v3091_v24, %v3088_v11  ;;  %v4417_v30 = vld [vmem:[%s6337_s3 + $0x524] sm:$0xff]   ;;  %v4431_v24 = vld [vmem:[%s6337_s3 + $0x554] sm:$0xff]  }
 0x158   :  { %2635 = vmatprep.subr.bf16.mxu0 %v4546_v1  ;;  %v4436_v15 = vld [vmem:[%s6337_s3 + $0x5a0] sm:$0xff]  }
 0x159   :  { %2462 = vmatpush2.bf16.msra.mxu1 %v4403_v61  ;;  %v2904_v25 = vadd.f32 %v2903_v18, %v2900_v17  ;;  %v2907_v61 = vmul.f32 %v5693_v36, %v2906_v2  ;;  %v4433_v17 = vld [vmem:[%s6337_s3 + $0x614] sm:$0xff]  }
 0x15a   :  { %2463 = vmatprep.subr.bf16.mxu1 %v4546_v1  ;;  %v4438_v2 = vld [vmem:[%s6337_s3 + $0x598] sm:$0xff]  }
 0x15b   :  { %2636 = vmatpush1.bf16.msra.mxu0 %v4408_v9  ;;  %v3096_v9 = vadd.f32 %v3095_v8, %v3092_v19  ;;  %v2908_v31 = vadd.f32 %v2907_v61, %v2904_v25  ;;  %v4437_v19 = vld [vmem:[%s6337_s3 + $0x604] sm:$0xff]   ;;  %v4441_v25 = vld [vmem:[%s6337_s3 + $0x5f4] sm:$0xff]  }
 0x15c   :  { %2637 = vmatprep.subr.bf16.mxu0 %v4546_v1  ;;  %v4442_v8 = vld [vmem:[%s6337_s3 + $0x588] sm:$0xff]   ;;  %v4446_v61 = vld [vmem:[%s6337_s3 + $0x578] sm:$0xff]  }
 0x15d   :  { %2464 = vmatpush2.bf16.msra.mxu1 %v4405_v33  ;;  %v2631_v33 = vsel %vm309_vm0, %v4422_v55, 0  ;;  %v3100_v38 = vadd.f32 %v3099_v35, %v3096_v9  ;;  %v2911_v34 = vadd.f32 %v2910_v43, %v2908_v31  ;;  %v4448_v55 = vld [vmem:[%s6337_s3 + $0x5d8] ss:$0 sps:$4 sm:$0x33]   ;;  %v4445_v35 = vld [vmem:[%s6337_s3 + $0x5e4] sm:$0xff]   ;;  %v4447_v31 = vld [vmem:[%s6337_s3 + $0x5dc] sm:$0xff]  }
 0x15e   :  { %2833 = vmatprep.subr.bf16.mxu1 %v4546_v1  ;;  %v3031_v9 = vsel %vm309_vm0, %v4448_v55, 0 }
 0x15f   :  { %2638 = vmatpush1.bf16.msra.mxu0 %v4410_v47  ;;  %v3103_v47 = vmul.f32 %v5672_v14, %v3102_v60  ;;  %v3107_v14 = vmul.f32 %v5693_v36, %v3106_v4  ;;  %v2912_v46 = vmax.f32 %v2911_v34, 0.0  ;;  %v4450_v60 = vld [vmem:[%s6337_s3 + $0x5d0] sm:$0xff]   ;;  %v4454_v34 = vld [vmem:[%s6337_s3 + $0x5c0] sm:$0xff]  }
 0x160   :  { %2466 = vmatmul.mubr.bf16.vlgmr.msra.gmra.mxu1 %v2324_v41  ;;  %2639 = vmatprep.subr.bf16.mxu0 %v4546_v1  ;;  %v4421_v41 = vld [vmem:[%s6337_s3 + $0x514] sm:$0xff]  }
 0x161   :  { %2834 = vmatpush1.bf16.msra.mxu1 %v4407_v42  ;;  %4103 = vmatprep.mubr.msk.bf16.mxu1 %vm305_vm1, %v2725_v20  ;;  %v3104_v49 = vadd.f32 %v3103_v47, %v3100_v38  ;;  %v4423_v42 = vld [vmem:[%s6337_s3 + $0x574] ss:$0 sps:$4 sm:$0x33]   ;;  %v4452_v38 = vld [vmem:[%s6337_s3 + $0x5c8] sm:$0xff]  }
 0x162   :  { %2835 = vmatprep.subr.bf16.mxu1 %v4546_v1  ;;  %v2831_v48 = vsel %vm309_vm0, %v4423_v42, 0 }
 0x163   :  { %2640 = vmatpush1.bf16.msra.mxu0 %v4412_v28  ;;  %v3108_v36 = vadd.f32 %v3107_v14, %v3104_v49  ;;  %v4451_v49 = vld [vmem:[%s6337_s3 + $0x634] sm:$0xff]  }
 0x164   :  { %2641 = vmatprep.subr.bf16.mxu0 %v4546_v1  ;;  %v4456_v14 = vld [vmem:[%s6337_s3 + $0x5b8] sm:$0xff]  }
 0x165   :  { %2836 = vmatpush1.bf16.msra.mxu1 %v4409_v40  ;;  %v6146_v40 = vrot.slane %v2912_v46, %v4815_v29  ;;  %v3111_v5 = vadd.f32 %v3110_v13, %v3108_v36  ;;  %v4455_v36 = vld [vmem:[%s6337_s3 + $0x624] sm:$0xff]  }
 0x166   :  { %2837 = vmatprep.subr.bf16.mxu1 %v4546_v1 }
 0x167   :  { %2642 = vmatpush1.bf16.msra.mxu0 %v4414_v57  ;;  %v4430_v57 = vld [vmem:[%s6337_s3 + $0x4f0] sm:$0xff]   ;;  %v2921_v58 = vcombine.high %v6146_v40, %v6146_v40  ;;  %v3112_v0 = vmax.f32 %v3111_v5, 0.0  ;;  %v2924_v46 = vpack.c.bf16 %v6146_v40, %v6146_v40  ;;  %v4548_v40 = vmov 0.0  }
 0x168   :  { %2643 = vmatprep.subr.bf16.mxu0 %v4546_v1 }
 0x169   :  { %2838 = vmatpush1.bf16.msra.mxu1 %v4411_v51  ;;  %v4427_v51 = vld [vmem:[%s6337_s3 + $0x564] sm:$0xff]   ;;  %v2925_v6 = vpack.c.bf16 %v2921_v58, %v2921_v58 }
 0x16a   :  { %2839 = vmatprep.subr.bf16.mxu1 %v4546_v1  ;;  %v4461_v58 = vld [vmem:[%s6339_s5 + $0x20] sm:$0xff]  }
 0x16b   :  { %2644 = vmatpush1.bf16.msra.mxu0 %v4416_v63  ;;  %v4432_v63 = vld [vmem:[%s6337_s3 + $0x5b0] sm:$0xff]  }
 0x16c   :  { %2645 = vmatprep.subr.bf16.mxu0 %v4546_v1 }
 0x16d   :  { %2840 = vmatpush1.bf16.msra.mxu1 %v4413_v32  ;;  %v6175_v32 = vrot.slane %v3112_v0, %v4815_v29 }
 0x16e   :  { %2841 = vmatprep.subr.bf16.mxu1 %v4546_v1 }
 0x16f   :  { %2646 = vmatpush1.bf16.msra.mxu0 %v4418_v16  ;;  %v3121_v29 = vcombine.high %v6175_v32, %v6175_v32  ;;  %v2724_v16 = vpack.c.bf16 %v5991_v27, %v5991_v27  ;;  %v4435_v27 = vld [vmem:[%s6337_s3 + $0x60c] sm:$0xff]   ;;  %v3124_v13 = vpack.c.bf16 %v6175_v32, %v6175_v32  ;;  %v4465_v32 = vld [vmem:[%s6339_s5] sm:$0xff]  }
 0x170   :  { %2647 = vmatprep.subr.bf16.mxu0 %v4546_v1 }
 0x171   :  { %2842 = vmatpush1.bf16.msra.mxu1 %v4415_v44  ;;  %v3125_v18 = vpack.c.bf16 %v3121_v29, %v3121_v29  ;;  %v4440_v44 = vld [vmem:[%s6337_s3 + $0x590] sm:$0xff]  }
 0x172   :  { %2843 = vmatprep.subr.bf16.mxu1 %v4546_v1 }
 0x173   :  { %2648 = vmatpush1.bf16.msra.mxu0 %v4420_v56  ;;  %v4444_v56 = vld [vmem:[%s6337_s3 + $0x580] sm:$0xff]  }
 0x174   :  { %2655 = vmatprep.subr.bf16.mxu0 %v4546_v1 }
 0x175   :  { %2844 = vmatpush1.bf16.msra.mxu1 %v4417_v30  ;;  %v4443_v30 = vld [vmem:[%s6337_s3 + $0x5ec] sm:$0xff]  }
 0x176   :  { %2845 = vmatprep.subr.bf16.mxu1 %v4546_v1 }
 0x177   :  { %2656 = vmatpush2.bf16.msra.mxu0 %v2631_v33  ;;  %v4449_v33 = vld [vmem:[%s6337_s3 + $0x63c] ss:$0 sps:$4 sm:$0x33]  }
 0x178   :  { %2657 = vmatprep.subr.bf16.mxu0 %v4546_v1  ;;  %v3231_v4 = vsel %vm309_vm0, %v4449_v33, 0 }
 0x179   :  { %2846 = vmatpush1.bf16.msra.mxu1 %v4419_v37 }
 0x17a   :  { %2847 = vmatprep.subr.bf16.mxu1 %v4546_v1  ;;  %v1067_v20 = vpop.f32.mrf.mxu0 }
 0x17b   :  { %v1073_v45 = vadd.f32 %v1067_v20, %v5966_v12  ;;  %2658 = vmatpush2.bf16.msra.mxu0 %v4424_v39  ;;  %v4428_v12 = vld [vmem:[%s6337_s3 + $0x4f8] sm:$0xff]  }
 0x17c   :  { %v1069_v28 = vpop.f32.mrf.mxu0  ;;  %2659 = vmatprep.subr.bf16.mxu0 %v4546_v1 }
 0x17d   :  { %2848 = vmatpush1.bf16.msra.mxu1 %v4421_v41 }
 0x17e   :  { %2855 = vmatprep.subr.bf16.mxu1 %v4546_v1  ;;  %v1070_v52 = vpop.f32.mrf.mxu0 }
 0x17f   :  { %2660 = vmatpush2.bf16.msra.mxu0 %v4426_v26  ;;  %v4457_v52 = vld [vmem:[%s6337_s3 + $0x61c] sm:$0xff]  }
 0x180   :  { %v1071_v53 = vpop.f32.mrf.mxu0  ;;  %2661 = vmatprep.subr.bf16.mxu0 %v4546_v1 }
 0x181   :  { %2856 = vmatpush2.bf16.msra.mxu1 %v2831_v48  ;;  %v4459_v53 = vld [vmem:[%s6339_s5 + $0x30] sm:$0xff]  }
 0x182   :  { %2857 = vmatprep.subr.bf16.mxu1 %v4546_v1 }
 0x183   :  { %2662 = vmatpush2.bf16.msra.mxu0 %v4428_v12  ;;  %v4458_v12 = vld [vmem:[%s6339_s5 + $0x38] sm:$0xff]  }
 0x184   :  { %v1267_v22 = vpop.f32.mrf.mxu1  ;;  %2663 = vmatprep.subr.bf16.mxu0 %v4546_v1 }
 0x185   :  { %v6159_v62 = vadd.f32 %v1267_v22, %v1073_v45  ;;  %2858 = vmatpush2.bf16.msra.mxu1 %v4425_v54  ;;  %v4453_v45 = vld [vmem:[%s6337_s3 + $0x62c] sm:$0xff]  }
 0x186   :  { %v1269_v3 = vpop.f32.mrf.mxu1  ;;  %2859 = vmatprep.subr.bf16.mxu1 %v4546_v1 }
 0x187   :  { %2664 = vmatpush2.bf16.msra.mxu0 %v4430_v57 }
 0x188   :  { %v1270_v7 = vpop.f32.mrf.mxu1  ;;  %3033 = vmatprep.subr.bf16.mxu0 %v4546_v1 }
 0x189   :  { %2860 = vmatpush2.bf16.msra.mxu1 %v4427_v51  ;;  %v4462_v51 = vld [vmem:[%s6339_s5 + $0x18] sm:$0xff]   ;;  %v4463_v7 = vld [vmem:[%s6339_s5 + $0x10] sm:$0xff]  }
 0x18a   :  { %v1271_v11 = vpop.f32.mrf.mxu1  ;;  %2861 = vmatprep.subr.bf16.mxu1 %v4546_v1  ;;  %2666 = vmatmul.mubr.bf16.vlgmr.msra.gmra.mxu0 %v2524_v21 }
 0x18b   :  { %3034 = vmatpush1.bf16.msra.mxu0 %v4432_v63  ;;  %4152 = vmatprep.mubr.msk.bf16.mxu0 %vm305_vm1, %v2925_v6 }
 0x18c   :  { %3035 = vmatprep.subr.bf16.mxu0 %v4546_v1 }
 0x18d   :  { %2862 = vmatpush2.bf16.msra.mxu1 %v4429_v10  ;;  %v4464_v10 = vld [vmem:[%s6339_s5 + $0x8] sm:$0xff]  }
 0x18e   :  { %2863 = vmatprep.subr.bf16.mxu1 %v4546_v1 }
 0x18f   :  { %3036 = vmatpush1.bf16.msra.mxu0 %v4434_v50 }
 0x190   :  { %3037 = vmatprep.subr.bf16.mxu0 %v4546_v1 }
 0x191   :  { %2864 = vmatpush2.bf16.msra.mxu1 %v4431_v24 }
 0x192   :  { %3233 = vmatprep.subr.bf16.mxu1 %v4546_v1 }
 0x193   :  { %3038 = vmatpush1.bf16.msra.mxu0 %v4436_v15 }
 0x194   :  { %2866 = vmatmul.mubr.bf16.vlgmr.msra.gmra.mxu1 %v2724_v16  ;;  %3039 = vmatprep.subr.bf16.mxu0 %v4546_v1 }
 0x195   :  { %3234 = vmatpush1.bf16.msra.mxu1 %v4433_v17  ;;  %4201 = vmatprep.mubr.msk.bf16.mxu1 %vm305_vm1, %v3125_v18 }
 0x196   :  { %3235 = vmatprep.subr.bf16.mxu1 %v4546_v1 }
 0x197   :  { %3040 = vmatpush1.bf16.msra.mxu0 %v4438_v2 }
 0x198   :  { %3041 = vmatprep.subr.bf16.mxu0 %v4546_v1 }
 0x199   :  { %3236 = vmatpush1.bf16.msra.mxu1 %v4435_v27 }
 0x19a   :  { %3237 = vmatprep.subr.bf16.mxu1 %v4546_v1 }
 0x19b   :  { %3042 = vmatpush1.bf16.msra.mxu0 %v4440_v44 }
 0x19c   :  { %3043 = vmatprep.subr.bf16.mxu0 %v4546_v1 }
 0x19d   :  { %3238 = vmatpush1.bf16.msra.mxu1 %v4437_v19 }
 0x19e   :  { %3239 = vmatprep.subr.bf16.mxu1 %v4546_v1 }
 0x19f   :  { %3044 = vmatpush1.bf16.msra.mxu0 %v4442_v8 }
 0x1a0   :  { %3045 = vmatprep.subr.bf16.mxu0 %v4546_v1 }
 0x1a1   :  { %3240 = vmatpush1.bf16.msra.mxu1 %v4439_v23 }
 0x1a2   :  { %3241 = vmatprep.subr.bf16.mxu1 %v4546_v1 }
 0x1a3   :  { %3046 = vmatpush1.bf16.msra.mxu0 %v4444_v56 }
 0x1a4   :  { %3047 = vmatprep.subr.bf16.mxu0 %v4546_v1 }
 0x1a5   :  { %3242 = vmatpush1.bf16.msra.mxu1 %v4441_v25 }
 0x1a6   :  { %3243 = vmatprep.subr.bf16.mxu1 %v4546_v1 }
 0x1a7   :  { %3048 = vmatpush1.bf16.msra.mxu0 %v4446_v61 }
 0x1a8   :  { %3055 = vmatprep.subr.bf16.mxu0 %v4546_v1 }
 0x1a9   :  { %3244 = vmatpush1.bf16.msra.mxu1 %v4443_v30 }
 0x1aa   :  { %3245 = vmatprep.subr.bf16.mxu1 %v4546_v1 }
 0x1ab   :  { %3056 = vmatpush2.bf16.msra.mxu0 %v3031_v9 }
 0x1ac   :  { %3057 = vmatprep.subr.bf16.mxu0 %v4546_v1 }
 0x1ad   :  { %3246 = vmatpush1.bf16.msra.mxu1 %v4445_v35 }
 0x1ae   :  { %3247 = vmatprep.subr.bf16.mxu1 %v4546_v1  ;;  %v1467_v43 = vpop.f32.mrf.mxu0 }
 0x1af   :  { %v1473_v37 = vadd.f32 %v1467_v43, %v6159_v62  ;;  %3058 = vmatpush2.bf16.msra.mxu0 %v4450_v60 }
 0x1b0   :  { %v1469_v47 = vpop.f32.mrf.mxu0  ;;  %3059 = vmatprep.subr.bf16.mxu0 %v4546_v1 }
 0x1b1   :  { %3248 = vmatpush1.bf16.msra.mxu1 %v4447_v31 }
 0x1b2   :  { %3255 = vmatprep.subr.bf16.mxu1 %v4546_v1  ;;  %v1470_v39 = vpop.f32.mrf.mxu0 }
 0x1b3   :  { %3060 = vmatpush2.bf16.msra.mxu0 %v4452_v38  ;;  %v4202_v38 = vld [vmem:[%s6338_s4] ss:$0 sm:$0xff] }
 0x1b4   :  { %v1471_v41 = vpop.f32.mrf.mxu0  ;;  %3061 = vmatprep.subr.bf16.mxu0 %v4546_v1 }
 0x1b5   :  { %3256 = vmatpush2.bf16.msra.mxu1 %v3231_v4 }
 0x1b6   :  { %3257 = vmatprep.subr.bf16.mxu1 %v4546_v1 }
 0x1b7   :  { %3062 = vmatpush2.bf16.msra.mxu0 %v4454_v34 }
 0x1b8   :  { %v1667_v42 = vpop.f32.mrf.mxu1  ;;  %3063 = vmatprep.subr.bf16.mxu0 %v4546_v1 }
 0x1b9   :  { %v1673_v20 = vadd.f32 %v1667_v42, %v1473_v37  ;;  %3258 = vmatpush2.bf16.msra.mxu1 %v4451_v49  ;;  %v3395_v42 = vld [vmem:[%s6341_s7] sm:$0x3] }
 0x1ba   :  { %v1669_v26 = vpop.f32.mrf.mxu1  ;;  %3259 = vmatprep.subr.bf16.mxu1 %v4546_v1 }
 0x1bb   :  { %3064 = vmatpush2.bf16.msra.mxu0 %v4456_v14 }
 0x1bc   :  { %v1670_v28 = vpop.f32.mrf.mxu1  ;;  %4221 = vmatprep.subr.bf16.mxu0 %v4548_v40 }
 0x1bd   :  { %3260 = vmatpush2.bf16.msra.mxu1 %v4453_v45 }
 0x1be   :  { %v1671_v48 = vpop.f32.mrf.mxu1  ;;  %3261 = vmatprep.subr.bf16.mxu1 %v4546_v1  ;;  %3066 = vmatmul.mubr.bf16.vlgmr.msra.gmra.mxu0 %v2924_v46 }
 0x1bf   :  { %4222 = vmatpush3.bf16.msra.mxu0 %v4458_v12  ;;  %4237 = vmatprep.mubr.msk.bf16.mxu0 %vm4549_vm2, %v4548_v40 }
 0x1c0   :  { %4223 = vmatprep.subr.bf16.mxu0 %v4548_v40 }
 0x1c1   :  { %3262 = vmatpush2.bf16.msra.mxu1 %v4455_v36 }
 0x1c2   :  { %3263 = vmatprep.subr.bf16.mxu1 %v4546_v1  ;;  %v4460_v1 = vld [vmem:[%s6339_s5 + $0x28] sm:$0xff]  }
 0x1c3   :  { %4224 = vmatpush3.bf16.msra.mxu0 %v4459_v53 }
 0x1c4   :  { %4225 = vmatprep.subr.bf16.mxu0 %v4548_v40 }
 0x1c5   :  { %3264 = vmatpush2.bf16.msra.mxu1 %v4457_v52  ;;  %v4203_v52 = vld [vmem:[%s6340_s6] ss:$0 sm:$0xff]  ;;  %s4550_s6 = smov [#allocation7]  }
 0x1c6   :  { %s3427_s7 = sshll.u32 %s4550_s6, 4  ;;  %s3428_s7 = int_to_ptr.vmem [resolvable:$true] %s3427_s7 }
 0x1c7   :  { %4226 = vmatpush3.bf16.msra.mxu0 %v4460_v1  ;;  %s4516_s23 = scalar_lea.vmem %s3428_s7, 32  ;;  %p4521_p11 = scmp.lt.s32.totalorder %s3428_s7, %s3428_s7 }
 0x1c8   :  { %3266 = vmatmul.mubr.bf16.vlgmr.msra.gmra.mxu1 %v3124_v13  ;;  %4227 = vmatprep.subr.bf16.mxu0 %v4548_v40  ;;  %v3406_v13 = vand.u32 127, %v118_v59  ;;  %p4517_p10 = scmp.ne.s32.totalorder %s3428_s7, %s4516_s23  ;;  %p4522_p12 = scmp.lt.s32.totalorder %s4516_s23, %s4516_s23 }
 0x1ca   :  { %vm3407_vm3 = vcmp.lt.s32.totalorder %v3406_v13, 10  ;;  %p4523_p13 = por %p4522_p12, %p4521_p11 }
 0x1cb   :  { %4228 = vmatpush3.bf16.msra.mxu0 %v4461_v58 }
 0x1cc   :  { %4229 = vmatprep.subr.bf16.mxu0 %v4548_v40  ;;  %p4524_p0 = pnand %p4523_p13, %p4517_p10 }
 0x1cf   :  { %4230 = vmatpush3.bf16.msra.mxu0 %v4462_v51 }
 0x1d0   :  { %4231 = vmatprep.subr.bf16.mxu0 %v4548_v40 }
 0x1d3   :  { %4232 = vmatpush3.bf16.msra.mxu0 %v4463_v7 }
 0x1d4   :  { %4233 = vmatprep.subr.bf16.mxu0 %v4548_v40 }
 0x1d7   :  { %4234 = vmatpush3.bf16.msra.mxu0 %v4464_v10 }
 0x1d8   :  { %4235 = vmatprep.subr.bf16.mxu0 %v4548_v40 }
 0x1db   :  { %4236 = vmatpush3.bf16.msra.mxu0 %v4465_v32 }
 0x1e2   :  { %v1867_v54 = vpop.f32.mrf.mxu0 }
 0x1e3   :  { %v1873_v5 = vadd.f32 %v1867_v54, %v1673_v20  ;;  %v3396_v20 = vadd.f32 1e-12, %v3395_v42 }
 0x1e4   :  { %v1869_v57 = vpop.f32.mrf.mxu0 }
 0x1e5   :  { %4466 = vlog2.f32 %v3396_v20 }
 0x1e6   :  { %v1870_v22 = vpop.f32.mrf.mxu0 }
 0x1e8   :  { %v1871_v62 = vpop.f32.mrf.mxu0 }
 0x1ec   :  { %v2067_v0 = vpop.f32.mrf.mxu1 }
 0x1ed   :  { %v2073_v3 = vadd.f32 %v2067_v0, %v1873_v5 }
 0x1ee   :  { %v2069_v21 = vpop.f32.mrf.mxu1 }
 0x1f0   :  { %v2070_v63 = vpop.f32.mrf.mxu1 }
 0x1f2   :  { %v2071_v6 = vpop.f32.mrf.mxu1  ;;  %v4467_v45 = vpop.eup %4466 }
 0x1f3   :  { %v3398_v26 = vmul.f32 0.6931472, %v4467_v45 }
 0x1f5   :  { %v3399_v46 = vsub.f32 0.0, %v3398_v26 }
 0x1f7   :  { %v3400_v28 = vadd.f32 1e-12, %v3399_v46 }
 0x1f9   :  { %4468 = vlog2.f32 %v3400_v28 }
 0x206   :  { %v4469_v36 = vpop.eup %4468 }
 0x207   :  { %v3402_v48 = vmul.f32 0.6931472, %v4469_v36 }
 0x209   :  { %v3403_v12 = vsub.f32 0.0, %v3402_v48 }
 0x216   :  { %v2267_v11 = vpop.f32.mrf.mxu0 }
 0x217   :  { %v2273_v50 = vadd.f32 %v2267_v11, %v2073_v3 }
 0x218   :  { %v2269_v24 = vpop.f32.mrf.mxu0 }
 0x21a   :  { %v2270_v29 = vpop.f32.mrf.mxu0 }
 0x21c   :  { %v2271_v15 = vpop.f32.mrf.mxu0 }
 0x220   :  { %v2467_v16 = vpop.f32.mrf.mxu1 }
 0x221   :  { %v2473_v17 = vadd.f32 %v2467_v16, %v2273_v50 }
 0x222   :  { %v2469_v18 = vpop.f32.mrf.mxu1 }
 0x224   :  { %v2470_v2 = vpop.f32.mrf.mxu1 }
 0x226   :  { %v2471_v27 = vpop.f32.mrf.mxu1 }
 0x24a   :  { %v2667_v44 = vpop.f32.mrf.mxu0 }
 0x24b   :  { %v2673_v9 = vadd.f32 %v2667_v44, %v2473_v17 }
 0x24c   :  { %v2669_v19 = vpop.f32.mrf.mxu0 }
 0x24e   :  { %v2670_v8 = vpop.f32.mrf.mxu0 }
 0x250   :  { %v2671_v23 = vpop.f32.mrf.mxu0 }
 0x254   :  { %v2867_v56 = vpop.f32.mrf.mxu1 }
 0x255   :  { %v2873_v31 = vadd.f32 %v2867_v56, %v2673_v9 }
 0x256   :  { %v2869_v25 = vpop.f32.mrf.mxu1 }
 0x258   :  { %v2870_v61 = vpop.f32.mrf.mxu1 }
 0x25a   :  { %v2871_v55 = vpop.f32.mrf.mxu1 }
 0x27e   :  { %v3067_v30 = vpop.f32.mrf.mxu0 }
 0x27f   :  { %v3073_v43 = vadd.f32 %v3067_v30, %v2873_v31 }
 0x280   :  { %v3069_v35 = vpop.f32.mrf.mxu0 }
 0x282   :  { %v3070_v60 = vpop.f32.mrf.mxu0 }
 0x284   :  { %v3071_v33 = vpop.f32.mrf.mxu0 }
 0x288   :  { %v3267_v37 = vpop.f32.mrf.mxu1 }
 0x289   :  { %v3273_v47 = vadd.f32 %v3267_v37, %v3073_v43 }
 0x28a   :  { %v3269_v4 = vpop.f32.mrf.mxu1 }
 0x28b   :  { %v3281_v39 = vadd.f32 %v4202_v38, %v3273_v47 }
 0x28c   :  { %v3270_v34 = vpop.f32.mrf.mxu1 }
 0x28d   :  { %v3282_v41 = vmax.f32 %v3281_v39, 0.0 }
 0x28e   :  { %v3271_v49 = vpop.f32.mrf.mxu1 }
 0x28f   :  { %v3283_v14 = vpack.c.bf16 %v3282_v41, %v3282_v41 }
 0x291   :  { %4238 = vmatmul.mubr.bf16.vlgmr.msra.gmra.mxu0 %v3283_v14 }
 0x351   :  { %v3389_v40 = vpop.f32.mrf.mxu0 }
 0x352   :  { %v3390_v53 = vadd.f32 %v4203_v52, %v3389_v40 }
 0x353   :  { %v4239_v1 = vpop.f32.mrf.mxu0 }
 0x354   :  { %v3404_v54 = vadd.f32 %v3403_v12, %v3390_v53 }
 0x355   :  { %v3392_v5 = vpop.f32.mrf.mxu0 }
 0x356   :  { %v3408_v57 = vsel %vm3407_vm3, %v3404_v54, -1e+30 }
 0x357   :  { %v4240_v58 = vpop.f32.mrf.mxu0  ;;  %v3409_v22 = vsel %vm309_vm0, %v3408_v57, -inf }
 0x358   :  { %3410 = vmax.xlane.f32.xlu0 %v3409_v22 }
 0x3e1   :  { %v3411_v62 = vpop.xlane.xlu0 %3410 }
 0x3e2   :  { %v3412_v51 = vsub.f32 %v3408_v57, %v3411_v62 }
 0x3e4   :  { %v3413_v0 = vmul.f32 1.442695, %v3412_v51 }
 0x3e6   :  { %4470 = vpow2.f32 %v3413_v0 }
 0x3f3   :  { %v4471_v3 = vpop.eup %4470 }
 0x3f4   :  { %v3415_v21 = vsel %vm309_vm0, %v4471_v3, 0.0 }
 0x3f5   :  { %3416 = vadd.xlane.f32.xlu0 %v3415_v21 }
 0x47e   :  { %v3417_v59 = vpop.xlane.xlu0 %3416 }
 0x47f   :  { %4472 = vrcp.f32 %v3417_v59 }
 0x48c   :  { %v4473_v63 = vpop.eup %4472 }
 0x48d   :  { %v3419_v6 = vmul.f32 %v4473_v63, %v4471_v3 }
 0x48f   :  { %3420 = vst [vmem:[#allocation7] sm:$0x3] %v3419_v6 }
 0x490   :  { %4527 = shalt.err (!%p4524_p0)
}
 0x491   :  { %3430 = dma.vmem_to_hbm [thread:$0]  %s3428_s7, 32, %s6342_s8, [#allocation3]  }
 0x492   :  { %4540 = dma.done.wait [#allocation3], 32  }
 0x493   :  { %4541 = vsyncadd [#allocation3], 4294967264 }
 0x494   :  { %3434 = vsyncpa [#allocation3], 1 }
 0x495   :  { %3435 = vsyncpa [#allocation4], 1 }
 0x496   :  { %3436 = vsyncpa [#allocation6], 1 }

</bundles_post_ra>
